<compile_context>
chip_gen: v7x
topology: tpu7x:2x2x1
jax: 0.10.0
libtpu: 0.0.40
codegen_flags: <defaults>
</compile_context>

<pallas_src>
import functools

import jax
import jax.numpy as jnp
from jax import lax
from jax.experimental import pallas as pl
from jax.experimental.pallas import tpu as pltpu

LANE = 128


def _round_up(v, m):
    return -(-v // m) * m


def _pick_tco(cout_p):
    for t in (512, 256, LANE):
        if cout_p % t == 0:
            return t
    return LANE


def _mosaic_params(vmem_bytes):
    # Scoped-VMEM budget sized from the actual working set (the v5e default of
    # 16 MiB is what we need to escape); capped below v5e/v6e physical and not
    # blindly set to v7x's entire 64 MiB.
    lim = int(min(max(vmem_bytes, 24 << 20), 96 << 20))
    return pltpu.CompilerParams(
        dimension_semantics=("parallel", "parallel"),
        vmem_limit_bytes=lim,
    )


def _roll_flat(v, d):
    """result[p] = v[(p + d) % M] along axis 0 (circular XLU sublane roll).

    Callers guarantee every wrapped row either lands in a junk output column
    (u >= wo) or is masked afterwards, so no zero-fill is needed.
    """
    m = v.shape[0]
    k = (-d) % m
    if k == 0:
        return v
    return pltpu.roll(v, shift=k, axis=0)


# ----------------------------- kernels --------------------------------------
def _conv3x3_acc(x_ref, w3_ref, ho):
    """3x3 conv over a spatially pre-padded, stride-folded input.

    x_ref : (Aq, s, Uq, s*Cp)  space-to-depth view of the padded input
    w3_ref: (3, 3*Cp, Tco)     kx-major contraction layout (BN scale folded in)
    Returns an f32 (ho*Uq, Tco) accumulator; folded columns u >= Wo are junk.
    """
    s, uq = x_ref.shape[1], x_ref.shape[2]
    cp = x_ref.shape[3] // s
    tco = w3_ref.shape[-1]
    per_tap = cp >= 256      # per-tap K already fills a 256-deep MXU
    acc = jnp.zeros((ho * uq, tco), jnp.float32)
    for ky in range(3):
        a_off, b = ky // s, ky % s
        slab = x_ref[a_off:a_off + ho, b, :, :].reshape(ho * uq, s * cp)
        wk = w3_ref[ky]                                     # (3*cp, tco)
        taps = [_roll_flat(slab[:, (kx % s) * cp:(kx % s + 1) * cp], kx // s)
                for kx in range(3)]
        if per_tap:
            for kx in range(3):
                acc = acc + jnp.dot(taps[kx], wk[kx * cp:(kx + 1) * cp, :],
                                    preferred_element_type=jnp.float32)
        else:
            acc = acc + jnp.dot(jnp.concatenate(taps, axis=-1), wk,
                                preferred_element_type=jnp.float32)
    return acc


def _conv_bn_relu_kernel(x_ref, w3_ref, b_ref, out_ref, *, relu):
    ho = out_ref.shape[1] // x_ref.shape[2]
    out = _conv3x3_acc(x_ref, w3_ref, ho) + b_ref[0].astype(jnp.float32)
    if relu:
        out = jnp.maximum(out, 0.0)
    out_ref[0] = out.astype(out_ref.dtype)


def _conv_bn_add_relu_kernel(y_ref, w3_ref, b_ref, xq_ref, *rest,
                             ho, uq, wo, project):
    """Second 3x3 conv + BN + fused shortcut + ReLU, reading conv1's RAW
    folded output (no HBM repack).

    y_ref : (1, ho*uq, Cmid_p)  conv1 output; folded columns u >= wo hold
            bias/relu garbage and, once zeroed here, double as the left/right
            spatial zero-halo for the taps.
    xq_ref: the block's own folded input (shortcut operand).
    """
    if project:
        ws_ref, bs_ref, out_ref = rest
    else:
        (out_ref,) = rest
    cm = y_ref.shape[2]
    tco = out_ref.shape[2]
    m = ho * uq
    per_tap = cm >= 256

    row = lax.broadcasted_iota(jnp.int32, (m, 1), 0)        # flattened index p
    # zero the junk columns: they become the column zero-halo
    y = jnp.where(row % uq < wo, y_ref[0], 0.0)

    acc = jnp.zeros((m, tco), jnp.float32)
    for ky in range(3):
        wk = w3_ref[ky]                                     # (3*cm, tco)

        # flattened shift d = (ky-1)*uq + (kx-1): lhs[p] = y[p + d].  Column
        # halos come for free from the zeroed junk columns; only the vertical
        # halos (output row 0 for ky=0, row ho-1 for ky=2) need masking.
        def vmask(a, _ky=ky):
            if _ky == 0:
                return jnp.where(row >= uq, a, 0.0)
            if _ky == 2:
                return jnp.where(row < (ho - 1) * uq, a, 0.0)
            return a

        taps = [_roll_flat(y, (ky - 1) * uq + (kx - 1)) for kx in range(3)]
        if per_tap:
            for kx in range(3):
                acc = acc + jnp.dot(vmask(taps[kx]),
                                    wk[kx * cm:(kx + 1) * cm, :],
                                    preferred_element_type=jnp.float32)
        else:
            acc = acc + jnp.dot(vmask(jnp.concatenate(taps, axis=-1)), wk,
                                preferred_element_type=jnp.float32)
    acc = acc + b_ref[0].astype(jnp.float32)

    # fused shortcut: centre tap of the block input's fold
    s_sc = xq_ref.shape[1]
    o_c, j_c = 1 // s_sc, 1 % s_sc
    if project:
        cpx = xq_ref.shape[3] // s_sc
        piece = xq_ref[o_c:o_c + ho, j_c, :, j_c * cpx:(j_c + 1) * cpx]
    else:
        piece = xq_ref[o_c:o_c + ho, j_c, :, :]  # channel tile picked by BlockSpec
    piece = _roll_flat(piece.reshape(m, piece.shape[-1]), o_c)
    if project:
        sc = jnp.dot(piece, ws_ref[...], preferred_element_type=jnp.float32)
        sc = sc + bs_ref[0].astype(jnp.float32)
    else:
        # TODO(synk): in bf16 compute mode the identity residual is read at
        # bf16 (input already quantized); PyTorch adds it at full precision.
        sc = piece.astype(jnp.float32)

    out_ref[0] = jnp.maximum(acc + sc, 0.0).astype(out_ref.dtype)


# ----------------------------- pallas_call wrappers --------------------------
def _conv3x3_bn_relu(xq, w3, bias, *, n, ho, cout_p, out_dtype, relu=True):
    aq = xq.shape[0] // n
    s, uq, scp = xq.shape[1], xq.shape[2], xq.shape[3]
    tco = _pick_tco(cout_p)
    nj = cout_p // tco
    kernel = functools.partial(_conv_bn_relu_kernel, relu=relu)

    esz = jnp.dtype(xq.dtype).itemsize
    blk = (aq * s * uq * scp + 3 * w3.shape[1] * tco + ho * uq * tco) * esz
    tmp = ho * uq * (3 * (scp // s) + 2 * tco) * 4
    return pl.pallas_call(
        kernel,
        out_shape=jax.ShapeDtypeStruct((n, ho * uq, cout_p), out_dtype),
        grid=(nj, n),            # Cout tile outermost: each weight tile is DMA'd once
        in_specs=[
            pl.BlockSpec((aq, s, uq, scp), lambda j, i: (i, 0, 0, 0)),
            pl.BlockSpec((3, w3.shape[1], tco), lambda j, i: (0, 0, j)),
            pl.BlockSpec((1, tco), lambda j, i: (0, j)),
        ],
        out_specs=pl.BlockSpec((1, ho * uq, tco), lambda j, i: (i, 0, j)),
        compiler_params=_mosaic_params(2 * blk + 2 * tmp + (8 << 20)),
    )(xq, w3, bias)


def _conv3x3_bn_add_relu(y1, w3, bias, xq, ws, bs, *, n, ho, uq, wo, cout_p,
                         out_dtype):
    cm = y1.shape[2]
    aqx, sx, uqx, scpx = xq.shape[0] // n, xq.shape[1], xq.shape[2], xq.shape[3]
    assert uqx == uq
    tco = _pick_tco(cout_p)
    nj = cout_p // tco
    project = ws is not None
    kernel = functools.partial(_conv_bn_add_relu_kernel, ho=ho, uq=uq, wo=wo,
                               project=project)

    in_specs = [
        pl.BlockSpec((1, ho * uq, cm), lambda j, i: (i, 0, 0)),
        pl.BlockSpec((3, w3.shape[1], tco), lambda j, i: (0, 0, j)),
        pl.BlockSpec((1, tco), lambda j, i: (0, j)),
    ]
    args = [y1, w3, bias]
    if project:
        in_specs += [
            pl.BlockSpec((aqx, sx, uqx, scpx), lambda j, i: (i, 0, 0, 0)),
            pl.BlockSpec((scpx // sx, tco), lambda j, i: (0, j)),
            pl.BlockSpec((1, tco), lambda j, i: (0, j)),
        ]
        args += [xq, ws, bs]
    else:
        # identity residual: tile the (lane-padded) input channels with the Cout tile
        in_specs.append(pl.BlockSpec((aqx, 1, uqx, tco), lambda j, i: (i, 0, 0, j)))
        args.append(xq)

    esz = jnp.dtype(y1.dtype).itemsize
    blk = (ho * uq * cm + 3 * w3.shape[1] * tco + ho * uq * tco
           + aqx * sx * uqx * (scpx if project else tco)) * esz
    tmp = ho * uq * (3 * cm + 2 * tco) * 4
    return pl.pallas_call(
        kernel,
        out_shape=jax.ShapeDtypeStruct((n, ho * uq, cout_p), out_dtype),
        grid=(nj, n),            # Cout tile outermost: each weight tile is DMA'd once
        in_specs=in_specs,
        out_specs=pl.BlockSpec((1, ho * uq, tco), lambda j, i: (i, 0, j)),
        compiler_params=_mosaic_params(2 * blk + 2 * tmp + (8 << 20)),
    )(*args)


# ----------------------------- parameter prep --------------------------------
def _fold_w3(w_hwio, scale, cin_p, cout_p, cdt):
    """Fold BN scale into the 3x3 weights; pad channels; (3, 3*cin_p, cout_p)."""
    _, _, cin, cout = w_hwio.shape
    w = w_hwio.astype(jnp.float32) * scale.astype(jnp.float32)[None, None, None, :]
    w = jnp.pad(w, ((0, 0), (0, 0), (0, cin_p - cin), (0, cout_p - cout)))
    return w.reshape(3, 3 * cin_p, cout_p).astype(cdt)


def _pad_bias(b, cout_p):
    return jnp.pad(b.astype(jnp.float32), (0, cout_p - b.shape[0])).reshape(1, cout_p)


# ----------------------------- BasicBlock ------------------------------------
def init_basic_block_params(key, in_planes, planes, stride=1, eps=1e-5):
    keys = jax.random.split(key, 16)

    def bn(kg, kb, km, kv, c):
        gamma = jax.random.uniform(kg, (c,), jnp.float32, 0.5, 1.5)
        beta = jax.random.uniform(kb, (c,), jnp.float32, -0.5, 0.5)
        mean = jax.random.uniform(km, (c,), jnp.float32, -0.5, 0.5)
        var = jax.random.uniform(kv, (c,), jnp.float32, 0.5, 1.5)
        scale = gamma / jnp.sqrt(var + eps)
        bias = beta - mean * scale
        return scale, bias

    p = {"stride": stride, "has_shortcut": (stride != 1 or in_planes != planes)}
    p["w1"] = 0.1 * jax.random.normal(keys[0], (3, 3, in_planes, planes), jnp.float32)
    p["s1"], p["b1"] = bn(keys[1], keys[2], keys[3], keys[4], planes)
    p["w2"] = 0.1 * jax.random.normal(keys[5], (3, 3, planes, planes), jnp.float32)
    p["s2"], p["b2"] = bn(keys[6], keys[7], keys[8], keys[9], planes)
    if p["has_shortcut"]:
        p["ws"] = 0.1 * jax.random.normal(keys[10], (in_planes, planes), jnp.float32)
        p["ss"], p["bs"] = bn(keys[11], keys[12], keys[13], keys[14], planes)
    return p


def basic_block_forward(x, p, compute_dtype=jnp.float32):
    """x: (N, H, W, Cin) NHWC -> (N, Ho, Wo, planes).  Inference-mode BN.

    out = relu(bn2(conv2(relu(bn1(conv1(x))))) + shortcut(x))
    """
    # TODO(synk): training-mode BatchNorm (batch statistics) is not implemented;
    # running stats are folded into the conv weights/bias (inference semantics).
    n, h, w, cin = x.shape
    s = int(p["stride"])
    planes = p["w1"].shape[-1]
    ho, wo = (h - 1) // s + 1, (w - 1) // s + 1
    cin_p = _round_up(cin, LANE)
    cmid_p = _round_up(planes, LANE)
    cout_p = cmid_p
    cdt = compute_dtype

    # fold BN scales into weights, pad channels to lane width (done once; tiny)
    w3_1 = _fold_w3(p["w1"], p["s1"], cin_p, cmid_p, cdt)
    b1 = _pad_bias(p["b1"], cmid_p)
    w3_2 = _fold_w3(p["w2"], p["s2"], cmid_p, cout_p, cdt)
    b2 = _pad_bias(p["b2"], cout_p)
    if p["has_shortcut"]:
        ws = p["ws"].astype(jnp.float32) * p["ss"].astype(jnp.float32)[None, :]
        ws = jnp.pad(ws, ((0, cin_p - cin), (0, cout_p - planes))).astype(cdt)
        bs = _pad_bias(p["bs"], cout_p)
    else:
        ws = bs = None

    # ONE pad of the block input (halo + lane padding, width rounded to 8*s
    # sublanes) followed by a free space-to-depth reshape that folds the stride.
    hp = _round_up(h + 2, s)
    wp = _round_up(w + 2, 8 * s)
    aq1, uq1 = hp // s, wp // s
    # Roll-trick invariants: wrapped rows must land only in junk folded columns.
    assert uq1 >= wo + (2 // s), (uq1, wo, s)   # conv1 taps
    assert uq1 >= wo + 1, (uq1, wo)             # conv2 halo-from-junk-column
    xq = jnp.pad(x.astype(cdt), ((0, 0), (1, hp - h - 1), (1, wp - w - 1),
                                 (0, cin_p - cin)))
    xq = xq.reshape(n * aq1, s, uq1, s * cin_p)

    # conv1 + bn1 + relu  (stride folded into the layout -> 1/s^2 the work)
    y1 = _conv3x3_bn_relu(xq, w3_1, b1, n=n, ho=ho, cout_p=cmid_p,
                          out_dtype=cdt, relu=True)

    # conv2 + bn2 + fused shortcut + relu, reading y1 straight from HBM
    # (conv2 builds its own zero halo in-kernel -- no repack / extra round trip)
    out = _conv3x3_bn_add_relu(y1, w3_2, b2, xq, ws, bs, n=n, ho=ho, uq=uq1,
                               wo=wo, cout_p=cout_p, out_dtype=x.dtype)
    out = out.reshape(n, ho, uq1, cout_p)[:, :, :wo, :planes]
    return out


# ----------------------------- pure-JAX reference -----------------------------
def ref_forward(x_nhwc, p):
    dn = ("NHWC", "HWIO", "NHWC")
    s = p["stride"]

    def conv3(x, w, stride):
        return lax.conv_general_dilated(
            x, w, (stride, stride), ((1, 1), (1, 1)), dimension_numbers=dn)

    out = jnp.maximum(conv3(x_nhwc, p["w1"], s) * p["s1"] + p["b1"], 0.0)
    out = conv3(out, p["w2"], 1) * p["s2"] + p["b2"]
    if p["has_shortcut"]:
        ws = p["ws"].reshape(1, 1, *p["ws"].shape)
        sc = lax.conv_general_dilated(
            x_nhwc, ws, (s, s), "VALID", dimension_numbers=dn) * p["ss"] + p["bs"]
    else:
        sc = x_nhwc
    return jnp.maximum(out + sc, 0.0)


if __name__ == "__main__":
    key = jax.random.PRNGKey(0)
    N, H, W = 2, 16, 16
    small_cfgs = [
        (4, 8, 1),      # projection shortcut (in_planes != planes)
        (4, 4, 1),      # identity shortcut
        (4, 8, 2),      # stride-2 + projection shortcut
    ]
    big_cfgs = [
        (256, 256, 1),  # identity, per-tap MXU path in both convs, tco=256
        (128, 256, 2),  # stride-2 projection, per-tap conv2
    ]
    for i, (cin, planes, stride) in enumerate(small_cfgs + big_cfgs):
        k_x, k_p, key = jax.random.split(key, 3)
        x_nchw = jax.random.normal(k_x, (N, cin, H, W), jnp.float32)
        params = init_basic_block_params(k_p, cin, planes, stride)
        x_nhwc = jnp.transpose(x_nchw, (0, 2, 3, 1))
        ref = ref_forward(x_nhwc, params)

        out = basic_block_forward(x_nhwc, params, compute_dtype=jnp.float32)
        jax.block_until_ready(out)
        assert out.shape == ref.shape, f"shape mismatch cfg {i}"
        out_nchw = jnp.transpose(out, (0, 3, 1, 2))
        assert out_nchw.shape == (N, planes, (H - 1) // stride + 1,
                                  (W - 1) // stride + 1)

        if cin <= 8:
            # f32 strict check + bf16 loose check on the small configs
            assert jnp.allclose(out, ref, atol=2e-4, rtol=2e-4), f"f32 mismatch cfg {i}"
            out_bf = basic_block_forward(x_nhwc, params, compute_dtype=jnp.bfloat16)
            jax.block_until_ready(out_bf)
            assert jnp.allclose(out_bf.astype(jnp.float32), ref, atol=0.15, rtol=0.15), \
                f"bf16 mismatch cfg {i}"
        else:
            err = jnp.max(jnp.abs(out - ref)) / (jnp.max(jnp.abs(ref)) + 1e-6)
            assert err < 5e-3, f"f32 mismatch cfg {i}: rel err {err}"

    print("KERNEL_OK")
</pallas_src>

<mosaic_0001>
module attributes {stable_mosaic.version = 11 : i64} {
  func.func @_conv_bn_relu_kernel(%arg0: i32, %arg1: i32, %arg2: memref<18x1x24x128xf32, #tpu.memory_space<vmem>>, %arg3: memref<3x384x128xf32, #tpu.memory_space<vmem>>, %arg4: memref<1x128xf32, #tpu.memory_space<vmem>>, %arg5: memref<1x384x128xf32, #tpu.memory_space<vmem>>) attributes {dimension_semantics = [#tpu.dimension_semantics<parallel>, #tpu.dimension_semantics<parallel>], iteration_bounds = array<i64: 1, 2>, scalar_prefetch = 0 : i64, scratch_operands = 0 : i64, tpu.core_type = #tpu.core_type<tc>, window_params = [{transform_indices = @transform_0, window_bounds = array<i64: 18, 1, 24, 128>}, {transform_indices = @transform_1, window_bounds = array<i64: 3, 384, 128>}, {transform_indices = @transform_2, window_bounds = array<i64: 1, 128>}, {transform_indices = @transform_3, window_bounds = array<i64: 1, 384, 128>}]} {
    %cst = arith.constant 0.000000e+00 : f32
    %0 = vector.broadcast %cst : f32 to vector<384x128xf32>
    %c0 = arith.constant 0 : index
    %c0_0 = arith.constant 0 : index
    %c0_1 = arith.constant 0 : index
    %c0_2 = arith.constant 0 : index
    %1 = vector.load %arg2[%c0, %c0_0, %c0_1, %c0_2] : memref<18x1x24x128xf32, #tpu.memory_space<vmem>>, vector<16x1x24x128xf32>
    %2 = vector.shape_cast %1 : vector<16x1x24x128xf32> to vector<16x24x128xf32>
    %3 = vector.shape_cast %2 : vector<16x24x128xf32> to vector<384x128xf32>
    %c0_3 = arith.constant 0 : index
    %c0_4 = arith.constant 0 : index
    %c0_5 = arith.constant 0 : index
    %4 = vector.load %arg3[%c0_3, %c0_4, %c0_5] : memref<3x384x128xf32, #tpu.memory_space<vmem>>, vector<1x384x128xf32>
    %5 = vector.shape_cast %4 : vector<1x384x128xf32> to vector<384x128xf32>
    %c383_i32 = arith.constant 383 : i32
    %6 = tpu.dynamic_rotate %3 by %c383_i32 dim 0 : vector<384x128xf32>, i32 -> vector<384x128xf32>
    %c382_i32 = arith.constant 382 : i32
    %7 = tpu.dynamic_rotate %3 by %c382_i32 dim 0 : vector<384x128xf32>, i32 -> vector<384x128xf32>
    %8 = tpu.concatenate %3, %6, %7 in 1 : vector<384x128xf32>, vector<384x128xf32>, vector<384x128xf32> -> vector<384x384xf32>
    %cst_6 = arith.constant dense<0.000000e+00> : vector<384x128xf32>
    %9 = tpu.matmul %8, %5, %cst_6 {dimension_numbers = #tpu.dot_dimension_numbers<[1], [0], [0], [1], [0, 0, 1, 1], [], []>} : vector<384x384xf32>, vector<384x128xf32>, vector<384x128xf32> -> vector<384x128xf32>
    %10 = arith.addf %0, %9 : vector<384x128xf32>
    %c1 = arith.constant 1 : index
    %c0_7 = arith.constant 0 : index
    %c0_8 = arith.constant 0 : index
    %c0_9 = arith.constant 0 : index
    %11 = vector.load %arg2[%c1, %c0_7, %c0_8, %c0_9] : memref<18x1x24x128xf32, #tpu.memory_space<vmem>>, vector<16x1x24x128xf32>
    %12 = vector.shape_cast %11 : vector<16x1x24x128xf32> to vector<16x24x128xf32>
    %13 = vector.shape_cast %12 : vector<16x24x128xf32> to vector<384x128xf32>
    %c1_10 = arith.constant 1 : index
    %c0_11 = arith.constant 0 : index
    %c0_12 = arith.constant 0 : index
    %14 = vector.load %arg3[%c1_10, %c0_11, %c0_12] : memref<3x384x128xf32, #tpu.memory_space<vmem>>, vector<1x384x128xf32>
    %15 = vector.shape_cast %14 : vector<1x384x128xf32> to vector<384x128xf32>
    %c383_i32_13 = arith.constant 383 : i32
    %16 = tpu.dynamic_rotate %13 by %c383_i32_13 dim 0 : vector<384x128xf32>, i32 -> vector<384x128xf32>
    %c382_i32_14 = arith.constant 382 : i32
    %17 = tpu.dynamic_rotate %13 by %c382_i32_14 dim 0 : vector<384x128xf32>, i32 -> vector<384x128xf32>
    %18 = tpu.concatenate %13, %16, %17 in 1 : vector<384x128xf32>, vector<384x128xf32>, vector<384x128xf32> -> vector<384x384xf32>
    %cst_15 = arith.constant dense<0.000000e+00> : vector<384x128xf32>
    %19 = tpu.matmul %18, %15, %cst_15 {dimension_numbers = #tpu.dot_dimension_numbers<[1], [0], [0], [1], [0, 0, 1, 1], [], []>} : vector<384x384xf32>, vector<384x128xf32>, vector<384x128xf32> -> vector<384x128xf32>
    %20 = arith.addf %10, %19 : vector<384x128xf32>
    %c2 = arith.constant 2 : index
    %c0_16 = arith.constant 0 : index
    %c0_17 = arith.constant 0 : index
    %c0_18 = arith.constant 0 : index
    %21 = vector.load %arg2[%c2, %c0_16, %c0_17, %c0_18] : memref<18x1x24x128xf32, #tpu.memory_space<vmem>>, vector<16x1x24x128xf32>
    %22 = vector.shape_cast %21 : vector<16x1x24x128xf32> to vector<16x24x128xf32>
    %23 = vector.shape_cast %22 : vector<16x24x128xf32> to vector<384x128xf32>
    %c2_19 = arith.constant 2 : index
    %c0_20 = arith.constant 0 : index
    %c0_21 = arith.constant 0 : index
    %24 = vector.load %arg3[%c2_19, %c0_20, %c0_21] : memref<3x384x128xf32, #tpu.memory_space<vmem>>, vector<1x384x128xf32>
    %25 = vector.shape_cast %24 : vector<1x384x128xf32> to vector<384x128xf32>
    %c383_i32_22 = arith.constant 383 : i32
    %26 = tpu.dynamic_rotate %23 by %c383_i32_22 dim 0 : vector<384x128xf32>, i32 -> vector<384x128xf32>
    %c382_i32_23 = arith.constant 382 : i32
    %27 = tpu.dynamic_rotate %23 by %c382_i32_23 dim 0 : vector<384x128xf32>, i32 -> vector<384x128xf32>
    %28 = tpu.concatenate %23, %26, %27 in 1 : vector<384x128xf32>, vector<384x128xf32>, vector<384x128xf32> -> vector<384x384xf32>
    %cst_24 = arith.constant dense<0.000000e+00> : vector<384x128xf32>
    %29 = tpu.matmul %28, %25, %cst_24 {dimension_numbers = #tpu.dot_dimension_numbers<[1], [0], [0], [1], [0, 0, 1, 1], [], []>} : vector<384x384xf32>, vector<384x128xf32>, vector<384x128xf32> -> vector<384x128xf32>
    %30 = arith.addf %20, %29 : vector<384x128xf32>
    %c0_25 = arith.constant 0 : index
    %c0_26 = arith.constant 0 : index
    %31 = vector.load %arg4[%c0_25, %c0_26] : memref<1x128xf32, #tpu.memory_space<vmem>>, vector<1x128xf32>
    %32 = vector.shape_cast %31 : vector<1x128xf32> to vector<128xf32>
    %33 = vector.shape_cast %32 : vector<128xf32> to vector<1x128xf32>
    %34 = vector.broadcast %33 : vector<1x128xf32> to vector<384x128xf32>
    %35 = arith.addf %30, %34 : vector<384x128xf32>
    %cst_27 = arith.constant 0.000000e+00 : f32
    %36 = vector.broadcast %cst_27 : f32 to vector<384x128xf32>
    %37 = arith.maximumf %35, %36 : vector<384x128xf32>
    %c0_28 = arith.constant 0 : index
    %c0_29 = arith.constant 0 : index
    %c0_30 = arith.constant 0 : index
    %38 = vector.load %arg5[%c0_28, %c0_29, %c0_30] : memref<1x384x128xf32, #tpu.memory_space<vmem>>, vector<1x384x128xf32>
    %39 = vector.shape_cast %38 : vector<1x384x128xf32> to vector<384x128xf32>
    %40 = vector.shape_cast %37 : vector<384x128xf32> to vector<1x384x128xf32>
    tpu.vector_store %arg5[%c0_28, %c0_29, %c0_30], %40 {strides = array<i32>} : memref<1x384x128xf32, #tpu.memory_space<vmem>>, vector<1x384x128xf32>,
    return
  }
  func.func @transform_0(%arg0: i32, %arg1: i32) -> (i32, i32, i32, i32) {
    %c0_i32 = arith.constant 0 : i32
    %c0_i32_0 = arith.constant 0 : i32
    %c0_i32_1 = arith.constant 0 : i32
    %c0_i32_2 = arith.constant 0 : i32
    return %arg1, %c0_i32, %c0_i32_0, %c0_i32_1 : i32, i32, i32, i32
  }
  func.func @transform_1(%arg0: i32, %arg1: i32) -> (i32, i32, i32) {
    %c0_i32 = arith.constant 0 : i32
    %c0_i32_0 = arith.constant 0 : i32
    %c0_i32_1 = arith.constant 0 : i32
    return %c0_i32, %c0_i32_0, %arg0 : i32, i32, i32
  }
  func.func @transform_2(%arg0: i32, %arg1: i32) -> (i32, i32) {
    %c0_i32 = arith.constant 0 : i32
    %c0_i32_0 = arith.constant 0 : i32
    return %c0_i32, %arg0 : i32, i32
  }
  func.func @transform_3(%arg0: i32, %arg1: i32) -> (i32, i32, i32) {
    %c0_i32 = arith.constant 0 : i32
    %c0_i32_0 = arith.constant 0 : i32
    return %arg1, %c0_i32, %arg0 : i32, i32, i32
  }
}

</mosaic_0001>

<bundles_post_ra>
// kernel: tpu_custom_call.1
= control target key start
LH: loop header
LB: loop body
LE: loop exit
PB: predicated region body
PF: predicated region fallthrough
CT: control target
= control target key end

     0   :  { %8 = vsyncpa [#allocation3], 0  ;;  %s6956_s0 = inlined_call_operand.hbm [shape: f32[36,1,24,128], index: 0, kind: input, shape index: {}]   ;;  %s6957_s1 = inlined_call_operand.hbm [shape: f32[3,384,128], index: 1, kind: input, shape index: {}]   ;;  %s6958_s2 = inlined_call_operand.vmem [shape: f32[1,128], index: 2, kind: input, shape index: {}]   ;;  %s6959_s3 = inlined_call_operand.hbm [shape: f32[2,384,128], index: 3, kind: output, shape index: {}]  }
   0x1   :  { %10 = vsyncpa [#allocation3 + $0x1], 0 }
   0x2   :  { %11 = vsyncpa [#allocation6], 0 }
   0x3   :  { %12 = vsyncpa [#allocation4], 0 }
   0x4   :  { %14 = vsyncpa [#allocation4 + $0x1], 0  ;;  %s4403_s12 = smov 0   ;;  %s4405_s13 = smov 0  }
   0x5   :  { %s4407_s14 = smov 0   ;;  %s4409_s15 = smov 0  }
   0x6   :  { %s4411_s16 = smov 0   ;;  %s4413_s17 = smov 0  }
   0x7 LB: > { %s3264_s18 = sadd.s32 4294967295, %s4373_s17   ;;  %s3265_s19 = sadd.s32 4294967294, %s4373_s17   ;;  %s4373_s17 = sphi %s4413_s17, %s20_s17   ;;  %s4369_s16 = sphi %s4411_s16, %s7216_s16   ;;  %s4365_s15 = sphi %s4409_s15, %s7215_s15   ;;  %s4361_s14 = sphi %s4407_s14, %s7214_s14   ;;  %s4357_s13 = sphi %s4405_s13, %s7213_s13   ;;  %s4353_s12 = sphi %s4403_s12, %s7212_s12  }
   0x8   : > { %p52_p0 = scmp.ne.s32.totalorder %s4357_s13, %s4353_s12  ;;  %p4437_p1 = scmp.eq.s32.totalorder %s3264_s18, 0 }
   0x9   : > { %p4441_p2 = scmp.eq.s32.totalorder %s3264_s18, 1  ;;  %p136_p3 = scmp.eq.s32.totalorder %s3265_s19, 1 }
   0xa   : > { %s6999_s20 = scalar_select %p4437_p1, 1, 0 }
   0xb   : > { %s7000_s21 = scalar_select %p4441_p2, 1, 0 }
   0xc   : > { %p4447_p4 = por %p4437_p1, %p52_p0  ;;  %p3266_p5 = scmp.ge.s32.totalorder %s4373_s17, 1 }
   0xd   : > { %p4452_p6 = por %p136_p3, %p52_p0  ;;  %p143_p7 = scmp.lt.s32.totalorder %s4373_s17, 3 }
   0xe   : > { %s7001_s22 = scalar_select %p4447_p4, 1, 0 }
   0xf   : > { %s7002_s23 = scalar_select %p4452_p6, 1, 0 }
  0x10   : > { %p4457_p8 = pnand %p3266_p5, %p143_p7  ;;  %s4375_s25 = smov [#allocation5]  }
  0x11   : > { %s157_s26 = sshll.u32 %s4375_s25, 4  ;;  %s29_s28 = sadd.s32 1, %s4369_s16  ;;  %s158_s26 = int_to_ptr.vmem [resolvable:$true] %s157_s26 }
  0x12   : > { %s7003_s24 = scalar_select %p4457_p8, 1, 0 }
  0x13   : > { %p4146_p9 = pneg %p4457_p8  ;;  %s4229_s4 = scalar_lea.hbm %s6957_s1, 18432 }
  0x14   : > { %p4230_p12 = scmp.ne.s32.totalorder %s6957_s1, %s4229_s4  ;;  %p4236_p5 = scmp.lt.u32.totalorder %s4229_s4, %s6957_s1 }
  0x15   : > { %p4466_p11 = pnand %p4146_p9, %p4437_p1 }
  0x17   : > { %p4231_p13 = pneg %p4466_p11 }
  0x19   : > { %p4232_p0 = pnand %p4231_p13, %p4230_p12 }
  0x1b   : > { %p4233_p3 = pneg %p4232_p0 }
  0x1d   : > { %p4238_p7 = pnand %p4236_p5, %p4233_p3 }
  0x1f   : > { %4241 = shalt.err (!%p4238_p7)
}
  0x20   : > { %s4242_s9 = scalar_lea.vmem %s158_s26, 18432  ;;  %p4250_p1 = scmp.lt.s32.totalorder %s158_s26, %s158_s26 }
  0x21   : > { %p4243_p9 = scmp.ne.s32.totalorder %s158_s26, %s4242_s9  ;;  %p4251_p4 = scmp.lt.s32.totalorder %s4242_s9, %s4242_s9 }
  0x23   : > { %p4245_p10 = pnand %p4243_p9, %p4231_p13  ;;  %p4252_p8 = por %p4251_p4, %p4250_p1 }
  0x25   : > { %p4246_p6 = pneg %p4245_p10 }
  0x27   : > { %p4253_p2 = pnand %p4252_p8, %p4246_p6 }
  0x29   : > { %4256 = shalt.err (!%p4253_p2)
}
  0x2a   : > { %s4376_s10 = smov 128   ;;  %s4377_s11 = smov 8  }
  0x2b   : > { %4149 = dma.hbm_to_vmem [thread:$0]  (!%p4466_p11), %s6957_s1, 18432, %s158_s26, [#allocation6], %s4376_s10, %s4376_s10, %s4377_s11  }
  0x2c   : > { %p30_p1 = scmp.ge.s32.totalorder %s29_s28, 2  ;;  %s39_s25 = sadd.s32 1, %s4361_s14 }
  0x2d   : > { %p46_p2 = scmp.ne.s32.totalorder %s4361_s14, %s4357_s13  ;;  %p47_p4 = scmp.eq.s32.totalorder %s4373_s17, 0 }
  0x2e   : > { %s7218_s28 = smov (%p30_p1, %s29_s28), 0  ;;  %p7005_p8 = scmp.ne.s32.totalorder %s7000_s21, 0 }
  0x2f   : > { %p48_p6 = por %p47_p4, %p46_p2  ;;  %s36_s27 = ssub.s32 %s4369_s16, %s7218_s28 }
  0x30   : > { %p4498_p10 = por %p7005_p8, %p46_p2  ;;  %p4159_p12 = scmp.lt.s32.totalorder %s4373_s17, 2 }
  0x31   : > { %p37_p13 = scmp.eq.s32.totalorder %s36_s27, 0  ;;  %s177_s30 = sand.u32 1, %s4361_s14  }
  0x32   : > { %s4133_s4 = smul.u32 432, %s177_s30  ;;  %p4512_p11 = pnand %p4159_p12, %p48_p6 }
  0x33   : > { %s4507_s5 = scalar_select %p37_p13, %s4361_s14, %s39_s25  }
  0x34   : > { %s4160_s26 = smul.u32 6912, %s4369_s16  ;;  %s181_s6 = scalar_lea.vmem [#allocation2], %s4133_s4 }
  0x35   : > { %s189_s7 = sshll.u32 %s181_s6, 4  ;;  %s4521_s19 = scalar_lea.sflag [#allocation3], %s177_s30  ;;  %s4510_s7 = int_to_ptr.vmem [resolvable:$true] %s189_s7 }
  0x36   : > { %s4519_s18 = scalar_lea.hbm %s6956_s0, %s4160_s26  ;;  %p4259_p3 = pneg %p4512_p11 }
  0x37   : > { %s4257_s25 = scalar_lea.hbm %s4519_s18, 6912  ;;  %s4262_s6 = scalar_lea.hbm %s6956_s0, 13824 }
  0x38   : > { %p4258_p0 = scmp.ne.s32.totalorder %s4519_s18, %s4257_s25  ;;  %p4263_p9 = scmp.lt.u32.totalorder %s4519_s18, %s6956_s0 }
  0x39   : > { %p4264_p1 = scmp.lt.u32.totalorder %s4262_s6, %s4257_s25  ;;  %p4266_p4 = scmp.lt.u32.totalorder %s4257_s25, %s4519_s18 }
  0x3a   : > { %p4260_p5 = pnand %p4259_p3, %p4258_p0 }
  0x3b   : > { %p4265_p2 = por %p4264_p1, %p4263_p9 }
  0x3c   : > { %p4261_p7 = pneg %p4260_p5 }
  0x3d   : > { %p4267_p6 = por %p4266_p4, %p4265_p2 }
  0x3f   : > { %p4268_p8 = pnand %p4267_p6, %p4261_p7 }
  0x41   : > { %4271 = shalt.err (!%p4268_p8)
}
  0x42   : > { %s4272_s30 = scalar_lea.vmem %s4510_s7, 6912  ;;  %s4378_s9 = smov [#allocation2]  }
  0x43   : > { %p4273_p12 = scmp.ne.s32.totalorder %s4510_s7, %s4272_s30  ;;  %s4277_s27 = sshll.u32 %s4378_s9, 4  ;;  %s4278_s27 = int_to_ptr.vmem [resolvable:$false] %s4277_s27 }
  0x44   : > { %s4279_s4 = scalar_lea.vmem %s4278_s27, 13824  ;;  %p4280_p5 = scmp.lt.s32.totalorder %s4510_s7, %s4278_s27 }
  0x45   : > { %p4275_p13 = pnand %p4273_p12, %p4259_p3  ;;  %p4281_p9 = scmp.lt.s32.totalorder %s4279_s4, %s4272_s30 }
  0x47   : > { %p4276_p0 = pneg %p4275_p13  ;;  %p4282_p1 = por %p4281_p9, %p4280_p5 }
  0x49   : > { %p4283_p2 = pnand %p4282_p1, %p4276_p0 }
  0x4b   : > { %4286 = shalt.err (!%p4283_p2)
}
  0x4c   : > { %4153 = dma.hbm_to_vmem [thread:$0]  (!%p4512_p11), %s4519_s18, 6912, %s4510_s7, %s4521_s19, %s4376_s10, %s4376_s10, %s4377_s11  }
  0x4d   : > { %p7008_p3 = scmp.ne.s32.totalorder %s7003_s24, 0 }
  0x4f   : > { %201 = sbr.rel (%p7008_p3) target bundleno = 809 (0x329), region = 32 }
  0x56   : > { %s4555_s25 = sand.u32 1, %s4357_s13   ;;  %p7009_p7 = scmp.ne.s32.totalorder %s7001_s22, 0 }
  0x57   : > { %s4135_s6 = smul.u32 432, %s4555_s25  ;;  %s204_s26 = scalar_lea.sflag [#allocation3], %s4555_s25 }
  0x59   : > { %s4559_s21 = scalar_lea.vmem [#allocation2], %s4135_s6 }
  0x5a   : > { %4340 = dma.done.wait (%p7009_p7), %s204_s26, 6912  }
  0x5b   : > { %4342 = vsyncadd (%p7009_p7), %s204_s26, 4294960384  ;;  %p7010_p11 = scmp.ne.s32.totalorder %s6999_s20, 0 }
  0x5d   : > { %4344 = dma.done.wait (%p7010_p11), [#allocation6], 18432  }
  0x5e   : > { %4346 = vsyncadd (%p7010_p11), [#allocation6], 4294948864  ;;  %v6965_v0 = vmov 0.0|0.0   ;;  %v583_v1 = vld [vmem:[#allocation5 + $0x180] sm:$0xff]  ;;  %v584_v2 = vld [vmem:[#allocation5 + $0x188] sm:$0xff]  ;;  %v385_v15 = vlaneseq  ;;  %s4136_s20 = smul.u32 384, %s4555_s25 }
  0x5f   : > { %3877 = vmatprep.subr.bf16.mxu0 %v6965_v0  ;;  %v615_v3 = vld [vmem:[#allocation5 + $0x280] sm:$0xff]  ;;  %v3878_v4 = vpack.c.bf16 %v584_v2, %v583_v1  ;;  %v616_v5 = vld [vmem:[#allocation5 + $0x288] sm:$0xff]  ;;  %v585_v6 = vld [vmem:[#allocation5 + $0x190] sm:$0xff]  ;;  %s4137_s11 = smul.u32 6144, %s4365_s15  ;;  %s3143_s15 = scalar_lea.sflag [#allocation4], %s4555_s25 }
  0x60   : > { %v586_v7 = vld [vmem:[#allocation5 + $0x198] sm:$0xff]  ;;  %v4570_v8 = vpack.c.bf16 %v616_v5, %v615_v3  ;;  %v617_v9 = vld [vmem:[#allocation5 + $0x290] sm:$0xff]  ;;  %v619_v13 = vld [vmem:[#allocation5 + $0x2a0] sm:$0xff]  ;;  %v4580_v22 = vshrl.u32 %v385_v15, 7  ;;  %s6699_s10 = scalar_lea.vmem [#allocation7], %s4136_s20  ;;  %s4380_s9 = smov [#allocation7]  }
  0x61   : > { %v618_v10 = vld [vmem:[#allocation5 + $0x298] sm:$0xff]  ;;  %3879 = vmatpush1.bf16.msra.mxu0 %v3878_v4  ;;  %v3881_v11 = vpack.c.bf16 %v586_v7, %v585_v6  ;;  %v620_v14 = vld [vmem:[#allocation5 + $0x2a8] sm:$0xff]  ;;  %v587_v16 = vld [vmem:[#allocation5 + $0x1a0] sm:$0xff]  ;;  %s3157_s7 = sshll.u32 %s6699_s10, 4  ;;  %s6903_s19 = scalar_lea.hbm %s6959_s3, %s4137_s11  ;;  %s6905_s7 = int_to_ptr.vmem [resolvable:$true] %s3157_s7 }
  0x62   : > { %v4572_v12 = vpack.c.bf16 %v618_v10, %v617_v9  ;;  %4117 = vmatprep.subr.bf16.mxu1 %v4570_v8  ;;  %3880 = vmatprep.subr.bf16.mxu0 %v6965_v0  ;;  %v588_v17 = vld [vmem:[#allocation5 + $0x1a8] sm:$0xff]  ;;  %v4578_v18 = vpack.c.bf16 %v620_v14, %v619_v13  ;;  %v621_v20 = vld [vmem:[#allocation5 + $0x2b0] sm:$0xff]  ;;  %v622_v21 = vld [vmem:[#allocation5 + $0x2b8] sm:$0xff]  ;;  %vm484_vm0 = vcmp.lt.s32.totalorder %v4580_v22, 6  ;;  %vm387_vm1 = vcmp.lt.s32.totalorder %v4580_v22, 7  ;;  %s4287_s30 = scalar_lea.vmem %s6905_s7, 6144 }
  0x63   : > { %4125 = vmatpush3.bf16.msra.mxu1 %v4570_v8  ;;  %v3884_v19 = vpack.c.bf16 %v588_v17, %v587_v16  ;;  %v589_v23 = vld [vmem:[#allocation5 + $0x1b0] sm:$0xff]  ;;  %v590_v24 = vld [vmem:[#allocation5 + $0x1b8] sm:$0xff]  ;;  %v4585_v25 = vpack.c.bf16 %v622_v21, %v621_v20  ;;  %v623_v28 = vld [vmem:[#allocation5 + $0x2c0] sm:$0xff]  ;;  %p4288_p4 = scmp.ne.s32.totalorder %s6905_s7, %s4287_s30  ;;  %s4291_s27 = sshll.u32 %s4380_s9, 4  ;;  %s4292_s27 = int_to_ptr.vmem [resolvable:$false] %s4291_s27 }
  0x64   : > { %4118 = vmatprep.subr.bf16.mxu1 %v4572_v12  ;;  %v4588_v26 = vld [vmem:[%s4559_s21 + $0x98] sm:$0xff]  ;;  %v3887_v27 = vpack.c.bf16 %v590_v24, %v589_v23  ;;  %v4592_v30 = vld [vmem:[%s4559_s21 + $0xa0] sm:$0xff]  ;;  %v4623_v55 = vld [vmem:[%s4559_s21 + $0xa8] sm:$0xff]  ;;  %s4293_s4 = scalar_lea.vmem %s4292_s27, 12288  ;;  %p4294_p12 = scmp.lt.s32.totalorder %s6905_s7, %s4292_s27 }
  0x65   : > { %3882 = vmatpush1.bf16.msra.mxu0 %v3881_v11  ;;  %v624_v29 = vld [vmem:[#allocation5 + $0x2c8] sm:$0xff]  ;;  %v6964_v31 = vrot.slane %v4588_v26, 2  ;;  %v591_v32 = vld [vmem:[#allocation5 + $0x1c0] sm:$0xff]  ;;  %v744_v34 = vrot.slane %v4592_v30, 2  ;;  %v625_v38 = vld [vmem:[#allocation5 + $0x2d0] sm:$0xff]  ;;  %v745_v1 = vrot.slane %v4623_v55, 2  ;;  %p4289_p6 = pnand %p4288_p4, %p4498_p10  ;;  %p4295_p13 = scmp.lt.s32.totalorder %s4293_s4, %s4287_s30 }
  0x66   : > { %3883 = vmatprep.subr.bf16.mxu0 %v6965_v0  ;;  %v592_v33 = vld [vmem:[#allocation5 + $0x1c8] sm:$0xff]  ;;  %v4599_v35 = vpack.c.bf16 %v624_v29, %v623_v28  ;;  %v626_v39 = vld [vmem:[#allocation5 + $0x2d8] sm:$0xff]  ;;  %v593_v40 = vld [vmem:[#allocation5 + $0x1d0] sm:$0xff] }
  0x67   : > { %4126 = vmatpush3.bf16.msra.mxu1 %v4572_v12  ;;  %v805_v36 = vsel %vm484_vm0, %v6964_v31, %v744_v34  ;;  %v3890_v37 = vpack.c.bf16 %v592_v33, %v591_v32  ;;  %v594_v41 = vld [vmem:[#allocation5 + $0x1d8] sm:$0xff]  ;;  %v4610_v42 = vpack.c.bf16 %v626_v39, %v625_v38  ;;  %v627_v44 = vld [vmem:[#allocation5 + $0x2e0] sm:$0xff]  ;;  %v628_v45 = vld [vmem:[#allocation5 + $0x2e8] sm:$0xff]  ;;  %v804_v13 = vsel %vm484_vm0, %v744_v34, %v745_v1  ;;  %p4290_p8 = pneg %p4289_p6  ;;  %p4296_p0 = por %p4295_p13, %p4294_p12 }
  0x68   : > { %4119 = vmatprep.subr.bf16.mxu1 %v4578_v18  ;;  %3621 = vmatprep.mubr.f32.mxu1 %v805_v36  ;;  %v3893_v43 = vpack.c.bf16 %v594_v41, %v593_v40  ;;  %v595_v46 = vld [vmem:[#allocation5 + $0x1e0] sm:$0xff]  ;;  %v596_v47 = vld [vmem:[#allocation5 + $0x1e8] sm:$0xff]  ;;  %v4615_v48 = vpack.c.bf16 %v628_v45, %v627_v44  ;;  %v629_v50 = vld [vmem:[#allocation5 + $0x2f0] sm:$0xff] }
  0x69   : > { %3885 = vmatpush1.bf16.msra.mxu0 %v3884_v19  ;;  %v3896_v49 = vpack.c.bf16 %v596_v47, %v595_v46  ;;  %v630_v51 = vld [vmem:[#allocation5 + $0x2f8] sm:$0xff]  ;;  %v597_v52 = vld [vmem:[#allocation5 + $0x1f0] sm:$0xff]  ;;  %v599_v60 = vld [vmem:[#allocation5 + $0x200] sm:$0xff]  ;;  %p4297_p5 = pnand %p4296_p0, %p4290_p8 }
  0x6a   : > { %3886 = vmatprep.subr.bf16.mxu0 %v6965_v0  ;;  %v598_v53 = vld [vmem:[#allocation5 + $0x1f8] sm:$0xff]  ;;  %v4620_v54 = vpack.c.bf16 %v630_v51, %v629_v50  ;;  %v4626_v57 = vld [vmem:[%s4559_s21 + $0xb0] sm:$0xff]  ;;  %v4633_v59 = vld [vmem:[%s4559_s21 + $0x20] sm:$0xff] }
  0x6b   : > { %4127 = vmatpush3.bf16.msra.mxu1 %v4578_v18  ;;  %v3899_v56 = vpack.c.bf16 %v598_v53, %v597_v52  ;;  %v4630_v58 = vld [vmem:[%s4559_s21 + $0x18] sm:$0xff]  ;;  %v632_v63 = vrot.slane %v4633_v59, 1  ;;  %v289_v2 = vld [vmem:[#allocation5] sm:$0xff]  ;;  %v746_v4 = vrot.slane %v4626_v57, 2  ;;  %v601_v10 = vld [vmem:[#allocation5 + $0x210] sm:$0xff] }
  0x6c   : > { %4120 = vmatprep.subr.bf16.mxu1 %v4585_v25  ;;  %v600_v61 = vld [vmem:[#allocation5 + $0x208] sm:$0xff]  ;;  %v4637_v62 = vrot.slane %v4630_v58, 1  ;;  %v4655_v9 = vld [vmem:[%s4559_s21 + $0xc0] sm:$0xff]  ;;  %v602_v11 = vld [vmem:[#allocation5 + $0x218] sm:$0xff] }
  0x6d   : > { %3888 = vmatpush1.bf16.msra.mxu0 %v3887_v27  ;;  %v290_v3 = vld [vmem:[#allocation5 + $0x8] sm:$0xff]  ;;  %v3902_v7 = vpack.c.bf16 %v600_v61, %v599_v60  ;;  %v803_v16 = vsel %vm484_vm0, %v745_v1, %v746_v4  ;;  %v291_v17 = vld [vmem:[#allocation5 + $0x10] sm:$0xff]  ;;  %v292_v19 = vld [vmem:[#allocation5 + $0x18] sm:$0xff]  ;;  %v748_v20 = vrot.slane %v4655_v9, 2  ;;  %v3905_v23 = vpack.c.bf16 %v602_v11, %v601_v10 }
  0x6e   : > { %3889 = vmatprep.subr.bf16.mxu0 %v6965_v0  ;;  %v4645_v5 = vld [vmem:[%s4559_s21 + $0xb8] sm:$0xff]  ;;  %v4652_v6 = vsel %vm387_vm1, %v4637_v62, %v632_v63  ;;  %v3958_v14 = vpack.c.bf16 %v290_v3, %v289_v2  ;;  %v4670_v21 = vld [vmem:[%s4559_s21 + $0xc8] sm:$0xff]  ;;  %v4673_v24 = vld [vmem:[%s4559_s21 + $0xd0] sm:$0xff]  ;;  %v3961_v32 = vpack.c.bf16 %v292_v19, %v291_v17 }
  0x6f   : > { %4128 = vmatpush3.bf16.msra.mxu1 %v4585_v25  ;;  %887 = vmatprep.mubr.f32.mxu0 %v4652_v6  ;;  %v747_v15 = vrot.slane %v4645_v5, 2  ;;  %v603_v27 = vld [vmem:[#allocation5 + $0x220] sm:$0xff]  ;;  %v604_v28 = vld [vmem:[#allocation5 + $0x228] sm:$0xff]  ;;  %v749_v33 = vrot.slane %v4670_v21, 2  ;;  %v750_v38 = vrot.slane %v4673_v24, 2  ;;  %v606_v44 = vld [vmem:[#allocation5 + $0x238] sm:$0xff] }
  0x70   : > { %4121 = vmatprep.subr.bf16.mxu1 %v4599_v35  ;;  %v293_v36 = vld [vmem:[#allocation5 + $0x20] sm:$0xff]  ;;  %v4684_v39 = vld [vmem:[%s4559_s21 + $0xd8] sm:$0xff]  ;;  %v3908_v40 = vpack.c.bf16 %v604_v28, %v603_v27  ;;  %v295_v50 = vld [vmem:[#allocation5 + $0x30] sm:$0xff] }
  0x71   : > { %3891 = vmatpush1.bf16.msra.mxu0 %v3890_v37  ;;  %v802_v29 = vsel %vm484_vm0, %v746_v4, %v747_v15  ;;  %v801_v34 = vsel %vm484_vm0, %v747_v15, %v748_v20  ;;  %v294_v37 = vld [vmem:[#allocation5 + $0x28] sm:$0xff]  ;;  %v4687_v41 = vld [vmem:[%s4559_s21 + $0xe0] sm:$0xff]  ;;  %v800_v45 = vsel %vm484_vm0, %v748_v20, %v749_v33  ;;  %v751_v47 = vrot.slane %v4684_v39, 2  ;;  %v296_v51 = vld [vmem:[#allocation5 + $0x38] sm:$0xff] }
  0x72   : > { %3892 = vmatprep.subr.bf16.mxu0 %v6965_v0  ;;  %v3964_v46 = vpack.c.bf16 %v294_v37, %v293_v36  ;;  %v752_v52 = vrot.slane %v4687_v41, 2  ;;  %v4698_v53 = vld [vmem:[%s4559_s21 + $0xe8] sm:$0xff]  ;;  %v4701_v60 = vld [vmem:[%s4559_s21 + $0xf0] sm:$0xff]  ;;  %v3967_v3 = vpack.c.bf16 %v296_v51, %v295_v50  ;;  %v4740_v51 = vld [vmem:[%s4559_s21 + $0x118] sm:$0xff] }
  0x73   : > { %4129 = vmatpush3.bf16.msra.mxu1 %v4599_v35  ;;  %v607_v61 = vld [vmem:[#allocation5 + $0x240] sm:$0xff]  ;;  %v608_v1 = vld [vmem:[#allocation5 + $0x248] sm:$0xff]  ;;  %v798_v2 = vsel %vm484_vm0, %v750_v38, %v751_v47  ;;  %v753_v4 = vrot.slane %v4698_v53, 2  ;;  %v609_v17 = vld [vmem:[#allocation5 + $0x250] sm:$0xff] }
  0x74   : > { %4122 = vmatprep.subr.bf16.mxu1 %v4610_v42  ;;  %v297_v10 = vld [vmem:[#allocation5 + $0x40] sm:$0xff]  ;;  %v298_v11 = vld [vmem:[#allocation5 + $0x48] sm:$0xff]  ;;  %v3914_v15 = vpack.c.bf16 %v608_v1, %v607_v61  ;;  %v610_v19 = vld [vmem:[#allocation5 + $0x258] sm:$0xff] }
  0x75   : > { %3894 = vmatpush1.bf16.msra.mxu0 %v3893_v43  ;;  %v605_v43 = vld [vmem:[#allocation5 + $0x230] sm:$0xff]  ;;  %v796_v20 = vsel %vm484_vm0, %v752_v52, %v753_v4  ;;  %v3917_v36 = vpack.c.bf16 %v610_v19, %v609_v17  ;;  %v614_v1 = vld [vmem:[#allocation5 + $0x278] sm:$0xff]  ;;  %v314_v31 = vld [vmem:[#allocation5 + $0xc8] sm:$0xff] }
  0x76   : > { %3895 = vmatprep.subr.bf16.mxu0 %v6965_v0  ;;  %v4729_v37 = vld [vmem:[%s4559_s21 + $0x110] sm:$0xff]  ;;  %v4757_v17 = vld [vmem:[%s4559_s21 + $0x128] sm:$0xff] }
  0x77   : > { %4130 = vmatpush3.bf16.msra.mxu1 %v4610_v42  ;;  %v758_v50 = vrot.slane %v4729_v37, 2  ;;  %v613_v61 = vld [vmem:[#allocation5 + $0x270] sm:$0xff] }
  0x78   : > { %4123 = vmatprep.subr.bf16.mxu1 %v4615_v48  ;;  %v3923_v19 = vpack.c.bf16 %v614_v1, %v613_v61  ;;  %v307_v61 = vld [vmem:[#allocation5 + $0x90] sm:$0xff]  ;;  %v308_v1 = vld [vmem:[#allocation5 + $0x98] sm:$0xff] }
  0x79   : > { %3897 = vmatpush1.bf16.msra.mxu0 %v3896_v49  ;;  %v799_v49 = vsel %vm484_vm0, %v749_v33, %v750_v38  ;;  %v611_v38 = vld [vmem:[#allocation5 + $0x260] sm:$0xff] }
  0x7a   : > { %3898 = vmatprep.subr.bf16.mxu0 %v6965_v0 }
  0x7b   : > { %4131 = vmatpush3.bf16.msra.mxu1 %v4615_v48 }
  0x7c   : > { %4124 = vmatprep.subr.bf16.mxu1 %v4620_v54 }
  0x7d   : > { %3900 = vmatpush1.bf16.msra.mxu0 %v3899_v56  ;;  %v3911_v56 = vpack.c.bf16 %v606_v44, %v605_v43 }
  0x7e   : > { %3901 = vmatprep.subr.bf16.mxu0 %v6965_v0 }
  0x7f   : > { %4132 = vmatpush3.bf16.msra.mxu1 %v4620_v54 }
  0x80   : > { %3957 = vmatprep.subr.bf16.mxu1 %v6965_v0 }
  0x81   : > { %3903 = vmatpush1.bf16.msra.mxu0 %v3902_v7  ;;  %v797_v7 = vsel %vm484_vm0, %v751_v47, %v752_v52  ;;  %v301_v47 = vld [vmem:[#allocation5 + $0x60] sm:$0xff] }
  0x82   : > { %3622 = vmatmul.mubr.f32.vlgmr.msra.gmra.mrb[0].mxu1 %v804_v13  ;;  %3904 = vmatprep.subr.bf16.mxu0 %v6965_v0  ;;  %v754_v13 = vrot.slane %v4701_v60, 2 }
  0x83   : > { %3959 = vmatpush1.bf16.msra.mxu1 %v3958_v14  ;;  %3624 = vmatprep.mubr.f32.mxu1 %v803_v16  ;;  %v4712_v14 = vld [vmem:[%s4559_s21 + $0xf8] sm:$0xff]  ;;  %v4715_v16 = vld [vmem:[%s4559_s21 + $0x100] sm:$0xff] }
  0x84   : > { %3960 = vmatprep.subr.bf16.mxu1 %v6965_v0  ;;  %v755_v27 = vrot.slane %v4712_v14, 2  ;;  %v795_v28 = vsel %vm484_vm0, %v753_v4, %v754_v13  ;;  %v756_v33 = vrot.slane %v4715_v16, 2  ;;  %v759_v4 = vrot.slane %v4740_v51, 2 }
  0x85   : > { %3906 = vmatpush1.bf16.msra.mxu0 %v3905_v23  ;;  %v3970_v23 = vpack.c.bf16 %v298_v11, %v297_v10  ;;  %v303_v11 = vld [vmem:[#allocation5 + $0x70] sm:$0xff] }
  0x86   : > { %3625 = vmatmul.mubr.f32.gmra.mrb[2].mxu1 %v802_v29  ;;  %3907 = vmatprep.subr.bf16.mxu0 %v6965_v0  ;;  %v299_v29 = vld [vmem:[#allocation5 + $0x50] sm:$0xff]  ;;  %v794_v43 = vsel %vm484_vm0, %v754_v13, %v755_v27  ;;  %v304_v13 = vld [vmem:[#allocation5 + $0x78] sm:$0xff] }
  0x87   : > { %3962 = vmatpush1.bf16.msra.mxu1 %v3961_v32  ;;  %3627 = vmatprep.mubr.f32.mxu1 %v801_v34  ;;  %v300_v32 = vld [vmem:[#allocation5 + $0x58] sm:$0xff] }
  0x88   : > { %3963 = vmatprep.subr.bf16.mxu1 %v6965_v0  ;;  %v4726_v34 = vld [vmem:[%s4559_s21 + $0x108] sm:$0xff]  ;;  %v3973_v44 = vpack.c.bf16 %v300_v32, %v299_v29  ;;  %v761_v29 = vrot.slane %v4757_v17, 2  ;;  %v4768_v32 = vld [vmem:[%s4559_s21 + $0x30] sm:$0xff] }
  0x89   : > { %3909 = vmatpush1.bf16.msra.mxu0 %v3908_v40  ;;  %v612_v40 = vld [vmem:[#allocation5 + $0x268] sm:$0xff] }
  0x8a   : > { %3628 = vmatmul.mubr.f32.gmra.mrb[4].mxu1 %v800_v45  ;;  %3910 = vmatprep.subr.bf16.mxu0 %v6965_v0  ;;  %v757_v45 = vrot.slane %v4726_v34, 2  ;;  %v3920_v52 = vpack.c.bf16 %v612_v40, %v611_v38  ;;  %v306_v38 = vld [vmem:[#allocation5 + $0x88] sm:$0xff] }
  0x8b   : > { %3965 = vmatpush1.bf16.msra.mxu1 %v3964_v46  ;;  %3630 = vmatprep.mubr.f32.mxu1 %v799_v49  ;;  %v793_v46 = vsel %vm484_vm0, %v755_v27, %v756_v33  ;;  %v302_v49 = vld [vmem:[#allocation5 + $0x68] sm:$0xff]  ;;  %v790_v27 = vsel %vm484_vm0, %v758_v50, %v759_v4 }
  0x8c   : > { %3966 = vmatprep.subr.bf16.mxu1 %v6965_v0  ;;  %v791_v10 = vsel %vm484_vm0, %v757_v45, %v758_v50 }
  0x8d   : > { %3912 = vmatpush1.bf16.msra.mxu0 %v3911_v56  ;;  %v4743_v56 = vld [vmem:[%s4559_s21 + $0x120] sm:$0xff] }
  0x8e   : > { %3631 = vmatmul.mubr.f32.gmra.mrb[6].mxu1 %v798_v2  ;;  %3913 = vmatprep.subr.bf16.mxu0 %v6965_v0  ;;  %v792_v2 = vsel %vm484_vm0, %v756_v33, %v757_v45 }
  0x8f   : > { %3968 = vmatpush1.bf16.msra.mxu1 %v3967_v3  ;;  %3633 = vmatprep.mubr.f32.mxu1 %v797_v7  ;;  %v3976_v3 = vpack.c.bf16 %v302_v49, %v301_v47  ;;  %v4750_v7 = vld [vmem:[%s4559_s21 + $0x28] sm:$0xff] }
  0x90   : > { %3969 = vmatprep.subr.bf16.mxu1 %v6965_v0 }
  0x91   : > { %3915 = vmatpush1.bf16.msra.mxu0 %v3914_v15  ;;  %v760_v15 = vrot.slane %v4743_v56, 2 }
  0x92   : > { %3634 = vmatmul.mubr.f32.gmra.mrb[8].mxu1 %v796_v20  ;;  %3916 = vmatprep.subr.bf16.mxu0 %v6965_v0  ;;  %v4760_v20 = vld [vmem:[%s4559_s21 + $0x130] sm:$0xff] }
  0x93   : > { %3971 = vmatpush1.bf16.msra.mxu1 %v3970_v23  ;;  %3636 = vmatprep.mubr.f32.mxu1 %v795_v28  ;;  %v633_v23 = vrot.slane %v4750_v7, 1  ;;  %v3979_v28 = vpack.c.bf16 %v304_v13, %v303_v11  ;;  %v789_v33 = vsel %vm484_vm0, %v759_v4, %v760_v15  ;;  %v762_v40 = vrot.slane %v4760_v20, 2  ;;  %v4805_v4 = vld [vmem:[%s4559_s21 + $0x150] sm:$0xff] }
  0x94   : > { %3972 = vmatprep.subr.bf16.mxu1 %v6965_v0  ;;  %v788_v47 = vsel %vm484_vm0, %v760_v15, %v761_v29  ;;  %7012 = vst [vmem:[#allocation12_spill] sm:$0xff] %v4805_v4  ;;  %v3985_v13 = vpack.c.bf16 %v308_v1, %v307_v61  ;;  %v312_v61 = vld [vmem:[#allocation5 + $0xb8] sm:$0xff] }
  0x95   : > { %3918 = vmatpush1.bf16.msra.mxu0 %v3917_v36  ;;  %v305_v36 = vld [vmem:[#allocation5 + $0x80] sm:$0xff]  ;;  %v4785_v45 = vsel %vm387_vm1, %v632_v63, %v633_v23  ;;  %v787_v63 = vsel %vm484_vm0, %v761_v29, %v762_v40  ;;  %v766_v29 = vrot.slane %v4805_v4, 2  ;;  %v4942_v4 = vld [vmem:[%s4559_s21 + $0x68] sm:$0xff] }
  0x96   : > { %3637 = vmatmul.mubr.f32.gmra.mrb[10].mxu1 %v794_v43  ;;  %3919 = vmatprep.subr.bf16.mxu0 %v6965_v0  ;;  %v4775_v43 = vld [vmem:[%s4559_s21 + $0x138] sm:$0xff]  ;;  %v3982_v49 = vpack.c.bf16 %v306_v38, %v305_v36  ;;  %v4829_v36 = vld [vmem:[%s4559_s21 + $0x160] sm:$0xff] }
  0x97   : > { %3974 = vmatpush1.bf16.msra.mxu1 %v3973_v44  ;;  %3639 = vmatprep.mubr.f32.mxu1 %v793_v46  ;;  %v4778_v44 = vld [vmem:[%s4559_s21 + $0x140] sm:$0xff]  ;;  %v634_v46 = vrot.slane %v4768_v32, 1  ;;  %v763_v50 = vrot.slane %v4775_v43, 2  ;;  %7014 = vst [vmem:[#allocation14_spill] sm:$0xff] %v4829_v36  ;;  %v768_v1 = vrot.slane %v4829_v36, 2  ;;  %v316_v36 = vld [vmem:[#allocation5 + $0xd8] sm:$0xff] }
  0x98   : > { %3975 = vmatprep.subr.bf16.mxu1 %v6965_v0 }
  0x99   : > { %3921 = vmatpush1.bf16.msra.mxu0 %v3920_v52  ;;  %v4792_v52 = vld [vmem:[%s4559_s21 + $0x38] sm:$0xff] }
  0x9a   : > { %3640 = vmatmul.mubr.f32.gmra.mrb[12].mxu1 %v792_v2  ;;  %3922 = vmatprep.subr.bf16.mxu0 %v6965_v0  ;;  %v764_v2 = vrot.slane %v4778_v44, 2  ;;  %v635_v11 = vrot.slane %v4792_v52, 1 }
  0x9b   : > { %3977 = vmatpush1.bf16.msra.mxu1 %v3976_v3  ;;  %3642 = vmatprep.mubr.f32.mxu1 %v791_v10  ;;  %v4800_v3 = vld [vmem:[%s4559_s21 + $0x148] sm:$0xff]  ;;  %v4809_v10 = vsel %vm387_vm1, %v633_v23, %v634_v46 }
  0x9c   : > { %3978 = vmatprep.subr.bf16.mxu1 %v6965_v0  ;;  %7011 = vst [vmem:[#allocation11_spill] sm:$0xff] %v4800_v3  ;;  %v765_v15 = vrot.slane %v4800_v3, 2  ;;  %v785_v23 = vsel %vm484_vm0, %v763_v50, %v764_v2  ;;  %v4834_v38 = vsel %vm387_vm1, %v634_v46, %v635_v11  ;;  %v4964_v3 = vld [vmem:[%s4559_s21 + $0x70] sm:$0xff] }
  0x9d   : > { %3924 = vmatpush1.bf16.msra.mxu0 %v3923_v19  ;;  %v4817_v19 = vld [vmem:[%s4559_s21 + $0x40] sm:$0xff] }
  0x9e   : > { %3643 = vmatmul.mubr.f32.gmra.mrb[14].mxu1 %v790_v27  ;;  %3926 = vmatprep.subr.bf16.mxu0 %v4570_v8  ;;  %v309_v27 = vld [vmem:[#allocation5 + $0xa0] sm:$0xff]  ;;  %v783_v46 = vsel %vm484_vm0, %v765_v15, %v766_v29 }
  0x9f   : > { %3980 = vmatpush1.bf16.msra.mxu1 %v3979_v28  ;;  %3645 = vmatprep.mubr.f32.mxu1 %v789_v33  ;;  %v310_v28 = vld [vmem:[#allocation5 + $0xa8] sm:$0xff] }
  0xa0   : > { %888 = vmatmul.mubr.f32.vlgmr.msra.gmra.mrb[0].mxu0 %v4630_v58  ;;  %3981 = vmatprep.subr.bf16.mxu1 %v6965_v0  ;;  %v4825_v33 = vld [vmem:[%s4559_s21 + $0x158] sm:$0xff] }
  0xa1   : > { %3928 = vmatpush3.bf16.msra.mxu0 %v4570_v8  ;;  %892 = vmatprep.mubr.f32.mxu0 %v4785_v45  ;;  %v786_v8 = vsel %vm484_vm0, %v762_v40, %v763_v50  ;;  %7013 = vst [vmem:[#allocation13_spill] sm:$0xff] %v4825_v33  ;;  %v636_v40 = vrot.slane %v4817_v19, 1  ;;  %v767_v50 = vrot.slane %v4825_v33, 2  ;;  %v318_v33 = vld [vmem:[#allocation5 + $0xe8] sm:$0xff] }
  0xa2   : > { %3646 = vmatmul.mubr.f32.gmra.mrb[16].mxu1 %v788_v47  ;;  %3930 = vmatprep.subr.bf16.mxu0 %v4572_v12  ;;  %v784_v47 = vsel %vm484_vm0, %v764_v2, %v765_v15  ;;  %v4854_v2 = vld [vmem:[%s4559_s21 + $0x170] sm:$0xff] }
  0xa3   : > { %3983 = vmatpush1.bf16.msra.mxu1 %v3982_v49  ;;  %3648 = vmatprep.mubr.f32.mxu1 %v787_v63  ;;  %v3988_v49 = vpack.c.bf16 %v310_v28, %v309_v27  ;;  %v311_v63 = vld [vmem:[#allocation5 + $0xb0] sm:$0xff]  ;;  %7016 = vst [vmem:[#allocation16_spill] sm:$0xff] %v4854_v2 }
  0xa4   : > { %893 = vmatmul.mubr.f32.gmra.mrb[2].mxu0 %v4633_v59  ;;  %3984 = vmatprep.subr.bf16.mxu1 %v6965_v0  ;;  %v3991_v27 = vpack.c.bf16 %v312_v61, %v311_v63 }
  0xa5   : > { %897 = vmatprep.mubr.f32.mxu0 %v4809_v10  ;;  %3932 = vmatpush3.bf16.msra.mxu0 %v4572_v12  ;;  %v4842_v12 = vld [vmem:[%s4559_s21 + $0x48] sm:$0xff] }
  0xa6   : > { %3649 = vmatmul.mubr.f32.gmra.mrb[18].mxu1 %v786_v8  ;;  %3934 = vmatprep.subr.bf16.mxu0 %v4578_v18  ;;  %v4850_v8 = vld [vmem:[%s4559_s21 + $0x168] sm:$0xff]  ;;  %v637_v15 = vrot.slane %v4842_v12, 1 }
  0xa7   : > { %3986 = vmatpush1.bf16.msra.mxu1 %v3985_v13  ;;  %3651 = vmatprep.mubr.f32.mxu1 %v785_v23  ;;  %7015 = vst [vmem:[#allocation15_spill] sm:$0xff] %v4850_v8  ;;  %v4859_v13 = vsel %vm387_vm1, %v635_v11, %v636_v40  ;;  %v782_v23 = vsel %vm484_vm0, %v766_v29, %v767_v50  ;;  %v769_v28 = vrot.slane %v4850_v8, 2  ;;  %v4879_v29 = vld [vmem:[%s4559_s21 + $0x180] sm:$0xff] }
  0xa8   : > { %898 = vmatmul.mubr.f32.gmra.mrb[4].mxu0 %v4750_v7  ;;  %3987 = vmatprep.subr.bf16.mxu1 %v6965_v0  ;;  %v781_v11 = vsel %vm484_vm0, %v767_v50, %v768_v1  ;;  %7018 = vst [vmem:[#allocation18_spill] sm:$0xff] %v4879_v29  ;;  %v4884_v63 = vsel %vm387_vm1, %v636_v40, %v637_v15  ;;  %v315_v8 = vld [vmem:[#allocation5 + $0xd0] sm:$0xff] }
  0xa9   : > { %902 = vmatprep.mubr.f32.mxu0 %v4834_v38  ;;  %3936 = vmatpush3.bf16.msra.mxu0 %v4578_v18  ;;  %v4867_v18 = vld [vmem:[%s4559_s21 + $0x50] sm:$0xff]  ;;  %v780_v61 = vsel %vm484_vm0, %v768_v1, %v769_v28 }
  0xaa   : > { %3652 = vmatmul.mubr.f32.gmra.mrb[20].mxu1 %v784_v47  ;;  %3938 = vmatprep.subr.bf16.mxu0 %v4585_v25  ;;  %v313_v47 = vld [vmem:[#allocation5 + $0xc0] sm:$0xff]  ;;  %v638_v50 = vrot.slane %v4867_v18, 1 }
  0xab   : > { %3989 = vmatpush1.bf16.msra.mxu1 %v3988_v49  ;;  %3654 = vmatprep.mubr.f32.mxu1 %v783_v46  ;;  %v770_v49 = vrot.slane %v4854_v2, 2  ;;  %v4875_v46 = vld [vmem:[%s4559_s21 + $0x178] sm:$0xff] }
  0xac   : > { %903 = vmatmul.mubr.f32.gmra.mrb[6].mxu0 %v4768_v32  ;;  %3990 = vmatprep.subr.bf16.mxu1 %v6965_v0  ;;  %7017 = vst [vmem:[#allocation17_spill] sm:$0xff] %v4875_v46  ;;  %v3994_v0 = vpack.c.bf16 %v314_v31, %v313_v47  ;;  %v771_v2 = vrot.slane %v4875_v46, 2  ;;  %v4904_v31 = vld [vmem:[%s4559_s21 + $0x190] sm:$0xff]  ;;  %v4909_v1 = vsel %vm387_vm1, %v637_v15, %v638_v50 }
  0xad   : > { %907 = vmatprep.mubr.f32.mxu0 %v4859_v13  ;;  %3940 = vmatpush3.bf16.msra.mxu0 %v4585_v25  ;;  %v4892_v25 = vld [vmem:[%s4559_s21 + $0x58] sm:$0xff]  ;;  %v779_v40 = vsel %vm484_vm0, %v769_v28, %v770_v49  ;;  %7021 = vst [vmem:[#allocation20_spill] sm:$0xff] %v4904_v31 }
  0xae   : > { %3655 = vmatmul.mubr.f32.gmra.mrb[22].mxu1 %v782_v23  ;;  %3942 = vmatprep.subr.bf16.mxu0 %v4599_v35  ;;  %v7019_v23 = vmov 0.0|0.0   ;;  %v639_v28 = vrot.slane %v4892_v25, 1  ;;  %v778_v47 = vsel %vm484_vm0, %v770_v49, %v771_v2  ;;  %v4926_v49 = vld [vmem:[%s4559_s21] sm:$0xff] }
  0xaf   : > { %3992 = vmatpush1.bf16.msra.mxu1 %v3991_v27  ;;  %3657 = vmatprep.mubr.f32.mxu1 %v781_v11  ;;  %v772_v27 = vrot.slane %v4879_v29, 2  ;;  %v4900_v11 = vld [vmem:[%s4559_s21 + $0x188] sm:$0xff]  ;;  %v3997_v29 = vpack.c.bf16 %v316_v36, %v315_v8  ;;  %7022 = vst [vmem:[#allocation21_spill] sm:$0xff] %v4926_v49 }
  0xb0   : > { %908 = vmatmul.mubr.f32.gmra.mrb[8].mxu0 %v4792_v52  ;;  %3993 = vmatprep.subr.bf16.mxu1 %v7019_v23  ;;  %7020 = vst [vmem:[#allocation19_spill] sm:$0xff] %v4900_v11  ;;  %v773_v46 = vrot.slane %v4900_v11, 2  ;;  %v4929_v36 = vld [vmem:[%s4559_s21 + $0x8] sm:$0xff]  ;;  %v4934_v8 = vsel %vm387_vm1, %v638_v50, %v639_v28  ;;  %v6987_v11 = vrot.slane %v4630_v58, 2  ;;  %v319_v50 = vld [vmem:[#allocation5 + $0xf0] sm:$0xff] }
  0xb1   : > { %912 = vmatprep.mubr.f32.mxu0 %v4884_v63  ;;  %3944 = vmatpush3.bf16.msra.mxu0 %v4599_v35  ;;  %v4917_v35 = vld [vmem:[%s4559_s21 + $0x60] sm:$0xff]  ;;  %v777_v15 = vsel %vm484_vm0, %v771_v2, %v772_v27 }
  0xb2   : > { %3658 = vmatmul.mubr.f32.gmra.mrb[24].mxu1 %v780_v61  ;;  %3946 = vmatprep.subr.bf16.mxu0 %v4610_v42  ;;  %v317_v61 = vld [vmem:[#allocation5 + $0xe0] sm:$0xff]  ;;  %v640_v2 = vrot.slane %v4917_v35, 1 }
  0xb3   : > { %3995 = vmatpush1.bf16.msra.mxu1 %v3994_v0  ;;  %3660 = vmatprep.mubr.f32.mxu1 %v779_v40  ;;  %v774_v0 = vrot.slane %v4904_v31, 2  ;;  %v776_v40 = vsel %vm484_vm0, %v772_v27, %v773_v46  ;;  %v4000_v31 = vpack.c.bf16 %v318_v33, %v317_v61  ;;  %v243_v33 = vld [vmem:[%s4559_s21 + $0x10] sm:$0xff]  ;;  %v641_v61 = vrot.slane %v4942_v4, 1 }
  0xb4   : > { %913 = vmatmul.mubr.f32.gmra.mrb[10].mxu0 %v4817_v19  ;;  %3996 = vmatprep.subr.bf16.mxu1 %v7019_v23  ;;  %v4955_v27 = vsel %vm387_vm1, %v639_v28, %v640_v2 }
  0xb5   : > { %917 = vmatprep.mubr.f32.mxu0 %v4909_v1  ;;  %3948 = vmatpush3.bf16.msra.mxu0 %v4610_v42  ;;  %v775_v42 = vsel %vm484_vm0, %v773_v46, %v774_v0  ;;  %v822_v46 = vsel %vm484_vm0, %v774_v0, %v6987_v11  ;;  %v4976_v0 = vsel %vm387_vm1, %v640_v2, %v641_v61  ;;  %v4980_v11 = vld [vmem:[%s4559_s21 + $0x78] sm:$0xff] }
  0xb6   : > { %3661 = vmatmul.mubr.f32.gmra.mrb[26].mxu1 %v778_v47  ;;  %3950 = vmatprep.subr.bf16.mxu0 %v4615_v48  ;;  %v320_v47 = vld [vmem:[#allocation5 + $0xf8] sm:$0xff] }
  0xb7   : > { %3998 = vmatpush1.bf16.msra.mxu1 %v3997_v29  ;;  %3663 = vmatprep.mubr.f32.mxu1 %v777_v15  ;;  %v338_v15 = vrot.slane %v4929_v36, 1  ;;  %v4003_v29 = vpack.c.bf16 %v320_v47, %v319_v50  ;;  %v642_v50 = vrot.slane %v4964_v3, 1 }
  0xb8   : > { %918 = vmatmul.mubr.f32.gmra.mrb[12].mxu0 %v4842_v12  ;;  %3999 = vmatprep.subr.bf16.mxu1 %v7019_v23 }
  0xb9   : > { %922 = vmatprep.mubr.f32.mxu0 %v4934_v8  ;;  %3952 = vmatpush3.bf16.msra.mxu0 %v4615_v48  ;;  %v7023_v48 = vrot.slane %v4926_v49, 1  ;;  %v4990_v2 = vsel %vm387_vm1, %v641_v61, %v642_v50 }
  0xba   : > { %3664 = vmatmul.mubr.f32.gmra.mrb[28].mxu1 %v776_v40  ;;  %3954 = vmatprep.subr.bf16.mxu0 %v4620_v54  ;;  %v2094_v40 = vld [vmem:[#allocation5 + $0x308] sm:$0xff] }
  0xbb   : > { %4001 = vmatpush1.bf16.msra.mxu1 %v4000_v31  ;;  %3666 = vmatprep.mubr.f32.mxu1 %v775_v42  ;;  %v434_v28 = vsel %vm387_vm1, %v7023_v48, %v338_v15  ;;  %v2093_v31 = vld [vmem:[#allocation5 + $0x300] sm:$0xff]  ;;  %v339_v42 = vrot.slane %v243_v33, 1  ;;  %v2096_v48 = vld [vmem:[#allocation5 + $0x318] sm:$0xff] }
  0xbc   : > { %923 = vmatmul.mubr.f32.gmra.mrb[14].mxu0 %v4867_v18  ;;  %4002 = vmatprep.subr.bf16.mxu1 %v7019_v23  ;;  %v4038_v47 = vpack.c.bf16 %v2094_v40, %v2093_v31  ;;  %v4994_v31 = vld [vmem:[%s4559_s21 + $0x80] sm:$0xff] }
  0xbd   : > { %927 = vmatprep.mubr.f32.mxu0 %v4955_v27  ;;  %3956 = vmatpush3.bf16.msra.mxu0 %v4620_v54  ;;  %v433_v54 = vsel %vm387_vm1, %v338_v15, %v339_v42  ;;  %v432_v15 = vsel %vm387_vm1, %v339_v42, %v4637_v62  ;;  %v2097_v40 = vld [vmem:[#allocation5 + $0x320] sm:$0xff] }
  0xbe   : > { %3667 = vmatmul.mubr.f32.gmra.mrb[30].mxu1 %v822_v46  ;;  %v2095_v46 = vld [vmem:[#allocation5 + $0x310] sm:$0xff] }
  0xbf   : > { %4004 = vmatpush1.bf16.msra.mxu1 %v4003_v29  ;;  %1497 = vmatprep.mubr.f32.mxu1 %v434_v28  ;;  %v643_v29 = vrot.slane %v4980_v11, 1  ;;  %v4041_v28 = vpack.c.bf16 %v2096_v48, %v2095_v46  ;;  %v2099_v46 = vld [vmem:[#allocation5 + $0x330] sm:$0xff]  ;;  %v2100_v48 = vld [vmem:[#allocation5 + $0x338] sm:$0xff] }
  0xc0   : > { %928 = vmatmul.mubr.f32.gmra.mrb[16].mxu0 %v4892_v25  ;;  %4037 = vmatprep.subr.bf16.mxu1 %v7019_v23 }
  0xc1   : > { %932 = vmatprep.mubr.f32.mxu0 %v4976_v0  ;;  %v5005_v61 = vsel %vm387_vm1, %v642_v50, %v643_v29 }
  0xc2   : > { %1498 = vmatmul.mubr.f32.vlgmr.msra.gmra.mrb[32].mxu1 %v4926_v49  ;;  %v2098_v49 = vld [vmem:[#allocation5 + $0x328] sm:$0xff] }
  0xc3   : > { %4039 = vmatpush1.bf16.msra.mxu1 %v4038_v47  ;;  %1502 = vmatprep.mubr.f32.mxu1 %v433_v54  ;;  %v644_v47 = vrot.slane %v4994_v31, 1  ;;  %v5009_v54 = vld [vmem:[%s4559_s21 + $0x88] sm:$0xff]  ;;  %v4044_v42 = vpack.c.bf16 %v2098_v49, %v2097_v40  ;;  %v4047_v49 = vpack.c.bf16 %v2100_v48, %v2099_v46  ;;  %v5042_v48 = vrot.slane %v4588_v26, 1 }
  0xc4   : > { %933 = vmatmul.mubr.f32.gmra.mrb[18].mxu0 %v4917_v35  ;;  %4040 = vmatprep.subr.bf16.mxu1 %v7019_v23  ;;  %v645_v50 = vrot.slane %v5009_v54, 1  ;;  %v2102_v40 = vld [vmem:[#allocation5 + $0x348] sm:$0xff]  ;;  %v2104_v46 = vld [vmem:[#allocation5 + $0x358] sm:$0xff] }
  0xc5   : > { %937 = vmatprep.mubr.f32.mxu0 %v4990_v2 }
  0xc6   : > { %1503 = vmatmul.mubr.f32.gmra.mrb[34].mxu1 %v4929_v36  ;;  %v5016_v36 = vsel %vm387_vm1, %v643_v29, %v644_v47 }
  0xc7   : > { %1507 = vmatprep.mubr.f32.mxu1 %v432_v15  ;;  %4042 = vmatpush1.bf16.msra.mxu1 %v4041_v28  ;;  %v5021_v28 = vld [vmem:[%s4559_s21 + $0x90] sm:$0xff] }
  0xc8   : > { %938 = vmatmul.mubr.f32.gmra.mrb[20].mxu0 %v4942_v4  ;;  %4043 = vmatprep.subr.bf16.mxu1 %v7019_v23  ;;  %v2101_v15 = vld [vmem:[#allocation5 + $0x340] sm:$0xff] }
  0xc9   : > { %942 = vmatprep.mubr.f32.mxu0 %v5005_v61  ;;  %v4050_v29 = vpack.c.bf16 %v2102_v40, %v2101_v15  ;;  %v2106_v15 = vld [vmem:[#allocation5 + $0x368] sm:$0xff]  ;;  %v2107_v40 = vld [vmem:[#allocation5 + $0x370] sm:$0xff] }
  0xca   : > { %1508 = vmatmul.mubr.f32.gmra.mrb[36].mxu1 %v243_v33  ;;  %v5029_v33 = vsel %vm387_vm1, %v644_v47, %v645_v50 }
  0xcb   : > { %1512 = vmatprep.mubr.f32.mxu1 %v4652_v6  ;;  %4045 = vmatpush1.bf16.msra.mxu1 %v4044_v42  ;;  %v646_v6 = vrot.slane %v5021_v28, 1  ;;  %v2103_v42 = vld [vmem:[#allocation5 + $0x350] sm:$0xff] }
  0xcc   : > { %943 = vmatmul.mubr.f32.gmra.mrb[22].mxu0 %v4964_v3  ;;  %4046 = vmatprep.subr.bf16.mxu1 %v7019_v23 }
  0xcd   : > { %947 = vmatprep.mubr.f32.mxu0 %v5016_v36  ;;  %v5039_v47 = vsel %vm387_vm1, %v645_v50, %v646_v6  ;;  %v648_v50 = vrot.slane %v4592_v30, 1 }
  0xce   : > { %1513 = vmatmul.mubr.f32.gmra.mrb[38].mxu1 %v4630_v58 }
  0xcf   : > { %1517 = vmatprep.mubr.f32.mxu1 %v4785_v45  ;;  %4048 = vmatpush1.bf16.msra.mxu1 %v4047_v49  ;;  %v4053_v45 = vpack.c.bf16 %v2104_v46, %v2103_v42  ;;  %v2105_v49 = vld [vmem:[#allocation5 + $0x360] sm:$0xff]  ;;  %v2110_v46 = vld [vmem:[#allocation5 + $0x388] sm:$0xff] }
  0xd0   : > { %948 = vmatmul.mubr.f32.gmra.mrb[24].mxu0 %v4980_v11  ;;  %4049 = vmatprep.subr.bf16.mxu1 %v7019_v23  ;;  %v2109_v42 = vld [vmem:[#allocation5 + $0x380] sm:$0xff] }
  0xd1   : > { %952 = vmatprep.mubr.f32.mxu0 %v5029_v33 }
  0xd2   : > { %1518 = vmatmul.mubr.f32.gmra.mrb[40].mxu1 %v4633_v59  ;;  %v5052_v59 = vsel %vm387_vm1, %v646_v6, %v5042_v48  ;;  %v649_v6 = vrot.slane %v4623_v55, 1 }
  0xd3   : > { %1522 = vmatprep.mubr.f32.mxu1 %v4809_v10  ;;  %4051 = vmatpush1.bf16.msra.mxu1 %v4050_v29  ;;  %v4056_v10 = vpack.c.bf16 %v2106_v15, %v2105_v49  ;;  %v2108_v29 = vld [vmem:[#allocation5 + $0x378] sm:$0xff]  ;;  %v321_v49 = vld [vmem:[#allocation5 + $0x100] sm:$0xff]  ;;  %v322_v15 = vld [vmem:[#allocation5 + $0x108] sm:$0xff] }
  0xd4   : > { %953 = vmatmul.mubr.f32.gmra.mrb[26].mxu0 %v4994_v31  ;;  %4052 = vmatprep.subr.bf16.mxu1 %v7019_v23 }
  0xd5   : > { %957 = vmatprep.mubr.f32.mxu0 %v5039_v47 }
  0xd6   : > { %1523 = vmatmul.mubr.f32.gmra.mrb[42].mxu1 %v4750_v7  ;;  %v709_v7 = vsel %vm387_vm1, %v5042_v48, %v648_v50 }
  0xd7   : > { %1527 = vmatprep.mubr.f32.mxu1 %v4834_v38  ;;  %4054 = vmatpush1.bf16.msra.mxu1 %v4053_v45  ;;  %v4059_v38 = vpack.c.bf16 %v2108_v29, %v2107_v40  ;;  %v650_v45 = vrot.slane %v4626_v57, 1  ;;  %v2112_v40 = vld [vmem:[#allocation5 + $0x398] sm:$0xff]  ;;  %v5074_v29 = vpack.c.bf16 %v322_v15, %v321_v49  ;;  %v655_v15 = vrot.slane %v4684_v39, 1 }
  0xd8   : > { %958 = vmatmul.mubr.f32.gmra.mrb[28].mxu0 %v5009_v54  ;;  %4055 = vmatprep.subr.bf16.mxu1 %v7019_v23  ;;  %v2120_v49 = vld [vmem:[#allocation5 + $0x3d8] sm:$0xff] }
  0xd9   : > { %962 = vmatprep.mubr.f32.mxu0 %v5052_v59  ;;  %4006 = vmatprep.subr.bf16.mxu0 %v5074_v29 }
  0xda   : > { %1528 = vmatmul.mubr.f32.gmra.mrb[44].mxu1 %v4768_v32  ;;  %v708_v32 = vsel %vm387_vm1, %v648_v50, %v649_v6  ;;  %v651_v50 = vrot.slane %v4645_v5, 1 }
  0xdb   : > { %1532 = vmatprep.mubr.f32.mxu1 %v4859_v13  ;;  %4057 = vmatpush1.bf16.msra.mxu1 %v4056_v10  ;;  %v4062_v13 = vpack.c.bf16 %v2110_v46, %v2109_v42  ;;  %v2111_v10 = vld [vmem:[#allocation5 + $0x390] sm:$0xff]  ;;  %v2116_v42 = vld [vmem:[#allocation5 + $0x3b8] sm:$0xff]  ;;  %v653_v46 = vrot.slane %v4670_v21, 1 }
  0xdc   : > { %963 = vmatmul.mubr.f32.gmra.mrb[30].mxu0 %v5021_v28  ;;  %4058 = vmatprep.subr.bf16.mxu1 %v7019_v23 }
  0xdd   : > { %967 = vmatprep.mubr.f32.mxu0 %v709_v7  ;;  %v2113_v7 = vld [vmem:[#allocation5 + $0x3a0] sm:$0xff] }
  0xde   : > { %1533 = vmatmul.mubr.f32.gmra.mrb[46].mxu1 %v4792_v52  ;;  %v707_v52 = vsel %vm387_vm1, %v649_v6, %v650_v45  ;;  %v652_v6 = vrot.slane %v4655_v9, 1 }
  0xdf   : > { %1537 = vmatprep.mubr.f32.mxu1 %v4884_v63  ;;  %4060 = vmatpush1.bf16.msra.mxu1 %v4059_v38  ;;  %v4065_v63 = vpack.c.bf16 %v2112_v40, %v2111_v10  ;;  %v2114_v38 = vld [vmem:[#allocation5 + $0x3a8] sm:$0xff] }
  0xe0   : > { %968 = vmatmul.mubr.f32.gmra.mrb[32].mxu0 %v4588_v26  ;;  %4061 = vmatprep.subr.bf16.mxu1 %v7019_v23  ;;  %v2122_v10 = vld [vmem:[#allocation5 + $0x3e8] sm:$0xff] }
  0xe1   : > { %972 = vmatprep.mubr.f32.mxu0 %v708_v32  ;;  %v2118_v32 = vld [vmem:[#allocation5 + $0x3c8] sm:$0xff] }
  0xe2   : > { %1538 = vmatmul.mubr.f32.gmra.mrb[48].mxu1 %v4817_v19  ;;  %v706_v19 = vsel %vm387_vm1, %v650_v45, %v651_v50  ;;  %v654_v45 = vrot.slane %v4673_v24, 1 }
  0xe3   : > { %1542 = vmatprep.mubr.f32.mxu1 %v4909_v1  ;;  %4063 = vmatpush1.bf16.msra.mxu1 %v4062_v13  ;;  %v4068_v1 = vpack.c.bf16 %v2114_v38, %v2113_v7  ;;  %v657_v7 = vrot.slane %v4698_v53, 1  ;;  %v658_v38 = vrot.slane %v4701_v60, 1 }
  0xe4   : > { %973 = vmatmul.mubr.f32.gmra.mrb[34].mxu0 %v4592_v30  ;;  %4064 = vmatprep.subr.bf16.mxu1 %v7019_v23  ;;  %v2115_v30 = vld [vmem:[#allocation5 + $0x3b0] sm:$0xff]  ;;  %v703_v13 = vsel %vm387_vm1, %v653_v46, %v654_v45  ;;  %v702_v40 = vsel %vm387_vm1, %v654_v45, %v655_v15  ;;  %v663_v45 = vrot.slane %v4740_v51, 1 }
  0xe5   : > { %977 = vmatprep.mubr.f32.mxu0 %v707_v52  ;;  %v656_v52 = vrot.slane %v4687_v41, 1 }
  0xe6   : > { %1543 = vmatmul.mubr.f32.gmra.mrb[50].mxu1 %v4842_v12  ;;  %v705_v12 = vsel %vm387_vm1, %v651_v50, %v652_v6  ;;  %v2124_v50 = vld [vmem:[#allocation5 + $0x3f8] sm:$0xff] }
  0xe7   : > { %1547 = vmatprep.mubr.f32.mxu1 %v4934_v8  ;;  %4066 = vmatpush1.bf16.msra.mxu1 %v4065_v63  ;;  %v4071_v8 = vpack.c.bf16 %v2116_v42, %v2115_v30  ;;  %v701_v63 = vsel %vm387_vm1, %v655_v15, %v656_v52  ;;  %v661_v42 = vrot.slane %v4726_v34, 1 }
  0xe8   : > { %978 = vmatmul.mubr.f32.gmra.mrb[36].mxu0 %v4623_v55  ;;  %4067 = vmatprep.subr.bf16.mxu1 %v7019_v23  ;;  %v2117_v55 = vld [vmem:[#allocation5 + $0x3c0] sm:$0xff] }
  0xe9   : > { %982 = vmatprep.mubr.f32.mxu0 %v706_v19  ;;  %v5143_v19 = vld [vmem:[%s4559_s21 + $0xa8] sm:$0xff] }
  0xea   : > { %1548 = vmatmul.mubr.f32.gmra.mrb[52].mxu1 %v4867_v18  ;;  %v704_v18 = vsel %vm387_vm1, %v652_v6, %v653_v46  ;;  %v660_v6 = vrot.slane %v4715_v16, 1 }
  0xeb   : > { %1552 = vmatprep.mubr.f32.mxu1 %v4955_v27  ;;  %4069 = vmatpush1.bf16.msra.mxu1 %v4068_v1  ;;  %v4074_v27 = vpack.c.bf16 %v2118_v32, %v2117_v55  ;;  %v5156_v1 = vld [vmem:[%s4559_s21 + $0xb0] sm:$0xff]  ;;  %v5181_v32 = vld [vmem:[%s4559_s21 + $0xc0] sm:$0xff] }
  0xec   : > { %983 = vmatmul.mubr.f32.gmra.mrb[38].mxu0 %v4626_v57  ;;  %4070 = vmatprep.subr.bf16.mxu1 %v7019_v23  ;;  %v2119_v57 = vld [vmem:[#allocation5 + $0x3d0] sm:$0xff]  ;;  %v696_v46 = vsel %vm387_vm1, %v660_v6, %v661_v42 }
  0xed   : > { %987 = vmatprep.mubr.f32.mxu0 %v705_v12  ;;  %v5170_v12 = vld [vmem:[%s4559_s21 + $0x98] sm:$0xff] }
  0xee   : > { %1553 = vmatmul.mubr.f32.gmra.mrb[54].mxu1 %v4892_v25 }
  0xef   : > { %1557 = vmatprep.mubr.f32.mxu1 %v4976_v0  ;;  %4072 = vmatpush1.bf16.msra.mxu1 %v4071_v8  ;;  %v4077_v0 = vpack.c.bf16 %v2120_v49, %v2119_v57  ;;  %v662_v8 = vrot.slane %v4729_v37, 1  ;;  %v5192_v57 = vld [vmem:[%s4559_s21 + $0xc8] sm:$0xff] }
  0xf0   : > { %988 = vmatmul.mubr.f32.gmra.mrb[40].mxu0 %v4645_v5  ;;  %4073 = vmatprep.subr.bf16.mxu1 %v7019_v23  ;;  %v2121_v5 = vld [vmem:[#allocation5 + $0x3e0] sm:$0xff]  ;;  %v362_v15 = vrot.slane %v5192_v57, 1 }
  0xf1   : > { %992 = vmatprep.mubr.f32.mxu0 %v704_v18  ;;  %v695_v18 = vsel %vm387_vm1, %v661_v42, %v662_v8  ;;  %v694_v49 = vsel %vm387_vm1, %v662_v8, %v663_v45  ;;  %v5258_v42 = vld [vmem:[%s4559_s21 + $0xf8] sm:$0xff] }
  0xf2   : > { %1558 = vmatmul.mubr.f32.gmra.mrb[56].mxu1 %v4917_v35  ;;  %v368_v8 = vrot.slane %v5258_v42, 1 }
  0xf3   : > { %1562 = vmatprep.mubr.f32.mxu1 %v4990_v2  ;;  %4075 = vmatpush1.bf16.msra.mxu1 %v4074_v27  ;;  %v4080_v2 = vpack.c.bf16 %v2122_v10, %v2121_v5  ;;  %v361_v27 = vrot.slane %v5181_v32, 1  ;;  %v665_v10 = vrot.slane %v4757_v17, 1 }
  0xf4   : > { %993 = vmatmul.mubr.f32.gmra.mrb[42].mxu0 %v4655_v9  ;;  %4076 = vmatprep.subr.bf16.mxu1 %v7019_v23  ;;  %v2123_v9 = vld [vmem:[#allocation5 + $0x3f0] sm:$0xff] }
  0xf5   : > { %997 = vmatprep.mubr.f32.mxu0 %v703_v13  ;;  %v664_v13 = vrot.slane %v4743_v56, 1 }
  0xf6   : > { %1563 = vmatmul.mubr.f32.gmra.mrb[58].mxu1 %v4942_v4 }
  0xf7   : > { %1567 = vmatprep.mubr.f32.mxu1 %v5005_v61  ;;  %4078 = vmatpush1.bf16.msra.mxu1 %v4077_v0  ;;  %v4083_v61 = vpack.c.bf16 %v2124_v50, %v2123_v9  ;;  %v5203_v0 = vld [vmem:[%s4559_s21 + $0xd0] sm:$0xff]  ;;  %v693_v5 = vsel %vm387_vm1, %v663_v45, %v664_v13  ;;  %v666_v9 = vrot.slane %v4760_v20, 1 }
  0xf8   : > { %998 = vmatmul.mubr.f32.gmra.mrb[44].mxu0 %v4670_v21  ;;  %4079 = vmatprep.subr.bf16.mxu1 %v7019_v23  ;;  %v700_v21 = vsel %vm387_vm1, %v656_v52, %v657_v7  ;;  %v5214_v52 = vld [vmem:[%s4559_s21 + $0xd8] sm:$0xff] }
  0xf9   : > { %1002 = vmatprep.mubr.f32.mxu0 %v702_v40  ;;  %v363_v40 = vrot.slane %v5203_v0, 1  ;;  %v364_v50 = vrot.slane %v5214_v52, 1 }
  0xfa   : > { %1568 = vmatmul.mubr.f32.gmra.mrb[60].mxu1 %v4964_v3 }
  0xfb   : > { %1572 = vmatprep.mubr.f32.mxu1 %v5016_v36  ;;  %4081 = vmatpush1.bf16.msra.mxu1 %v4080_v2  ;;  %v5133_v36 = vld [vmem:[%s4559_s21 + $0xa0] sm:$0xff]  ;;  %v692_v2 = vsel %vm387_vm1, %v664_v13, %v665_v10  ;;  %v7027_v13 = vld [vmem:[#allocation14_spill] sm:$0xff] }
  0xfc   : > { %1003 = vmatmul.mubr.f32.gmra.mrb[46].mxu0 %v4673_v24  ;;  %4082 = vmatprep.subr.bf16.mxu1 %v7019_v23  ;;  %v699_v24 = vsel %vm387_vm1, %v657_v7, %v658_v38  ;;  %v659_v23 = vrot.slane %v4712_v14, 1  ;;  %v691_v7 = vsel %vm387_vm1, %v665_v10, %v666_v9 }
  0xfd   : > { %1007 = vmatprep.mubr.f32.mxu0 %v701_v63  ;;  %v5225_v63 = vld [vmem:[%s4559_s21 + $0xe0] sm:$0xff] }
  0xfe   : > { %1573 = vmatmul.mubr.f32.gmra.mrb[62].mxu1 %v4980_v11  ;;  %v697_v30 = vsel %vm387_vm1, %v659_v23, %v660_v6 }
  0xff   : > { %1577 = vmatprep.mubr.f32.mxu1 %v5029_v33  ;;  %4084 = vmatpush1.bf16.msra.mxu1 %v4083_v61  ;;  %v357_v33 = vrot.slane %v5133_v36, 1  ;;  %v667_v61 = vrot.slane %v4775_v43, 1 }
 0x100   : > { %1008 = vmatmul.mubr.f32.gmra.mrb[48].mxu0 %v4684_v39  ;;  %v698_v39 = vsel %vm387_vm1, %v658_v38, %v659_v23  ;;  %v5236_v38 = vld [vmem:[%s4559_s21 + $0xe8] sm:$0xff]  ;;  %v668_v23 = vrot.slane %v4778_v44, 1 }
 0x101   : > { %1012 = vmatprep.mubr.f32.mxu0 %v700_v21  ;;  %v365_v21 = vrot.slane %v5225_v63, 1 }
 0x102   : > { %1578 = vmatmul.mubr.f32.gmra.mrb[64].mxu1 %v4994_v31  ;;  %v689_v6 = vsel %vm387_vm1, %v667_v61, %v668_v23 }
 0x103   : > { %1582 = vmatprep.mubr.f32.mxu1 %v5039_v47  ;;  %v358_v47 = vrot.slane %v5143_v19, 1 }
 0x104   : > { %1013 = vmatmul.mubr.f32.gmra.mrb[50].mxu0 %v4687_v41  ;;  %v415_v41 = vsel %vm387_vm1, %v5042_v48, %v357_v33  ;;  %v359_v48 = vrot.slane %v5156_v1, 1 }
 0x105   : > { %1017 = vmatprep.mubr.f32.mxu0 %v699_v24  ;;  %v690_v24 = vsel %vm387_vm1, %v666_v9, %v667_v61 }
 0x106   : > { %1583 = vmatmul.mubr.f32.gmra.mrb[66].mxu1 %v5009_v54 }
 0x107   : > { %1587 = vmatprep.mubr.f32.mxu1 %v5052_v59  ;;  %v5167_v59 = vld [vmem:[%s4559_s21 + $0xb8] sm:$0xff] }
 0x108   : > { %1018 = vmatmul.mubr.f32.gmra.mrb[52].mxu0 %v4698_v53  ;;  %v414_v53 = vsel %vm387_vm1, %v357_v33, %v358_v47  ;;  %v360_v55 = vrot.slane %v5167_v59, 1  ;;  %v366_v33 = vrot.slane %v5236_v38, 1 }
 0x109   : > { %1022 = vmatprep.mubr.f32.mxu0 %v698_v39  ;;  %v5247_v39 = vld [vmem:[%s4559_s21 + $0xf0] sm:$0xff] }
 0x10a   : > { %1588 = vmatmul.mubr.f32.gmra.mrb[68].mxu1 %v5021_v28 }
 0x10b   : > { %1592 = vmatprep.mubr.f32.mxu1 %v415_v41  ;;  %v7024_v41 = vld [vmem:[#allocation11_spill] sm:$0xff] }
 0x10c   : > { %1023 = vmatmul.mubr.f32.gmra.mrb[54].mxu0 %v4701_v60  ;;  %v413_v60 = vsel %vm387_vm1, %v358_v47, %v359_v48  ;;  %v669_v47 = vrot.slane %v7024_v41, 1 }
 0x10d   : > { %1027 = vmatprep.mubr.f32.mxu0 %v697_v30  ;;  %v367_v30 = vrot.slane %v5247_v39, 1 }
 0x10e   : > { %1593 = vmatmul.mubr.f32.gmra.mrb[70].mxu1 %v5170_v12 }
 0x10f   : > { %1597 = vmatprep.mubr.f32.mxu1 %v414_v53  ;;  %v688_v53 = vsel %vm387_vm1, %v668_v23, %v669_v47 }
 0x110   : > { %1028 = vmatmul.mubr.f32.gmra.mrb[56].mxu0 %v4712_v14  ;;  %v412_v14 = vsel %vm387_vm1, %v359_v48, %v360_v55  ;;  %v7025_v48 = vld [vmem:[#allocation12_spill] sm:$0xff] }
 0x111   : > { %1032 = vmatprep.mubr.f32.mxu0 %v696_v46  ;;  %v670_v46 = vrot.slane %v7025_v48, 1 }
 0x112   : > { %1598 = vmatmul.mubr.f32.gmra.mrb[72].mxu1 %v5133_v36 }
 0x113   : > { %1602 = vmatprep.mubr.f32.mxu1 %v413_v60  ;;  %v5269_v60 = vld [vmem:[%s4559_s21 + $0x100] sm:$0xff] }
 0x114   : > { %1033 = vmatmul.mubr.f32.gmra.mrb[58].mxu0 %v4715_v16  ;;  %v411_v16 = vsel %vm387_vm1, %v360_v55, %v361_v27  ;;  %v687_v55 = vsel %vm387_vm1, %v669_v47, %v670_v46  ;;  %v5324_v47 = vld [vmem:[%s4559_s21 + $0x128] sm:$0xff] }
 0x115   : > { %1037 = vmatprep.mubr.f32.mxu0 %v695_v18  ;;  %v7026_v18 = vld [vmem:[#allocation13_spill] sm:$0xff] }
 0x116   : > { %1603 = vmatmul.mubr.f32.gmra.mrb[74].mxu1 %v5143_v19  ;;  %v671_v45 = vrot.slane %v7026_v18, 1 }
 0x117   : > { %1607 = vmatprep.mubr.f32.mxu1 %v412_v14  ;;  %v369_v14 = vrot.slane %v5269_v60, 1 }
 0x118   : > { %1038 = vmatmul.mubr.f32.gmra.mrb[60].mxu0 %v4726_v34  ;;  %v410_v34 = vsel %vm387_vm1, %v361_v27, %v362_v15  ;;  %v5280_v27 = vld [vmem:[%s4559_s21 + $0x108] sm:$0xff] }
 0x119   : > { %1042 = vmatprep.mubr.f32.mxu0 %v694_v49  ;;  %v686_v49 = vsel %vm387_vm1, %v670_v46, %v671_v45  ;;  %v374_v46 = vrot.slane %v5324_v47, 1 }
 0x11a   : > { %1608 = vmatmul.mubr.f32.gmra.mrb[76].mxu1 %v5156_v1 }
 0x11b   : > { %1612 = vmatprep.mubr.f32.mxu1 %v411_v16  ;;  %v672_v16 = vrot.slane %v7027_v13, 1 }
 0x11c   : > { %1043 = vmatmul.mubr.f32.gmra.mrb[62].mxu0 %v4729_v37  ;;  %v409_v37 = vsel %vm387_vm1, %v362_v15, %v363_v40  ;;  %v370_v15 = vrot.slane %v5280_v27, 1 }
 0x11d   : > { %1047 = vmatprep.mubr.f32.mxu0 %v693_v5  ;;  %v5291_v5 = vld [vmem:[%s4559_s21 + $0x110] sm:$0xff]  ;;  %v685_v10 = vsel %vm387_vm1, %v671_v45, %v672_v16 }
 0x11e   : > { %1613 = vmatmul.mubr.f32.gmra.mrb[78].mxu1 %v5167_v59  ;;  %v371_v9 = vrot.slane %v5291_v5, 1 }
 0x11f   : > { %1617 = vmatprep.mubr.f32.mxu1 %v410_v34  ;;  %v7028_v34 = vld [vmem:[#allocation15_spill] sm:$0xff] }
 0x120   : > { %1048 = vmatmul.mubr.f32.gmra.mrb[64].mxu0 %v4740_v51  ;;  %v408_v51 = vsel %vm387_vm1, %v363_v40, %v364_v50  ;;  %v673_v40 = vrot.slane %v7028_v34, 1 }
 0x121   : > { %1052 = vmatprep.mubr.f32.mxu0 %v692_v2  ;;  %v402_v2 = vsel %vm387_vm1, %v369_v14, %v370_v15 }
 0x122   : > { %1618 = vmatmul.mubr.f32.gmra.mrb[80].mxu1 %v5181_v32 }
 0x123   : > { %1622 = vmatprep.mubr.f32.mxu1 %v409_v37  ;;  %v5302_v37 = vld [vmem:[%s4559_s21 + $0x118] sm:$0xff] }
 0x124   : > { %1053 = vmatmul.mubr.f32.gmra.mrb[66].mxu0 %v4743_v56  ;;  %v407_v56 = vsel %vm387_vm1, %v364_v50, %v365_v21  ;;  %v684_v50 = vsel %vm387_vm1, %v672_v16, %v673_v40 }
 0x125   : > { %1057 = vmatprep.mubr.f32.mxu0 %v691_v7  ;;  %v7029_v7 = vld [vmem:[#allocation16_spill] sm:$0xff] }
 0x126   : > { %1623 = vmatmul.mubr.f32.gmra.mrb[82].mxu1 %v5192_v57  ;;  %v674_v61 = vrot.slane %v7029_v7, 1 }
 0x127   : > { %1627 = vmatprep.mubr.f32.mxu1 %v408_v51  ;;  %v401_v51 = vsel %vm387_vm1, %v370_v15, %v371_v9 }
 0x128   : > { %1058 = vmatmul.mubr.f32.gmra.mrb[68].mxu0 %v4757_v17  ;;  %v406_v17 = vsel %vm387_vm1, %v365_v21, %v366_v33  ;;  %v372_v21 = vrot.slane %v5302_v37, 1  ;;  %v683_v23 = vsel %vm387_vm1, %v673_v40, %v674_v61 }
 0x129   : > { %1062 = vmatprep.mubr.f32.mxu0 %v690_v24  ;;  %v5313_v24 = vld [vmem:[%s4559_s21 + $0x120] sm:$0xff] }
 0x12a   : > { %1628 = vmatmul.mubr.f32.gmra.mrb[84].mxu1 %v5203_v0 }
 0x12b   : > { %1632 = vmatprep.mubr.f32.mxu1 %v407_v56  ;;  %v7030_v56 = vld [vmem:[#allocation17_spill] sm:$0xff] }
 0x12c   : > { %1063 = vmatmul.mubr.f32.gmra.mrb[70].mxu0 %v4760_v20  ;;  %v405_v20 = vsel %vm387_vm1, %v366_v33, %v367_v30  ;;  %v675_v33 = vrot.slane %v7030_v56, 1 }
 0x12d   : > { %1067 = vmatprep.mubr.f32.mxu0 %v689_v6  ;;  %v400_v6 = vsel %vm387_vm1, %v371_v9, %v372_v21 }
 0x12e   : > { %1633 = vmatmul.mubr.f32.gmra.mrb[86].mxu1 %v5214_v52 }
 0x12f   : > { %1637 = vmatprep.mubr.f32.mxu1 %v406_v17  ;;  %v682_v17 = vsel %vm387_vm1, %v674_v61, %v675_v33 }
 0x130   : > { %1068 = vmatmul.mubr.f32.gmra.mrb[72].mxu0 %v4775_v43  ;;  %v404_v43 = vsel %vm387_vm1, %v367_v30, %v368_v8  ;;  %v7031_v30 = vld [vmem:[#allocation18_spill] sm:$0xff] }
 0x131   : > { %1072 = vmatprep.mubr.f32.mxu0 %v688_v53  ;;  %v676_v53 = vrot.slane %v7031_v30, 1 }
 0x132   : > { %1638 = vmatmul.mubr.f32.gmra.mrb[88].mxu1 %v5225_v63 }
 0x133   : > { %1642 = vmatprep.mubr.f32.mxu1 %v405_v20  ;;  %v5335_v20 = vld [vmem:[%s4559_s21 + $0x130] sm:$0xff] }
 0x134   : > { %1073 = vmatmul.mubr.f32.gmra.mrb[74].mxu0 %v4778_v44  ;;  %v403_v44 = vsel %vm387_vm1, %v368_v8, %v369_v14  ;;  %7032 = vst [vmem:[#allocation11_spill] sm:$0xff] %v5335_v20  ;;  %v681_v8 = vsel %vm387_vm1, %v675_v33, %v676_v53  ;;  %v5346_v14 = vld [vmem:[%s4559_s21 + $0x138] sm:$0xff] }
 0x135   : > { %1077 = vmatprep.mubr.f32.mxu0 %v687_v55  ;;  %v7033_v55 = vld [vmem:[#allocation19_spill] sm:$0xff]  ;;  %7034 = vst [vmem:[#allocation12_spill] sm:$0xff] %v5346_v14  ;;  %v376_v15 = vrot.slane %v5346_v14, 1 }
 0x136   : > { %1643 = vmatmul.mubr.f32.gmra.mrb[90].mxu1 %v5236_v38 }
 0x137   : > { %1647 = vmatprep.mubr.f32.mxu1 %v404_v43  ;;  %v375_v43 = vrot.slane %v5335_v20, 1 }
 0x138   : > { %1078 = vmatmul.mubr.f32.gmra.mrb[76].mxu0 %v7024_v41  ;;  %v373_v41 = vrot.slane %v5313_v24, 1 }
 0x139   : > { %1082 = vmatprep.mubr.f32.mxu0 %v686_v49  ;;  %v396_v40 = vsel %vm387_vm1, %v375_v43, %v376_v15 }
 0x13a   : > { %1648 = vmatmul.mubr.f32.gmra.mrb[92].mxu1 %v5247_v39  ;;  %v398_v45 = vsel %vm387_vm1, %v373_v41, %v374_v46 }
 0x13b   : > { %1652 = vmatprep.mubr.f32.mxu1 %v403_v44  ;;  %v397_v44 = vsel %vm387_vm1, %v374_v46, %v375_v43 }
 0x13c   : > { %1083 = vmatmul.mubr.f32.gmra.mrb[78].mxu0 %v7025_v48  ;;  %v399_v48 = vsel %vm387_vm1, %v372_v21, %v373_v41 }
 0x13d   : > { %1087 = vmatprep.mubr.f32.mxu0 %v685_v10  ;;  %v5357_v10 = vld [vmem:[%s4559_s21 + $0x140] sm:$0xff] }
 0x13e   : > { %1653 = vmatmul.mubr.f32.gmra.mrb[94].mxu1 %v5258_v42  ;;  %7036 = vst [vmem:[#allocation13_spill] sm:$0xff] %v5357_v10 }
 0x13f   : > { %1657 = vmatprep.mubr.f32.mxu1 %v402_v2  ;;  %v377_v2 = vrot.slane %v5357_v10, 1 }
 0x140   : > { %1088 = vmatmul.mubr.f32.gmra.mrb[80].mxu0 %v7026_v18  ;;  %v677_v18 = vrot.slane %v7033_v55, 1 }
 0x141   : > { %1092 = vmatprep.mubr.f32.mxu0 %v684_v50  ;;  %v5369_v50 = vld [vmem:[%s4559_s21 + $0x148] sm:$0xff] }
 0x142   : > { %1658 = vmatmul.mubr.f32.gmra.mrb[96].mxu1 %v5269_v60  ;;  %v680_v49 = vsel %vm387_vm1, %v676_v53, %v677_v18  ;;  %7037 = vst [vmem:[#allocation14_spill] sm:$0xff] %v5369_v50 }
 0x143   : > { %1662 = vmatprep.mubr.f32.mxu1 %v401_v51  ;;  %v4218_v51 = vld [vmem:[%s4559_s21 + $0x20] sm:$0xff] }
 0x144   : > { %1093 = vmatmul.mubr.f32.gmra.mrb[82].mxu0 %v7027_v13  ;;  %v7035_v13 = vld [vmem:[#allocation20_spill] sm:$0xff]  ;;  %v5378_v21 = vrot.slane %v4218_v51, 2 }
 0x145   : > { %1097 = vmatprep.mubr.f32.mxu0 %v683_v23  ;;  %v678_v16 = vrot.slane %v7035_v13, 1  ;;  %v395_v23 = vsel %vm387_vm1, %v376_v15, %v377_v2  ;;  %v326_v51 = vld [vmem:[#allocation5 + $0x128] sm:$0xff] }
 0x146   : > { %1663 = vmatmul.mubr.f32.gmra.mrb[98].mxu1 %v5280_v27 }
 0x147   : > { %1667 = vmatprep.mubr.f32.mxu1 %v400_v6  ;;  %v726_v61 = vsel %vm387_vm1, %v678_v16, %v4637_v62  ;;  %v4219_v6 = vld [vmem:[%s4559_s21 + $0x28] sm:$0xff] }
 0x148   : > { %1098 = vmatmul.mubr.f32.gmra.mrb[84].mxu0 %v7028_v34  ;;  %v679_v34 = vsel %vm387_vm1, %v677_v18, %v678_v16  ;;  %v729_v41 = vrot.slane %v4219_v6, 2 }
 0x149   : > { %1102 = vmatprep.mubr.f32.mxu0 %v682_v17  ;;  %v5388_v17 = vld [vmem:[%s4559_s21 + $0x150] sm:$0xff] }
 0x14a   : > { %1668 = vmatmul.mubr.f32.gmra.mrb[100].mxu1 %v5291_v5  ;;  %7039 = vst [vmem:[#allocation16_spill] sm:$0xff] %v5388_v17 }
 0x14b   : > { %1672 = vmatprep.mubr.f32.mxu1 %v399_v48  ;;  %v4220_v48 = vld [vmem:[%s4559_s21 + $0x30] sm:$0xff] }
 0x14c   : > { %1103 = vmatmul.mubr.f32.gmra.mrb[86].mxu0 %v7029_v7  ;;  %v730_v46 = vrot.slane %v4220_v48, 2 }
 0x14d   : > { %1107 = vmatprep.mubr.f32.mxu0 %v681_v8  ;;  %v323_v8 = vld [vmem:[#allocation5 + $0x110] sm:$0xff] }
 0x14e   : > { %1673 = vmatmul.mubr.f32.gmra.mrb[102].mxu1 %v5302_v37 }
 0x14f   : > { %1677 = vmatprep.mubr.f32.mxu1 %v398_v45  ;;  %v379_v45 = vrot.slane %v5388_v17, 1 }
 0x150   : > { %1108 = vmatmul.mubr.f32.gmra.mrb[88].mxu0 %v7030_v56  ;;  %v378_v56 = vrot.slane %v5369_v50, 1 }
 0x151   : > { %1112 = vmatprep.mubr.f32.mxu0 %v680_v49  ;;  %v4221_v49 = vld [vmem:[%s4559_s21 + $0x38] sm:$0xff] }
 0x152   : > { %1678 = vmatmul.mubr.f32.gmra.mrb[104].mxu1 %v5313_v24  ;;  %v394_v18 = vsel %vm387_vm1, %v377_v2, %v378_v56  ;;  %v731_v16 = vrot.slane %v4221_v49, 2 }
 0x153   : > { %1682 = vmatprep.mubr.f32.mxu1 %v397_v44  ;;  %v5412_v44 = vld [vmem:[%s4559_s21 + $0x158] sm:$0xff] }
 0x154   : > { %1113 = vmatmul.mubr.f32.gmra.mrb[90].mxu0 %v7031_v30  ;;  %v7040_v30 = vrot.slane %v4630_v58, 2  ;;  %v5408_v58 = vsel %vm484_vm0, %v5378_v21, %v729_v41  ;;  %7042 = vst [vmem:[#allocation18_spill] sm:$0xff] %v5412_v44  ;;  %v380_v6 = vrot.slane %v5412_v44, 1 }
 0x155   : > { %v5366_v9 = vpop.f32.mrb[0].mxu1  ;;  %1117 = vmatprep.mubr.f32.mxu0 %v679_v34 }
 0x156   : > { %v5371_v7 = vpop.f32.mrb[1].mxu1  ;;  %1683 = vmatmul.mubr.f32.gmra.mrb[106].mxu1 %v5324_v47  ;;  %v821_v53 = vsel %vm484_vm0, %v7040_v30, %v5378_v21 }
 0x157   : > { %1687 = vmatprep.mubr.f32.mxu1 %v396_v40  ;;  %v4222_v40 = vld [vmem:[%s4559_s21 + $0x40] sm:$0xff] }
 0x158   : > { %1118 = vmatmul.mubr.f32.gmra.mrb[92].mxu0 %v7033_v55  ;;  %v324_v55 = vld [vmem:[#allocation5 + $0x118] sm:$0xff]  ;;  %v732_v2 = vrot.slane %v4222_v40, 2 }
 0x159   : > { %v5384_v33 = vpop.f32.mrb[2].mxu1  ;;  %1122 = vmatprep.mubr.f32.mxu0 %v726_v61  ;;  %v4009_v34 = vpack.c.bf16 %v324_v55, %v323_v8  ;;  %v325_v61 = vld [vmem:[#allocation5 + $0x120] sm:$0xff]  ;;  %v328_v40 = vld [vmem:[#allocation5 + $0x138] sm:$0xff] }
 0x15a   : > { %7038 = vst [vmem:[#allocation15_spill] sm:$0xff] %v5384_v33  ;;  %v5390_v62 = vpop.f32.mrb[3].mxu1  ;;  %1688 = vmatmul.mubr.f32.gmra.mrb[108].mxu1 %v5335_v20  ;;  %v5436_v8 = vld [vmem:[%s4559_s21 + $0x160] sm:$0xff] }
 0x15b   : > { %1692 = vmatprep.mubr.f32.mxu1 %v395_v23  ;;  %v393_v23 = vsel %vm387_vm1, %v378_v56, %v379_v45  ;;  %7045 = vst [vmem:[#allocation22_spill] sm:$0xff] %v5436_v8  ;;  %v5443_v56 = vsel %vm484_vm0, %v731_v16, %v732_v2 }
 0x15c   : > { %1123 = vmatmul.mubr.f32.gmra.mrb[94].mxu0 %v7035_v13  ;;  %v5419_v13 = vsel %vm484_vm0, %v729_v41, %v730_v46  ;;  %v5432_v41 = vsel %vm484_vm0, %v730_v46, %v731_v16  ;;  %v327_v46 = vld [vmem:[#allocation5 + $0x130] sm:$0xff] }
 0x15d   : > { %v5403_v43 = vpop.f32.mrb[4].mxu1  ;;  %3597 = vmatprep.mubr.f32.mxu0 %v821_v53  ;;  %v4223_v53 = vld [vmem:[%s4559_s21 + $0x48] sm:$0xff] }
 0x15e   : > { %7041 = vst [vmem:[#allocation17_spill] sm:$0xff] %v5403_v43  ;;  %v5414_v15 = vpop.f32.mrb[5].mxu1  ;;  %1693 = vmatmul.mubr.f32.gmra.mrb[110].mxu1 %v5346_v14  ;;  %v733_v48 = vrot.slane %v4223_v53, 2  ;;  %v392_v53 = vsel %vm387_vm1, %v379_v45, %v380_v6 }
 0x15f   : > { %7043 = vst [vmem:[#allocation19_spill] sm:$0xff] %v5414_v15  ;;  %1697 = vmatprep.mubr.f32.mxu1 %v394_v18  ;;  %v4224_v18 = vld [vmem:[%s4559_s21 + $0x50] sm:$0xff]  ;;  %v5587_v15 = vld [vmem:[%s4559_s21 + $0x40] sm:$0xff] }
 0x160   : > { %3598 = vmatmul.mubr.f32.vlgmr.msra.gmra.mrb[96].mxu0 %v5408_v58  ;;  %v734_v49 = vrot.slane %v4224_v18, 2  ;;  %v5455_v16 = vsel %vm484_vm0, %v732_v2, %v733_v48  ;;  %v736_v18 = vrot.slane %v4917_v35, 2  ;;  %v329_v2 = vld [vmem:[#allocation5 + $0x140] sm:$0xff]  ;;  %v737_v35 = vrot.slane %v4942_v4, 2 }
 0x161   : > { %v5426_v30 = vpop.f32.mrb[6].mxu1  ;;  %4008 = vmatpush3.bf16.msra.mxu0 %v5074_v29  ;;  %3600 = vmatprep.mubr.f32.mxu0 %v5419_v13  ;;  %v4013_v29 = vpack.c.bf16 %v326_v51, %v325_v61  ;;  %v735_v61 = vrot.slane %v4892_v25, 2  ;;  %v5459_v51 = vld [vmem:[%s4559_s21 + $0x168] sm:$0xff] }
 0x162   : > { %7044 = vst [vmem:[#allocation20_spill] sm:$0xff] %v5426_v30  ;;  %v5438_v55 = vpop.f32.mrb[7].mxu1  ;;  %1698 = vmatmul.mubr.f32.gmra.mrb[112].mxu1 %v5357_v10  ;;  %4010 = vmatprep.subr.bf16.mxu0 %v4009_v34  ;;  %v381_v30 = vrot.slane %v5436_v8, 1  ;;  %7048 = vst [vmem:[#allocation25_spill] sm:$0xff] %v5459_v51  ;;  %v5466_v45 = vsel %vm484_vm0, %v733_v48, %v734_v49  ;;  %v7062_v10 = vld [vmem:[#allocation21_spill] sm:$0xff] }
 0x163   : > { %7046 = vst [vmem:[#allocation23_spill] sm:$0xff] %v5438_v55  ;;  %1702 = vmatprep.mubr.f32.mxu1 %v393_v23  ;;  %v5478_v48 = vsel %vm484_vm0, %v734_v49, %v735_v61  ;;  %v331_v49 = vld [vmem:[#allocation5 + $0x150] sm:$0xff] }
 0x164   : > { %3601 = vmatmul.mubr.f32.gmra.mrb[98].mxu0 %v5432_v41  ;;  %v391_v25 = vsel %vm387_vm1, %v380_v6, %v381_v30  ;;  %v5489_v6 = vsel %vm484_vm0, %v735_v61, %v736_v18  ;;  %v5505_v61 = vld [vmem:[%s4559_s21 + $0x178] sm:$0xff] }
 0x165   : > { %v5450_v55 = vpop.f32.mrb[8].mxu1  ;;  %4012 = vmatpush3.bf16.msra.mxu0 %v4009_v34  ;;  %3603 = vmatprep.mubr.f32.mxu0 %v5443_v56  ;;  %v4017_v34 = vpack.c.bf16 %v328_v40, %v327_v46  ;;  %v5482_v46 = vld [vmem:[%s4559_s21 + $0x170] sm:$0xff] }
 0x166   : > { %7047 = vst [vmem:[#allocation24_spill] sm:$0xff] %v5450_v55  ;;  %v5461_v23 = vpop.f32.mrb[9].mxu1  ;;  %1703 = vmatmul.mubr.f32.gmra.mrb[114].mxu1 %v5369_v50  ;;  %4014 = vmatprep.subr.bf16.mxu0 %v4013_v29  ;;  %v330_v55 = vld [vmem:[#allocation5 + $0x148] sm:$0xff]  ;;  %7051 = vst [vmem:[#allocation28_spill] sm:$0xff] %v5482_v46 }
 0x167   : > { %7049 = vst [vmem:[#allocation26_spill] sm:$0xff] %v5461_v23  ;;  %1707 = vmatprep.mubr.f32.mxu1 %v392_v53  ;;  %v382_v23 = vrot.slane %v5459_v51, 1  ;;  %v738_v53 = vrot.slane %v4964_v3, 2  ;;  %v739_v3 = vrot.slane %v4980_v11, 2 }
 0x168   : > { %3604 = vmatmul.mubr.f32.gmra.mrb[100].mxu0 %v5455_v16 }
 0x169   : > { %v5473_v43 = vpop.f32.mrb[10].mxu1  ;;  %4016 = vmatpush3.bf16.msra.mxu0 %v4013_v29  ;;  %3606 = vmatprep.mubr.f32.mxu0 %v5466_v45  ;;  %v4021_v29 = vpack.c.bf16 %v330_v55, %v329_v2  ;;  %v390_v4 = vsel %vm387_vm1, %v381_v30, %v382_v23  ;;  %v5501_v55 = vsel %vm484_vm0, %v736_v18, %v737_v35  ;;  %v334_v18 = vld [vmem:[#allocation5 + $0x168] sm:$0xff] }
 0x16a   : > { %7050 = vst [vmem:[#allocation27_spill] sm:$0xff] %v5473_v43  ;;  %v5484_v40 = vpop.f32.mrb[11].mxu1  ;;  %1708 = vmatmul.mubr.f32.gmra.mrb[116].mxu1 %v5388_v17  ;;  %4018 = vmatprep.subr.bf16.mxu0 %v4017_v34  ;;  %v332_v43 = vld [vmem:[#allocation5 + $0x158] sm:$0xff]  ;;  %v5512_v30 = vsel %vm484_vm0, %v737_v35, %v738_v53 }
 0x16b   : > { %7052 = vst [vmem:[#allocation29_spill] sm:$0xff] %v5484_v40  ;;  %1712 = vmatprep.mubr.f32.mxu1 %v391_v25  ;;  %v383_v40 = vrot.slane %v5482_v46, 1  ;;  %v740_v25 = vrot.slane %v4994_v31, 2  ;;  %v741_v31 = vrot.slane %v5009_v54, 2  ;;  %v336_v54 = vld [vmem:[#allocation5 + $0x178] sm:$0xff] }
 0x16c   : > { %3607 = vmatmul.mubr.f32.gmra.mrb[102].mxu0 %v5478_v48 }
 0x16d   : > { %v5496_v17 = vpop.f32.mrb[12].mxu1  ;;  %4020 = vmatpush3.bf16.msra.mxu0 %v4017_v34  ;;  %3609 = vmatprep.mubr.f32.mxu0 %v5489_v6  ;;  %v4025_v34 = vpack.c.bf16 %v332_v43, %v331_v49  ;;  %v389_v11 = vsel %vm387_vm1, %v382_v23, %v383_v40  ;;  %v5524_v43 = vsel %vm484_vm0, %v738_v53, %v739_v3  ;;  %v5535_v49 = vrot.slane %v5021_v28, 2  ;;  %v335_v53 = vld [vmem:[#allocation5 + $0x170] sm:$0xff] }
 0x16e   : > { %7053 = vst [vmem:[#allocation30_spill] sm:$0xff] %v5496_v17  ;;  %v5507_v2 = vpop.f32.mrb[13].mxu1  ;;  %1713 = vmatmul.mubr.f32.gmra.mrb[118].mxu1 %v5412_v44  ;;  %4022 = vmatprep.subr.bf16.mxu0 %v4021_v29  ;;  %v333_v17 = vld [vmem:[#allocation5 + $0x160] sm:$0xff]  ;;  %v5532_v23 = vsel %vm484_vm0, %v739_v3, %v740_v25  ;;  %v5547_v28 = vsel %vm484_vm0, %v740_v25, %v741_v31  ;;  %v5553_v3 = vld [vmem:[%s4559_s21 + $0x38] sm:$0xff] }
 0x16f   : > { %7054 = vst [vmem:[#allocation31_spill] sm:$0xff] %v5507_v2  ;;  %1717 = vmatprep.mubr.f32.mxu1 %v390_v4  ;;  %v384_v2 = vrot.slane %v5505_v61, 1  ;;  %v2142_v25 = vrot.slane %v5553_v3, 1 }
 0x170   : > { %3610 = vmatmul.mubr.f32.gmra.mrb[104].mxu0 %v5501_v55 }
 0x171   : > { %v5519_v50 = vpop.f32.mrb[14].mxu1  ;;  %4024 = vmatpush3.bf16.msra.mxu0 %v4021_v29  ;;  %3612 = vmatprep.mubr.f32.mxu0 %v5512_v30  ;;  %v4029_v29 = vpack.c.bf16 %v334_v18, %v333_v17  ;;  %v5550_v17 = vld [vmem:[%s4559_s21 + $0x30] sm:$0xff]  ;;  %v5564_v18 = vld [vmem:[%s4559_s21] sm:$0xff] }
 0x172   : > { %7055 = vst [vmem:[#allocation32_spill] sm:$0xff] %v5519_v50  ;;  %v5527_v35 = vpop.f32.mrb[15].mxu1  ;;  %1718 = vmatmul.mubr.f32.gmra.mrb[120].mxu1 %v5436_v8  ;;  %4026 = vmatprep.subr.bf16.mxu0 %v4025_v34  ;;  %7060 = vst [vmem:[#allocation37_spill] sm:$0xff] %v5564_v18 }
 0x173   : > { %7056 = vst [vmem:[#allocation33_spill] sm:$0xff] %v5527_v35  ;;  %v5537_v4 = vpop.f32.mrb[0].mxu0  ;;  %1722 = vmatprep.mubr.f32.mxu1 %v389_v11  ;;  %v388_v35 = vsel %vm387_vm1, %v383_v40, %v384_v2  ;;  %v5561_v40 = vsel %vm484_vm0, %v741_v31, %v5535_v49  ;;  %v4226_v11 = vld [vmem:[%s4559_s21 + $0x8] sm:$0xff]  ;;  %v7063_v31 = vrot.slane %v7062_v10, 1  ;;  %v4227_v10 = vld [vmem:[%s4559_s21 + $0x10] sm:$0xff] }
 0x174   : > { %7057 = vst [vmem:[#allocation34_spill] sm:$0xff] %v5537_v4  ;;  %v891_v50 = vpop.f32.mrb[1].mxu0  ;;  %3613 = vmatmul.mubr.f32.gmra.mrb[106].mxu0 %v5524_v43  ;;  %v437_v4 = vrot.slane %v4226_v11, 2 }
 0x175   : > { %v5542_v8 = vpop.f32.mrb[16].mxu1  ;;  %4028 = vmatpush3.bf16.msra.mxu0 %v4025_v34  ;;  %3615 = vmatprep.mubr.f32.mxu0 %v5532_v23  ;;  %v4033_v34 = vpack.c.bf16 %v336_v54, %v335_v53  ;;  %v435_v53 = vsel %vm387_vm1, %v384_v2, %v7063_v31  ;;  %v7067_v31 = vrot.slane %v5564_v18, 2  ;;  %v4228_v54 = vld [vmem:[%s4559_s21 + $0x18] sm:$0xff]  ;;  %v2143_v18 = vrot.slane %v5587_v15, 1 }
 0x176   : > { %7058 = vst [vmem:[#allocation35_spill] sm:$0xff] %v5542_v8  ;;  %v5555_v50 = vpop.f32.mrb[17].mxu1  ;;  %1723 = vmatmul.mubr.f32.gmra.mrb[122].mxu1 %v5459_v51  ;;  %4030 = vmatprep.subr.bf16.mxu0 %v4029_v29  ;;  %v2126_v51 = vld [vmem:[#allocation5 + $0x408] sm:$0xff] }
 0x177   : > { %7059 = vst [vmem:[#allocation36_spill] sm:$0xff] %v5555_v50  ;;  %v5568_v8 = vpop.f32.mrb[2].mxu0  ;;  %1727 = vmatprep.mubr.f32.mxu1 %v388_v35  ;;  %v2125_v50 = vld [vmem:[#allocation5 + $0x400] sm:$0xff]  ;;  %v7065_v35 = vrot.slane %v4588_v26, 2 }
 0x178   : > { %7061 = vst [vmem:[#allocation38_spill] sm:$0xff] %v5568_v8  ;;  %v896_v44 = vpop.f32.mrb[3].mxu0  ;;  %3616 = vmatmul.mubr.f32.gmra.mrb[108].mxu0 %v5547_v28  ;;  %v438_v8 = vrot.slane %v4227_v10, 2  ;;  %v4085_v26 = vpack.c.bf16 %v2126_v51, %v2125_v50  ;;  %v2128_v10 = vld [vmem:[#allocation5 + $0x418] sm:$0xff] }
 0x179   : > { %v5577_v11 = vpop.f32.mrb[18].mxu1  ;;  %4032 = vmatpush3.bf16.msra.mxu0 %v4029_v29  ;;  %3618 = vmatprep.mubr.f32.mxu0 %v5561_v40  ;;  %v806_v44 = vsel %vm484_vm0, %v5535_v49, %v7065_v35  ;;  %v531_v29 = vsel %vm484_vm0, %v7067_v31, %v437_v4  ;;  %v2127_v35 = vld [vmem:[#allocation5 + $0x410] sm:$0xff]  ;;  %v5609_v50 = vld [vmem:[%s4559_s21 + $0x48] sm:$0xff] }
 0x17a   : > { %7064 = vst [vmem:[#allocation21_spill] sm:$0xff] %v5577_v11  ;;  %v5589_v2 = vpop.f32.mrb[19].mxu1  ;;  %1728 = vmatmul.mubr.f32.gmra.mrb[124].mxu1 %v5482_v46  ;;  %4034 = vmatprep.subr.bf16.mxu0 %v4033_v34  ;;  %v439_v11 = vrot.slane %v4228_v54, 2  ;;  %v530_v51 = vsel %vm484_vm0, %v437_v4, %v438_v8  ;;  %v4089_v54 = vpack.c.bf16 %v2128_v10, %v2127_v35  ;;  %v5627_v35 = vld [vmem:[%s4559_s21 + $0x50] sm:$0xff] }
 0x17b   : > { %7066 = vst [vmem:[#allocation39_spill] sm:$0xff] %v5589_v2  ;;  %v5597_v14 = vpop.f32.mrb[4].mxu0  ;;  %1732 = vmatprep.mubr.f32.mxu1 %v435_v53  ;;  %v7069_v2 = vrot.slane %v5550_v17, 1  ;;  %v2234_v4 = vsel %vm387_vm1, %v2142_v25, %v2143_v18 }
 0x17c   : > { %7068 = vst [vmem:[#allocation40_spill] sm:$0xff] %v5597_v14  ;;  %v901_v20 = vpop.f32.mrb[5].mxu0  ;;  %3619 = vmatmul.mubr.f32.gmra.mrb[110].mxu0 %v806_v44 }
 0x17d   : > { %v2235_v46 = vsel %vm387_vm1, %v7069_v2, %v2142_v25  ;;  %v5604_v33 = vpop.f32.mrb[20].mxu1  ;;  %4036 = vmatpush3.bf16.msra.mxu0 %v4033_v34  ;;  %3701 = vmatprep.mubr.f32.mxu0 %v531_v29  ;;  %v529_v20 = vsel %vm484_vm0, %v438_v8, %v439_v11  ;;  %v2129_v34 = vld [vmem:[#allocation5 + $0x420] sm:$0xff]  ;;  %v2130_v2 = vld [vmem:[#allocation5 + $0x428] sm:$0xff]  ;;  %v2144_v29 = vrot.slane %v5609_v50, 1  ;;  %v528_v8 = vsel %vm484_vm0, %v439_v11, %v5378_v21 }
 0x17e   : > { %v5611_v53 = vpop.f32.mrb[21].mxu1  ;;  %1733 = vmatmul.mubr.f32.gmra.mrb[126].mxu1 %v5505_v61  ;;  %4086 = vmatprep.subr.bf16.mxu0 %v4085_v26  ;;  %v4093_v10 = vpack.c.bf16 %v2130_v2, %v2129_v34  ;;  %v2145_v21 = vrot.slane %v5627_v35, 1 }
 0x17f   : > { %v5616_v44 = vpop.f32.mrb[6].mxu0  ;;  %2397 = vmatprep.mubr.f32.mxu1 %v2235_v46 }
 0x180   : > { %7070 = vst [vmem:[#allocation41_spill] sm:$0xff] %v5616_v44  ;;  %v906_v31 = vpop.f32.mrb[7].mxu0  ;;  %3702 = vmatmul.mubr.f32.vlgmr.msra.gmra.mrb[112].mxu0 %v530_v51  ;;  %v2131_v51 = vld [vmem:[#allocation5 + $0x430] sm:$0xff]  ;;  %v5641_v44 = vld [vmem:[%s4559_s21 + $0x58] sm:$0xff] }
 0x181   : > { %v5621_v14 = vpop.f32.mrb[22].mxu1  ;;  %4088 = vmatpush3.bf16.msra.mxu0 %v4085_v26  ;;  %3704 = vmatprep.mubr.f32.mxu0 %v529_v20  ;;  %v2132_v31 = vld [vmem:[#allocation5 + $0x438] sm:$0xff]  ;;  %v2233_v20 = vsel %vm387_vm1, %v2143_v18, %v2144_v29  ;;  %v2133_v18 = vld [vmem:[#allocation5 + $0x440] sm:$0xff] }
 0x182   : > { %v5629_v46 = vpop.f32.mrb[23].mxu1  ;;  %2398 = vmatmul.mubr.f32.vlgmr.msra.gmra.mrb[128].mxu1 %v5550_v17  ;;  %4090 = vmatprep.subr.bf16.mxu0 %v4089_v54  ;;  %v4097_v2 = vpack.c.bf16 %v2132_v31, %v2131_v51 }
 0x183   : > { %v5632_v25 = vpop.f32.mrb[8].mxu0  ;;  %2402 = vmatprep.mubr.f32.mxu1 %v2234_v4 }
 0x184   : > { %7071 = vst [vmem:[#allocation42_spill] sm:$0xff] %v5632_v25  ;;  %v911_v26 = vpop.f32.mrb[9].mxu0  ;;  %3705 = vmatmul.mubr.f32.gmra.mrb[114].mxu0 %v528_v8  ;;  %v2134_v8 = vld [vmem:[#allocation5 + $0x448] sm:$0xff] }
 0x185   : > { %v5637_v11 = vpop.f32.mrb[24].mxu1  ;;  %3707 = vmatprep.mubr.f32.mxu0 %v5408_v58  ;;  %4092 = vmatpush3.bf16.msra.mxu0 %v4089_v54  ;;  %v2232_v58 = vsel %vm387_vm1, %v2144_v29, %v2145_v21  ;;  %v2146_v54 = vrot.slane %v5641_v44, 1  ;;  %v4101_v31 = vpack.c.bf16 %v2134_v8, %v2133_v18  ;;  %v2135_v29 = vld [vmem:[#allocation5 + $0x450] sm:$0xff] }
 0x186   : > { %7072 = vst [vmem:[#allocation43_spill] sm:$0xff] %v5637_v11  ;;  %v5643_v34 = vpop.f32.mrb[25].mxu1  ;;  %2403 = vmatmul.mubr.f32.gmra.mrb[130].mxu1 %v5553_v3  ;;  %4094 = vmatprep.subr.bf16.mxu0 %v4093_v10  ;;  %v5656_v11 = vld [vmem:[%s4559_s21 + $0x60] sm:$0xff] }
 0x187   : > { %v5646_v4 = vpop.f32.mrb[10].mxu0  ;;  %2407 = vmatprep.mubr.f32.mxu1 %v2233_v20  ;;  %v2136_v20 = vld [vmem:[#allocation5 + $0x458] sm:$0xff] }
 0x188   : > { %7073 = vst [vmem:[#allocation44_spill] sm:$0xff] %v5646_v4  ;;  %v916_v26 = vpop.f32.mrb[11].mxu0  ;;  %3708 = vmatmul.mubr.f32.gmra.mrb[116].mxu0 %v5419_v13  ;;  %v2147_v4 = vrot.slane %v5656_v11, 1  ;;  %v4105_v8 = vpack.c.bf16 %v2136_v20, %v2135_v29 }
 0x189   : > { %v5652_v25 = vpop.f32.mrb[26].mxu1  ;;  %3710 = vmatprep.mubr.f32.mxu0 %v5432_v41  ;;  %4096 = vmatpush3.bf16.msra.mxu0 %v4093_v10  ;;  %v2231_v41 = vsel %vm387_vm1, %v2145_v21, %v2146_v54  ;;  %v2137_v21 = vld [vmem:[#allocation5 + $0x460] sm:$0xff] }
 0x18a   : > { %7074 = vst [vmem:[#allocation45_spill] sm:$0xff] %v5652_v25  ;;  %v5658_v51 = vpop.f32.mrb[27].mxu1  ;;  %2408 = vmatmul.mubr.f32.gmra.mrb[132].mxu1 %v5587_v15  ;;  %4098 = vmatprep.subr.bf16.mxu0 %v4097_v2  ;;  %v5671_v25 = vld [vmem:[%s4559_s21 + $0x68] sm:$0xff] }
 0x18b   : > { %v5661_v13 = vpop.f32.mrb[12].mxu0  ;;  %2412 = vmatprep.mubr.f32.mxu1 %v2232_v58  ;;  %v2138_v58 = vld [vmem:[#allocation5 + $0x468] sm:$0xff]  ;;  %v7140_v22 = vld [vmem:[#allocation42_spill] sm:$0xff] }
 0x18c   : > { %7075 = vst [vmem:[#allocation46_spill] sm:$0xff] %v5661_v13  ;;  %v921_v26 = vpop.f32.mrb[13].mxu0  ;;  %3711 = vmatmul.mubr.f32.gmra.mrb[118].mxu0 %v5443_v56  ;;  %v2148_v13 = vrot.slane %v5671_v25, 1  ;;  %v4109_v20 = vpack.c.bf16 %v2138_v58, %v2137_v21 }
 0x18d   : > { %v5667_v10 = vpop.f32.mrb[28].mxu1  ;;  %3713 = vmatprep.mubr.f32.mxu0 %v5455_v16  ;;  %4100 = vmatpush3.bf16.msra.mxu0 %v4097_v2  ;;  %v2230_v16 = vsel %vm387_vm1, %v2146_v54, %v2147_v4  ;;  %v2139_v54 = vld [vmem:[#allocation5 + $0x470] sm:$0xff] }
 0x18e   : > { %7076 = vst [vmem:[#allocation47_spill] sm:$0xff] %v5667_v10  ;;  %v5673_v18 = vpop.f32.mrb[29].mxu1  ;;  %2413 = vmatmul.mubr.f32.gmra.mrb[134].mxu1 %v5609_v50  ;;  %4102 = vmatprep.subr.bf16.mxu0 %v4101_v31  ;;  %v5686_v10 = vld [vmem:[%s4559_s21 + $0x70] sm:$0xff] }
 0x18f   : > { %v5676_v56 = vpop.f32.mrb[14].mxu0  ;;  %2417 = vmatprep.mubr.f32.mxu1 %v2231_v41  ;;  %v2140_v41 = vld [vmem:[#allocation5 + $0x478] sm:$0xff] }
 0x190   : > { %7077 = vst [vmem:[#allocation48_spill] sm:$0xff] %v5676_v56  ;;  %v926_v26 = vpop.f32.mrb[15].mxu0  ;;  %3714 = vmatmul.mubr.f32.gmra.mrb[120].mxu0 %v5466_v45  ;;  %v2149_v56 = vrot.slane %v5686_v10, 1  ;;  %v4113_v58 = vpack.c.bf16 %v2140_v41, %v2139_v54  ;;  %v455_v41 = vrot.slane %v5170_v12, 2 }
 0x191   : > { %v5682_v2 = vpop.f32.mrb[30].mxu1  ;;  %3716 = vmatprep.mubr.f32.mxu0 %v5478_v48  ;;  %4104 = vmatpush3.bf16.msra.mxu0 %v4101_v31  ;;  %v2229_v48 = vsel %vm387_vm1, %v2147_v4, %v2148_v13 }
 0x192   : > { %7078 = vst [vmem:[#allocation49_spill] sm:$0xff] %v5682_v2  ;;  %v5688_v29 = vpop.f32.mrb[31].mxu1  ;;  %2418 = vmatmul.mubr.f32.gmra.mrb[136].mxu1 %v5627_v35  ;;  %4106 = vmatprep.subr.bf16.mxu0 %v4105_v8  ;;  %v5701_v2 = vld [vmem:[%s4559_s21 + $0x78] sm:$0xff]  ;;  %v2228_v4 = vsel %vm387_vm1, %v2148_v13, %v2149_v56 }
 0x193   : > { %v5691_v45 = vpop.f32.mrb[16].mxu0  ;;  %2422 = vmatprep.mubr.f32.mxu1 %v2230_v16 }
 0x194   : > { %7079 = vst [vmem:[#allocation50_spill] sm:$0xff] %v5691_v45  ;;  %v931_v26 = vpop.f32.mrb[17].mxu0  ;;  %3717 = vmatmul.mubr.f32.gmra.mrb[122].mxu0 %v5489_v6  ;;  %v7104_v45 = vld [vmem:[#allocation16_spill] sm:$0xff] }
 0x195   : > { %v5697_v31 = vpop.f32.mrb[32].mxu1  ;;  %3719 = vmatprep.mubr.f32.mxu0 %v5501_v55  ;;  %4108 = vmatpush3.bf16.msra.mxu0 %v4105_v8  ;;  %v2150_v26 = vrot.slane %v5701_v2, 1  ;;  %v5714_v8 = vld [vmem:[%s4559_s21 + $0x80] sm:$0xff] }
 0x196   : > { %v1501_v21 = vpop.f32.mrb[33].mxu1  ;;  %2423 = vmatmul.mubr.f32.gmra.mrb[138].mxu1 %v5641_v44  ;;  %4110 = vmatprep.subr.bf16.mxu0 %v4109_v20 }
 0x197   : > { %v5704_v16 = vpop.f32.mrb[18].mxu0  ;;  %2427 = vmatprep.mubr.f32.mxu1 %v2229_v48  ;;  %v2227_v48 = vsel %vm387_vm1, %v2149_v56, %v2150_v26  ;;  %v457_v56 = vrot.slane %v5143_v19, 2  ;;  %v5748_v19 = vld [vmem:[%s4559_s21 + $0x90] sm:$0xff] }
 0x198   : > { %7080 = vst [vmem:[#allocation51_spill] sm:$0xff] %v5704_v16  ;;  %v936_v6 = vpop.f32.mrb[19].mxu0  ;;  %3720 = vmatmul.mubr.f32.gmra.mrb[124].mxu0 %v5512_v30  ;;  %v5924_v16 = vld [vmem:[%s4559_s21 + $0xe0] sm:$0xff] }
 0x199   : > { %v5710_v55 = vpop.f32.mrb[34].mxu1  ;;  %3722 = vmatprep.mubr.f32.mxu0 %v5524_v43  ;;  %4112 = vmatpush3.bf16.msra.mxu0 %v4109_v20  ;;  %v2151_v43 = vrot.slane %v5714_v8, 1  ;;  %v456_v20 = vrot.slane %v5133_v36, 2  ;;  %v5729_v6 = vld [vmem:[%s4559_s21 + $0x88] sm:$0xff] }
 0x19a   : > { %v1506_v54 = vpop.f32.mrb[35].mxu1  ;;  %2428 = vmatmul.mubr.f32.gmra.mrb[140].mxu1 %v5656_v11  ;;  %4114 = vmatprep.subr.bf16.mxu0 %v4113_v58 }
 0x19b   : > { %v5718_v30 = vpop.f32.mrb[20].mxu0  ;;  %2432 = vmatprep.mubr.f32.mxu1 %v2228_v4  ;;  %v2226_v36 = vsel %vm387_vm1, %v2150_v26, %v2151_v43  ;;  %v459_v26 = vrot.slane %v5167_v59, 2  ;;  %v5765_v59 = vld [vmem:[%s4559_s21 + $0x98] sm:$0xff] }
 0x19c   : > { %7081 = vst [vmem:[#allocation52_spill] sm:$0xff] %v5718_v30  ;;  %v941_v13 = vpop.f32.mrb[21].mxu0  ;;  %3723 = vmatmul.mubr.f32.gmra.mrb[126].mxu0 %v5532_v23  ;;  %v513_v23 = vsel %vm484_vm0, %v5535_v49, %v455_v41  ;;  %v458_v49 = vrot.slane %v5156_v1, 2  ;;  %v2153_v1 = vrot.slane %v5748_v19, 1  ;;  %v5816_v30 = vld [vmem:[%s4559_s21 + $0xb0] sm:$0xff] }
 0x19d   : > { %v5724_v21 = vpop.f32.mrb[36].mxu1  ;;  %3725 = vmatprep.mubr.f32.mxu0 %v5547_v28  ;;  %4116 = vmatpush3.bf16.msra.mxu0 %v4113_v58  ;;  %v2152_v28 = vrot.slane %v5729_v6, 1  ;;  %v512_v13 = vsel %vm484_vm0, %v455_v41, %v456_v20 }
 0x19e   : > { %v1511_v12 = vpop.f32.mrb[37].mxu1  ;;  %2433 = vmatmul.mubr.f32.gmra.mrb[142].mxu1 %v5671_v25 }
 0x19f   : > { %v5736_v4 = vpop.f32.mrb[22].mxu0  ;;  %2437 = vmatprep.mubr.f32.mxu1 %v2227_v48  ;;  %v2225_v41 = vsel %vm387_vm1, %v2151_v43, %v2152_v28  ;;  %v461_v43 = vrot.slane %v5192_v57, 2  ;;  %v5782_v57 = vld [vmem:[%s4559_s21 + $0xa0] sm:$0xff] }
 0x1a0   : > { %7082 = vst [vmem:[#allocation53_spill] sm:$0xff] %v5736_v4  ;;  %v946_v54 = vpop.f32.mrb[23].mxu0  ;;  %3726 = vmatmul.mubr.f32.gmra.mrb[128].mxu0 %v5561_v40  ;;  %v511_v40 = vsel %vm484_vm0, %v456_v20, %v457_v56  ;;  %v460_v20 = vrot.slane %v5181_v32, 2  ;;  %v2154_v32 = vrot.slane %v5765_v59, 1  ;;  %v5888_v4 = vld [vmem:[%s4559_s21 + $0xd0] sm:$0xff] }
 0x1a1   : > { %v5742_v58 = vpop.f32.mrb[38].mxu1  ;;  %3728 = vmatprep.mubr.f32.mxu0 %v513_v23 }
 0x1a2   : > { %v1516_v48 = vpop.f32.mrb[39].mxu1  ;;  %2438 = vmatmul.mubr.f32.gmra.mrb[144].mxu1 %v5686_v10 }
 0x1a3   : > { %v5754_v12 = vpop.f32.mrb[24].mxu0  ;;  %2442 = vmatprep.mubr.f32.mxu1 %v2226_v36  ;;  %v510_v48 = vsel %vm484_vm0, %v457_v56, %v458_v49  ;;  %v509_v36 = vsel %vm484_vm0, %v458_v49, %v459_v26  ;;  %v2224_v56 = vsel %vm387_vm1, %v2152_v28, %v2153_v1  ;;  %v462_v49 = vrot.slane %v5203_v0, 2 }
 0x1a4   : > { %7083 = vst [vmem:[#allocation54_spill] sm:$0xff] %v5754_v12  ;;  %v951_v23 = vpop.f32.mrb[25].mxu0  ;;  %3729 = vmatmul.mubr.f32.gmra.mrb[130].mxu0 %v512_v13  ;;  %v463_v28 = vrot.slane %v5214_v52, 2  ;;  %v2155_v0 = vrot.slane %v5782_v57, 1  ;;  %v5799_v52 = vld [vmem:[%s4559_s21 + $0xa8] sm:$0xff] }
 0x1a5   : > { %v5759_v54 = vpop.f32.mrb[40].mxu1  ;;  %3731 = vmatprep.mubr.f32.mxu0 %v511_v40 }
 0x1a6   : > { %7084 = vst [vmem:[#allocation55_spill] sm:$0xff] %v5759_v54  ;;  %v1521_v12 = vpop.f32.mrb[41].mxu1  ;;  %2443 = vmatmul.mubr.f32.gmra.mrb[146].mxu1 %v5701_v2  ;;  %v7112_v54 = vld [vmem:[#allocation28_spill] sm:$0xff] }
 0x1a7   : > { %v5771_v13 = vpop.f32.mrb[26].mxu0  ;;  %2447 = vmatprep.mubr.f32.mxu1 %v2225_v41  ;;  %v508_v12 = vsel %vm484_vm0, %v459_v26, %v460_v20  ;;  %v507_v41 = vsel %vm484_vm0, %v460_v20, %v461_v43  ;;  %v2223_v26 = vsel %vm387_vm1, %v2153_v1, %v2154_v32  ;;  %v464_v20 = vrot.slane %v5225_v63, 2 }
 0x1a8   : > { %7085 = vst [vmem:[#allocation56_spill] sm:$0xff] %v5771_v13  ;;  %v956_v40 = vpop.f32.mrb[27].mxu0  ;;  %3732 = vmatmul.mubr.f32.gmra.mrb[132].mxu0 %v510_v48  ;;  %v465_v1 = vrot.slane %v5236_v38, 2  ;;  %v2156_v63 = vrot.slane %v5799_v52, 1 }
 0x1a9   : > { %v5776_v23 = vpop.f32.mrb[42].mxu1  ;;  %3734 = vmatprep.mubr.f32.mxu0 %v509_v36 }
 0x1aa   : > { %7086 = vst [vmem:[#allocation57_spill] sm:$0xff] %v5776_v23  ;;  %v1526_v13 = vpop.f32.mrb[43].mxu1  ;;  %2448 = vmatmul.mubr.f32.gmra.mrb[148].mxu1 %v5714_v8 }
 0x1ab   : > { %v5788_v48 = vpop.f32.mrb[28].mxu0  ;;  %2452 = vmatprep.mubr.f32.mxu1 %v2224_v56  ;;  %v506_v13 = vsel %vm484_vm0, %v461_v43, %v462_v49  ;;  %v505_v56 = vsel %vm484_vm0, %v462_v49, %v463_v28  ;;  %v2222_v43 = vsel %vm387_vm1, %v2154_v32, %v2155_v0  ;;  %v466_v49 = vrot.slane %v5247_v39, 2 }
 0x1ac   : > { %7087 = vst [vmem:[#allocation58_spill] sm:$0xff] %v5788_v48  ;;  %v961_v36 = vpop.f32.mrb[29].mxu0  ;;  %3735 = vmatmul.mubr.f32.gmra.mrb[134].mxu0 %v508_v12  ;;  %v467_v32 = vrot.slane %v5258_v42, 2  ;;  %v2221_v39 = vsel %vm387_vm1, %v2155_v0, %v2156_v63  ;;  %v468_v42 = vrot.slane %v5269_v60, 2  ;;  %v469_v0 = vrot.slane %v5280_v27, 2 }
 0x1ad   : > { %v5793_v40 = vpop.f32.mrb[44].mxu1  ;;  %3737 = vmatprep.mubr.f32.mxu0 %v507_v41  ;;  %v470_v27 = vrot.slane %v5291_v5, 2 }
 0x1ae   : > { %7088 = vst [vmem:[#allocation59_spill] sm:$0xff] %v5793_v40  ;;  %v1531_v48 = vpop.f32.mrb[45].mxu1  ;;  %2453 = vmatmul.mubr.f32.gmra.mrb[150].mxu1 %v5729_v6  ;;  %v7108_v40 = vld [vmem:[#allocation22_spill] sm:$0xff] }
 0x1af   : > { %v5805_v12 = vpop.f32.mrb[30].mxu0  ;;  %2457 = vmatprep.mubr.f32.mxu1 %v2223_v26  ;;  %v504_v48 = vsel %vm484_vm0, %v463_v28, %v464_v20  ;;  %v503_v26 = vsel %vm484_vm0, %v464_v20, %v465_v1  ;;  %v2157_v28 = vrot.slane %v5816_v30, 1  ;;  %v502_v20 = vsel %vm484_vm0, %v465_v1, %v466_v49 }
 0x1b0   : > { %7089 = vst [vmem:[#allocation60_spill] sm:$0xff] %v5805_v12  ;;  %v966_v41 = vpop.f32.mrb[31].mxu0  ;;  %3738 = vmatmul.mubr.f32.gmra.mrb[136].mxu0 %v506_v13  ;;  %v5834_v12 = vld [vmem:[%s4559_s21 + $0xb8] sm:$0xff] }
 0x1b1   : > { %v5810_v36 = vpop.f32.mrb[46].mxu1  ;;  %3740 = vmatprep.mubr.f32.mxu0 %v505_v56  ;;  %v2220_v60 = vsel %vm387_vm1, %v2156_v63, %v2157_v28  ;;  %v2158_v1 = vrot.slane %v5834_v12, 1  ;;  %v471_v63 = vrot.slane %v5302_v37, 2  ;;  %v472_v37 = vrot.slane %v5313_v24, 2 }
 0x1b2   : > { %7090 = vst [vmem:[#allocation61_spill] sm:$0xff] %v5810_v36  ;;  %v1536_v38 = vpop.f32.mrb[47].mxu1  ;;  %2458 = vmatmul.mubr.f32.gmra.mrb[152].mxu1 %v5748_v19  ;;  %v5942_v36 = vld [vmem:[%s4559_s21 + $0xe8] sm:$0xff] }
 0x1b3   : > { %v969_v13 = vpop.f32.mrb[32].mxu0  ;;  %2462 = vmatprep.mubr.f32.mxu1 %v2222_v43  ;;  %v501_v43 = vsel %vm484_vm0, %v466_v49, %v467_v32  ;;  %v500_v49 = vsel %vm484_vm0, %v467_v32, %v468_v42  ;;  %v2219_v5 = vsel %vm387_vm1, %v2157_v28, %v2158_v1  ;;  %v473_v28 = vrot.slane %v5324_v47, 2 }
 0x1b4   : > { %v5823_v56 = vadd.f32 %v5371_v7, %v969_v13  ;;  %v971_v41 = vpop.f32.mrb[33].mxu0  ;;  %3741 = vmatmul.mubr.f32.gmra.mrb[138].mxu0 %v504_v48 }
 0x1b5   : > { %v5828_v38 = vpop.f32.mrb[48].mxu1  ;;  %3743 = vmatprep.mubr.f32.mxu0 %v503_v26 }
 0x1b6   : > { %7091 = vst [vmem:[#allocation62_spill] sm:$0xff] %v5828_v38  ;;  %v1541_v7 = vpop.f32.mrb[49].mxu1  ;;  %2463 = vmatmul.mubr.f32.gmra.mrb[154].mxu1 %v5765_v59  ;;  %v7100_v38 = vld [vmem:[#allocation13_spill] sm:$0xff] }
 0x1b7   : > { %v974_v48 = vpop.f32.mrb[34].mxu0  ;;  %2467 = vmatprep.mubr.f32.mxu1 %v2221_v39  ;;  %v5852_v7 = vld [vmem:[%s4559_s21 + $0xc0] sm:$0xff]  ;;  %v499_v39 = vsel %vm484_vm0, %v468_v42, %v469_v0  ;;  %v498_v42 = vsel %vm484_vm0, %v469_v0, %v470_v27 }
 0x1b8   : > { %v5841_v26 = vadd.f32 %v5366_v9, %v974_v48  ;;  %v976_v13 = vpop.f32.mrb[35].mxu0  ;;  %3744 = vmatmul.mubr.f32.gmra.mrb[140].mxu0 %v502_v20  ;;  %v2159_v32 = vrot.slane %v5852_v7, 1 }
 0x1b9   : > { %v5846_v41 = vpop.f32.mrb[50].mxu1  ;;  %3746 = vmatprep.mubr.f32.mxu0 %v501_v43 }
 0x1ba   : > { %7092 = vst [vmem:[#allocation63_spill] sm:$0xff] %v5846_v41  ;;  %v1546_v9 = vpop.f32.mrb[51].mxu1  ;;  %2468 = vmatmul.mubr.f32.gmra.mrb[156].mxu1 %v5782_v57  ;;  %v2218_v24 = vsel %vm387_vm1, %v2158_v1, %v2159_v32  ;;  %v7097_v1 = vld [vmem:[#allocation12_spill] sm:$0xff] }
 0x1bb   : > { %v979_v20 = vpop.f32.mrb[36].mxu0  ;;  %2472 = vmatprep.mubr.f32.mxu1 %v2220_v60  ;;  %v5870_v9 = vld [vmem:[%s4559_s21 + $0xc8] sm:$0xff]  ;;  %v497_v60 = vsel %vm484_vm0, %v470_v27, %v471_v63  ;;  %v496_v27 = vsel %vm484_vm0, %v471_v63, %v472_v37  ;;  %v5906_v41 = vld [vmem:[%s4559_s21 + $0xd8] sm:$0xff] }
 0x1bc   : > { %v5859_v43 = vadd.f32 %v5390_v62, %v979_v20  ;;  %v981_v48 = vpop.f32.mrb[37].mxu0  ;;  %3747 = vmatmul.mubr.f32.gmra.mrb[142].mxu0 %v500_v49  ;;  %v7094_v20 = vld [vmem:[#allocation15_spill] sm:$0xff]  ;;  %v2160_v0 = vrot.slane %v5870_v9, 1 }
 0x1bd   : > { %v5864_v13 = vpop.f32.mrb[52].mxu1  ;;  %3749 = vmatprep.mubr.f32.mxu0 %v499_v39 }
 0x1be   : > { %7093 = vst [vmem:[#allocation64_spill] sm:$0xff] %v5864_v13  ;;  %v1551_v62 = vpop.f32.mrb[53].mxu1  ;;  %2473 = vmatmul.mubr.f32.gmra.mrb[158].mxu1 %v5799_v52  ;;  %v7096_v13 = vld [vmem:[#allocation11_spill] sm:$0xff]  ;;  %v2217_v63 = vsel %vm387_vm1, %v2159_v32, %v2160_v0  ;;  %v7101_v32 = vld [vmem:[#allocation14_spill] sm:$0xff] }
 0x1bf   : > { %v984_v49 = vpop.f32.mrb[38].mxu0  ;;  %2477 = vmatprep.mubr.f32.mxu1 %v2219_v5  ;;  %v474_v47 = vrot.slane %v7096_v13, 2  ;;  %v2161_v13 = vrot.slane %v5888_v4, 1 }
 0x1c0   : > { %v5877_v39 = vadd.f32 %v7094_v20, %v984_v49  ;;  %v986_v48 = vpop.f32.mrb[39].mxu0  ;;  %3750 = vmatmul.mubr.f32.gmra.mrb[144].mxu0 %v498_v42  ;;  %v495_v42 = vsel %vm484_vm0, %v472_v37, %v473_v28  ;;  %v475_v49 = vrot.slane %v7097_v1, 2  ;;  %v476_v1 = vrot.slane %v7100_v38, 2 }
 0x1c1   : > { %v5882_v62 = vpop.f32.mrb[54].mxu1  ;;  %3752 = vmatprep.mubr.f32.mxu0 %v497_v60  ;;  %v7098_v48 = vld [vmem:[#allocation19_spill] sm:$0xff]  ;;  %v494_v37 = vsel %vm484_vm0, %v473_v28, %v474_v47  ;;  %v2216_v38 = vsel %vm387_vm1, %v2160_v0, %v2161_v13  ;;  %v2162_v28 = vrot.slane %v5906_v41, 1  ;;  %v7105_v0 = vld [vmem:[#allocation18_spill] sm:$0xff] }
 0x1c2   : > { %7095 = vst [vmem:[#allocation15_spill] sm:$0xff] %v5882_v62  ;;  %v1556_v5 = vpop.f32.mrb[55].mxu1  ;;  %2478 = vmatmul.mubr.f32.gmra.mrb[160].mxu1 %v5816_v30 }
 0x1c3   : > { %v989_v20 = vpop.f32.mrb[40].mxu0  ;;  %2482 = vmatprep.mubr.f32.mxu1 %v2218_v24 }
 0x1c4   : > { %v5895_v60 = vadd.f32 %v7098_v48, %v989_v20  ;;  %v991_v62 = vpop.f32.mrb[41].mxu0  ;;  %3753 = vmatmul.mubr.f32.gmra.mrb[146].mxu0 %v496_v27  ;;  %v477_v27 = vrot.slane %v7101_v32, 2  ;;  %v7102_v48 = vld [vmem:[#allocation17_spill] sm:$0xff]  ;;  %v478_v32 = vrot.slane %v7104_v45, 2  ;;  %v2215_v45 = vsel %vm387_vm1, %v2161_v13, %v2162_v28 }
 0x1c5   : > { %v5900_v5 = vpop.f32.mrb[56].mxu1  ;;  %3755 = vmatprep.mubr.f32.mxu0 %v495_v42  ;;  %v493_v62 = vsel %vm484_vm0, %v474_v47, %v475_v49  ;;  %v492_v47 = vsel %vm484_vm0, %v475_v49, %v476_v1  ;;  %v2163_v49 = vrot.slane %v5924_v16, 1  ;;  %v7109_v13 = vld [vmem:[#allocation25_spill] sm:$0xff] }
 0x1c6   : > { %7099 = vst [vmem:[#allocation11_spill] sm:$0xff] %v5900_v5  ;;  %v1561_v24 = vpop.f32.mrb[57].mxu1  ;;  %2483 = vmatmul.mubr.f32.gmra.mrb[162].mxu1 %v5834_v12 }
 0x1c7   : > { %v994_v20 = vpop.f32.mrb[42].mxu0  ;;  %2487 = vmatprep.mubr.f32.mxu1 %v2217_v63 }
 0x1c8   : > { %v5913_v42 = vadd.f32 %v7102_v48, %v994_v20  ;;  %v996_v5 = vpop.f32.mrb[43].mxu0  ;;  %3756 = vmatmul.mubr.f32.gmra.mrb[148].mxu0 %v494_v37  ;;  %v479_v37 = vrot.slane %v7105_v0, 2  ;;  %v7106_v48 = vld [vmem:[#allocation23_spill] sm:$0xff]  ;;  %v480_v0 = vrot.slane %v7108_v40, 2  ;;  %v2214_v40 = vsel %vm387_vm1, %v2162_v28, %v2163_v49 }
 0x1c9   : > { %v5918_v24 = vpop.f32.mrb[58].mxu1  ;;  %3758 = vmatprep.mubr.f32.mxu0 %v493_v62  ;;  %v491_v5 = vsel %vm484_vm0, %v476_v1, %v477_v27  ;;  %v490_v1 = vsel %vm484_vm0, %v477_v27, %v478_v32  ;;  %v2164_v27 = vrot.slane %v5942_v36, 1  ;;  %v483_v28 = vrot.slane %v5505_v61, 2 }
 0x1ca   : > { %7103 = vst [vmem:[#allocation12_spill] sm:$0xff] %v5918_v24  ;;  %v1566_v63 = vpop.f32.mrb[59].mxu1  ;;  %2488 = vmatmul.mubr.f32.gmra.mrb[164].mxu1 %v5852_v7 }
 0x1cb   : > { %v999_v20 = vpop.f32.mrb[44].mxu0  ;;  %2492 = vmatprep.mubr.f32.mxu1 %v2216_v38 }
 0x1cc   : > { %v5931_v62 = vadd.f32 %v7106_v48, %v999_v20  ;;  %v1001_v24 = vpop.f32.mrb[45].mxu0  ;;  %3759 = vmatmul.mubr.f32.gmra.mrb[150].mxu0 %v492_v47  ;;  %v481_v47 = vrot.slane %v7109_v13, 2  ;;  %v7110_v48 = vld [vmem:[#allocation20_spill] sm:$0xff]  ;;  %v482_v13 = vrot.slane %v7112_v54, 2  ;;  %v2213_v54 = vsel %vm387_vm1, %v2163_v49, %v2164_v27 }
 0x1cd   : > { %v5936_v63 = vpop.f32.mrb[60].mxu1  ;;  %3761 = vmatprep.mubr.f32.mxu0 %v491_v5  ;;  %v489_v24 = vsel %vm484_vm0, %v478_v32, %v479_v37  ;;  %v488_v32 = vsel %vm484_vm0, %v479_v37, %v480_v0 }
 0x1ce   : > { %7107 = vst [vmem:[#allocation19_spill] sm:$0xff] %v5936_v63  ;;  %v1571_v38 = vpop.f32.mrb[61].mxu1  ;;  %2493 = vmatmul.mubr.f32.gmra.mrb[166].mxu1 %v5870_v9  ;;  %v486_v23 = vsel %vm484_vm0, %v481_v47, %v482_v13 }
 0x1cf   : > { %v1004_v20 = vpop.f32.mrb[46].mxu0  ;;  %2497 = vmatprep.mubr.f32.mxu1 %v2215_v45  ;;  %v5960_v45 = vld [vmem:[%s4559_s21 + $0xf0] sm:$0xff] }
 0x1d0   : > { %v5949_v5 = vadd.f32 %v7110_v48, %v1004_v20  ;;  %v1006_v63 = vpop.f32.mrb[47].mxu0  ;;  %3762 = vmatmul.mubr.f32.gmra.mrb[152].mxu0 %v490_v1  ;;  %v7113_v48 = vld [vmem:[#allocation26_spill] sm:$0xff]  ;;  %v2165_v37 = vrot.slane %v5960_v45, 1 }
 0x1d1   : > { %v5954_v38 = vpop.f32.mrb[62].mxu1  ;;  %3764 = vmatprep.mubr.f32.mxu0 %v489_v24  ;;  %v487_v63 = vsel %vm484_vm0, %v480_v0, %v481_v47  ;;  %v5975_v0 = vld [vmem:[%s4559_s21 + $0xf8] sm:$0xff] }
 0x1d2   : > { %7111 = vst [vmem:[#allocation13_spill] sm:$0xff] %v5954_v38  ;;  %v1576_v20 = vpop.f32.mrb[63].mxu1  ;;  %2498 = vmatmul.mubr.f32.gmra.mrb[168].mxu1 %v5888_v4 }
 0x1d3   : > { %v1009_v1 = vpop.f32.mrb[48].mxu0  ;;  %2502 = vmatprep.mubr.f32.mxu1 %v2214_v40 }
 0x1d4   : > { %v5967_v24 = vadd.f32 %v7113_v48, %v1009_v1  ;;  %v1011_v38 = vpop.f32.mrb[49].mxu0  ;;  %3765 = vmatmul.mubr.f32.gmra.mrb[154].mxu0 %v488_v32  ;;  %v2238_v32 = vrot.slane %v5553_v3, 2  ;;  %v7115_v1 = vld [vmem:[#allocation24_spill] sm:$0xff]  ;;  %v2239_v3 = vrot.slane %v5587_v15, 2 }
 0x1d5   : > { %v1579_v20 = vpop.f32.mrb[64].mxu1  ;;  %3767 = vmatprep.mubr.f32.mxu0 %v487_v63  ;;  %v485_v38 = vsel %vm484_vm0, %v482_v13, %v483_v28 }
 0x1d6   : > { %v5978_v61 = vadd.f32 %v1579_v20, %v5823_v56  ;;  %v1581_v40 = vpop.f32.mrb[65].mxu1  ;;  %2503 = vmatmul.mubr.f32.gmra.mrb[170].mxu1 %v5906_v41  ;;  %v2212_v56 = vsel %vm387_vm1, %v2164_v27, %v2165_v37  ;;  %v2166_v20 = vrot.slane %v5975_v0, 1  ;;  %v7118_v27 = vrot.slane %v5550_v17, 2 }
 0x1d7   : > { %v1014_v63 = vpop.f32.mrb[50].mxu0  ;;  %2507 = vmatprep.mubr.f32.mxu1 %v2213_v54  ;;  %v5997_v54 = vld [vmem:[%s4559_s21 + $0x100] sm:$0xff] }
 0x1d8   : > { %7114 = vst [vmem:[#allocation14_spill] sm:$0xff] %v5978_v61  ;;  %v5986_v47 = vadd.f32 %v7115_v1, %v1014_v63  ;;  %v1016_v48 = vpop.f32.mrb[51].mxu0  ;;  %3768 = vmatmul.mubr.f32.gmra.mrb[156].mxu0 %v486_v23  ;;  %v7116_v61 = vld [vmem:[#allocation37_spill] sm:$0xff] }
 0x1d9   : > { %v1584_v40 = vpop.f32.mrb[66].mxu1  ;;  %3770 = vmatprep.mubr.f32.mxu0 %v485_v38  ;;  %v7117_v13 = vrot.slane %v7116_v61, 2  ;;  %v2331_v38 = vsel %vm484_vm0, %v7118_v27, %v2238_v32  ;;  %v2240_v61 = vrot.slane %v5609_v50, 2  ;;  %v2241_v27 = vrot.slane %v5627_v35, 2  ;;  %v6018_v50 = vld [vmem:[%s4559_s21 + $0x108] sm:$0xff] }
 0x1da   : > { %v6000_v63 = vadd.f32 %v1584_v40, %v5841_v26  ;;  %v1586_v23 = vpop.f32.mrb[67].mxu1  ;;  %2508 = vmatmul.mubr.f32.gmra.mrb[172].mxu1 %v5924_v16  ;;  %v2211_v26 = vsel %vm387_vm1, %v2165_v37, %v2166_v20  ;;  %v2167_v40 = vrot.slane %v5997_v54, 1 }
 0x1db   : > { %v532_v49 = vsel %vm484_vm0, %v483_v28, %v7117_v13  ;;  %v1019_v1 = vpop.f32.mrb[52].mxu0  ;;  %2512 = vmatprep.mubr.f32.mxu1 %v2212_v56  ;;  %v7119_v28 = vld [vmem:[#allocation29_spill] sm:$0xff]  ;;  %v2330_v23 = vsel %vm484_vm0, %v2238_v32, %v2239_v3  ;;  %v2329_v37 = vsel %vm484_vm0, %v2239_v3, %v2240_v61  ;;  %v2243_v3 = vrot.slane %v5656_v11, 2 }
 0x1dc   : > { %v6009_v15 = vadd.f32 %v7119_v28, %v1019_v1  ;;  %v1021_v48 = vpop.f32.mrb[53].mxu0  ;;  %3771 = vmatmul.mubr.f32.gmra.mrb[158].mxu0 %v532_v49  ;;  %v2242_v49 = vrot.slane %v5641_v44, 2  ;;  %v7120_v28 = vld [vmem:[#allocation27_spill] sm:$0xff] }
 0x1dd   : > { %v1589_v13 = vpop.f32.mrb[68].mxu1  ;;  %3805 = vmatprep.mubr.f32.mxu0 %v2331_v38  ;;  %v2168_v48 = vrot.slane %v6018_v50, 1  ;;  %v6037_v44 = vld [vmem:[%s4559_s21 + $0x110] sm:$0xff] }
 0x1de   : > { %v6021_v56 = vadd.f32 %v1589_v13, %v5859_v43  ;;  %v1591_v1 = vpop.f32.mrb[69].mxu1  ;;  %2513 = vmatmul.mubr.f32.gmra.mrb[174].mxu1 %v5942_v36  ;;  %v2210_v43 = vsel %vm387_vm1, %v2166_v20, %v2167_v40  ;;  %v2327_v20 = vsel %vm484_vm0, %v2241_v27, %v2242_v49 }
 0x1df   : > { %v1024_v38 = vpop.f32.mrb[54].mxu0  ;;  %2517 = vmatprep.mubr.f32.mxu1 %v2211_v26  ;;  %v2328_v1 = vsel %vm484_vm0, %v2240_v61, %v2241_v27  ;;  %v2245_v27 = vrot.slane %v5686_v10, 2 }
 0x1e0   : > { %v6028_v32 = vadd.f32 %v7120_v28, %v1024_v38  ;;  %v1026_v35 = vpop.f32.mrb[55].mxu0  ;;  %3806 = vmatmul.mubr.f32.vlgmr.msra.gmra.mrb[160].mxu0 %v2330_v23  ;;  %v2244_v23 = vrot.slane %v5671_v25, 2  ;;  %v7121_v28 = vld [vmem:[#allocation31_spill] sm:$0xff]  ;;  %v6056_v25 = vld [vmem:[%s4559_s21 + $0x118] sm:$0xff] }
 0x1e1   : > { %v1594_v13 = vpop.f32.mrb[70].mxu1  ;;  %3808 = vmatprep.mubr.f32.mxu0 %v2329_v37  ;;  %v2169_v35 = vrot.slane %v6037_v44, 1 }
 0x1e2   : > { %v6040_v26 = vadd.f32 %v1594_v13, %v5877_v39  ;;  %v1596_v38 = vpop.f32.mrb[71].mxu1  ;;  %2518 = vmatmul.mubr.f32.gmra.mrb[176].mxu1 %v5960_v45  ;;  %v2209_v39 = vsel %vm387_vm1, %v2167_v40, %v2168_v48  ;;  %v2325_v40 = vsel %vm484_vm0, %v2243_v3, %v2244_v23 }
 0x1e3   : > { %v1029_v37 = vpop.f32.mrb[56].mxu0  ;;  %2522 = vmatprep.mubr.f32.mxu1 %v2210_v43  ;;  %v2326_v38 = vsel %vm484_vm0, %v2242_v49, %v2243_v3  ;;  %v2247_v3 = vrot.slane %v5714_v8, 2 }
 0x1e4   : > { %v6047_v61 = vadd.f32 %v7121_v28, %v1029_v37  ;;  %v1031_v11 = vpop.f32.mrb[57].mxu0  ;;  %3809 = vmatmul.mubr.f32.gmra.mrb[162].mxu0 %v2328_v1  ;;  %v2246_v1 = vrot.slane %v5701_v2, 2  ;;  %v7122_v28 = vld [vmem:[#allocation30_spill] sm:$0xff]  ;;  %v6075_v2 = vld [vmem:[%s4559_s21 + $0x120] sm:$0xff] }
 0x1e5   : > { %v1599_v13 = vpop.f32.mrb[72].mxu1  ;;  %3811 = vmatprep.mubr.f32.mxu0 %v2327_v20  ;;  %v2170_v11 = vrot.slane %v6056_v25, 1 }
 0x1e6   : > { %v6059_v43 = vadd.f32 %v1599_v13, %v5895_v60  ;;  %v1601_v37 = vpop.f32.mrb[73].mxu1  ;;  %2523 = vmatmul.mubr.f32.gmra.mrb[178].mxu1 %v5975_v0  ;;  %v2208_v60 = vsel %vm387_vm1, %v2168_v48, %v2169_v35  ;;  %v2323_v48 = vsel %vm484_vm0, %v2245_v27, %v2246_v1 }
 0x1e7   : > { %v1034_v20 = vpop.f32.mrb[58].mxu0  ;;  %2527 = vmatprep.mubr.f32.mxu1 %v2209_v39  ;;  %v2324_v37 = vsel %vm484_vm0, %v2244_v23, %v2245_v27  ;;  %v2249_v27 = vrot.slane %v5748_v19, 2 }
 0x1e8   : > { %v6066_v49 = vadd.f32 %v7122_v28, %v1034_v20  ;;  %v1036_v10 = vpop.f32.mrb[59].mxu0  ;;  %3812 = vmatmul.mubr.f32.gmra.mrb[164].mxu0 %v2326_v38  ;;  %v2248_v38 = vrot.slane %v5729_v6, 2  ;;  %v7123_v28 = vld [vmem:[#allocation33_spill] sm:$0xff]  ;;  %v6094_v6 = vld [vmem:[%s4559_s21 + $0x128] sm:$0xff] }
 0x1e9   : > { %v1604_v13 = vpop.f32.mrb[74].mxu1  ;;  %3814 = vmatprep.mubr.f32.mxu0 %v2325_v40  ;;  %v2171_v10 = vrot.slane %v6075_v2, 1 }
 0x1ea   : > { %v6078_v39 = vadd.f32 %v1604_v13, %v5913_v42  ;;  %v1606_v20 = vpop.f32.mrb[75].mxu1  ;;  %2528 = vmatmul.mubr.f32.gmra.mrb[180].mxu1 %v5997_v54  ;;  %v2207_v42 = vsel %vm387_vm1, %v2169_v35, %v2170_v11  ;;  %v2321_v35 = vsel %vm484_vm0, %v2247_v3, %v2248_v38 }
 0x1eb   : > { %v1039_v40 = vpop.f32.mrb[60].mxu0  ;;  %2532 = vmatprep.mubr.f32.mxu1 %v2208_v60  ;;  %v2322_v20 = vsel %vm484_vm0, %v2246_v1, %v2247_v3  ;;  %v2251_v3 = vrot.slane %v5782_v57, 2 }
 0x1ec   : > { %v6085_v23 = vadd.f32 %v7123_v28, %v1039_v40  ;;  %v1041_v8 = vpop.f32.mrb[61].mxu0  ;;  %3815 = vmatmul.mubr.f32.gmra.mrb[166].mxu0 %v2324_v37  ;;  %v2250_v37 = vrot.slane %v5765_v59, 2  ;;  %v7124_v28 = vld [vmem:[#allocation32_spill] sm:$0xff]  ;;  %v6113_v59 = vld [vmem:[%s4559_s21 + $0x130] sm:$0xff] }
 0x1ed   : > { %v1609_v13 = vpop.f32.mrb[76].mxu1  ;;  %3817 = vmatprep.mubr.f32.mxu0 %v2323_v48  ;;  %v2172_v8 = vrot.slane %v6094_v6, 1 }
 0x1ee   : > { %v6097_v60 = vadd.f32 %v1609_v13, %v5931_v62  ;;  %v1611_v40 = vpop.f32.mrb[77].mxu1  ;;  %2533 = vmatmul.mubr.f32.gmra.mrb[182].mxu1 %v6018_v50  ;;  %v2206_v62 = vsel %vm387_vm1, %v2170_v11, %v2171_v10  ;;  %v2319_v11 = vsel %vm484_vm0, %v2249_v27, %v2250_v37 }
 0x1ef   : > { %v1044_v48 = vpop.f32.mrb[62].mxu0  ;;  %2537 = vmatprep.mubr.f32.mxu1 %v2207_v42  ;;  %v2320_v40 = vsel %vm484_vm0, %v2248_v38, %v2249_v27  ;;  %v2253_v27 = vrot.slane %v5816_v30, 2 }
 0x1f0   : > { %v6104_v1 = vadd.f32 %v7124_v28, %v1044_v48  ;;  %v1046_v19 = vpop.f32.mrb[63].mxu0  ;;  %3818 = vmatmul.mubr.f32.gmra.mrb[168].mxu0 %v2322_v20  ;;  %v2252_v20 = vrot.slane %v5799_v52, 2  ;;  %v7125_v28 = vld [vmem:[#allocation36_spill] sm:$0xff] }
 0x1f1   : > { %v1614_v13 = vpop.f32.mrb[78].mxu1  ;;  %3820 = vmatprep.mubr.f32.mxu0 %v2321_v35  ;;  %v2173_v19 = vrot.slane %v6113_v59, 1  ;;  %v6132_v52 = vld [vmem:[%s4559_s21 + $0x138] sm:$0xff] }
 0x1f2   : > { %v6116_v42 = vadd.f32 %v1614_v13, %v5949_v5  ;;  %v1616_v48 = vpop.f32.mrb[79].mxu1  ;;  %2538 = vmatmul.mubr.f32.gmra.mrb[184].mxu1 %v6037_v44  ;;  %v2205_v5 = vsel %vm387_vm1, %v2171_v10, %v2172_v8  ;;  %v2317_v10 = vsel %vm484_vm0, %v2251_v3, %v2252_v20 }
 0x1f3   : > { %v1049_v35 = vpop.f32.mrb[64].mxu0  ;;  %2542 = vmatprep.mubr.f32.mxu1 %v2206_v62  ;;  %v2318_v48 = vsel %vm484_vm0, %v2250_v37, %v2251_v3  ;;  %v2255_v3 = vrot.slane %v5852_v7, 2 }
 0x1f4   : > { %v6123_v38 = vadd.f32 %v7125_v28, %v1049_v35  ;;  %v1051_v57 = vpop.f32.mrb[65].mxu0  ;;  %3821 = vmatmul.mubr.f32.gmra.mrb[170].mxu0 %v2320_v40  ;;  %v2254_v40 = vrot.slane %v5834_v12, 2  ;;  %v7126_v28 = vld [vmem:[#allocation35_spill] sm:$0xff] }
 0x1f5   : > { %v1619_v13 = vpop.f32.mrb[80].mxu1  ;;  %3823 = vmatprep.mubr.f32.mxu0 %v2319_v11  ;;  %v2174_v57 = vrot.slane %v6132_v52, 1  ;;  %v6151_v12 = vld [vmem:[%s4559_s21 + $0x140] sm:$0xff] }
 0x1f6   : > { %v6135_v62 = vadd.f32 %v1619_v13, %v5967_v24  ;;  %v1621_v35 = vpop.f32.mrb[81].mxu1  ;;  %2543 = vmatmul.mubr.f32.gmra.mrb[186].mxu1 %v6056_v25  ;;  %v2204_v24 = vsel %vm387_vm1, %v2172_v8, %v2173_v19  ;;  %v2315_v8 = vsel %vm484_vm0, %v2253_v27, %v2254_v40 }
 0x1f7   : > { %v1054_v11 = vpop.f32.mrb[66].mxu0  ;;  %2547 = vmatprep.mubr.f32.mxu1 %v2205_v5  ;;  %v2316_v35 = vsel %vm484_vm0, %v2252_v20, %v2253_v27  ;;  %v2257_v27 = vrot.slane %v5888_v4, 2 }
 0x1f8   : > { %v6142_v37 = vadd.f32 %v7126_v28, %v1054_v11  ;;  %v1056_v30 = vpop.f32.mrb[67].mxu0  ;;  %3824 = vmatmul.mubr.f32.gmra.mrb[172].mxu0 %v2318_v48  ;;  %v2256_v48 = vrot.slane %v5870_v9, 2  ;;  %v7127_v28 = vld [vmem:[#allocation39_spill] sm:$0xff]  ;;  %v6170_v9 = vld [vmem:[%s4559_s21 + $0x148] sm:$0xff] }
 0x1f9   : > { %v1624_v13 = vpop.f32.mrb[82].mxu1  ;;  %3826 = vmatprep.mubr.f32.mxu0 %v2317_v10  ;;  %v2175_v30 = vrot.slane %v6151_v12, 1 }
 0x1fa   : > { %v6154_v5 = vadd.f32 %v1624_v13, %v5986_v47  ;;  %v1626_v11 = vpop.f32.mrb[83].mxu1  ;;  %2548 = vmatmul.mubr.f32.gmra.mrb[188].mxu1 %v6075_v2  ;;  %v2203_v47 = vsel %vm387_vm1, %v2173_v19, %v2174_v57  ;;  %v2313_v19 = vsel %vm484_vm0, %v2255_v3, %v2256_v48 }
 0x1fb   : > { %v1059_v10 = vpop.f32.mrb[68].mxu0  ;;  %2552 = vmatprep.mubr.f32.mxu1 %v2204_v24  ;;  %v2314_v11 = vsel %vm484_vm0, %v2254_v40, %v2255_v3  ;;  %v2259_v3 = vrot.slane %v5924_v16, 2 }
 0x1fc   : > { %v6161_v20 = vadd.f32 %v7127_v28, %v1059_v10  ;;  %v1061_v7 = vpop.f32.mrb[69].mxu0  ;;  %3827 = vmatmul.mubr.f32.gmra.mrb[174].mxu0 %v2316_v35  ;;  %v2258_v35 = vrot.slane %v5906_v41, 2  ;;  %v7128_v28 = vld [vmem:[#allocation21_spill] sm:$0xff] }
 0x1fd   : > { %v1629_v13 = vpop.f32.mrb[84].mxu1  ;;  %3829 = vmatprep.mubr.f32.mxu0 %v2315_v8  ;;  %v2176_v7 = vrot.slane %v6170_v9, 1  ;;  %v6189_v41 = vld [vmem:[%s4559_s21 + $0x150] sm:$0xff] }
 0x1fe   : > { %v6173_v24 = vadd.f32 %v1629_v13, %v6009_v15  ;;  %v1631_v10 = vpop.f32.mrb[85].mxu1  ;;  %2553 = vmatmul.mubr.f32.gmra.mrb[190].mxu1 %v6094_v6  ;;  %v2202_v15 = vsel %vm387_vm1, %v2174_v57, %v2175_v30  ;;  %v2311_v57 = vsel %vm484_vm0, %v2257_v27, %v2258_v35 }
 0x1ff   : > { %v1064_v8 = vpop.f32.mrb[70].mxu0  ;;  %2557 = vmatprep.mubr.f32.mxu1 %v2203_v47  ;;  %v2312_v10 = vsel %vm484_vm0, %v2256_v48, %v2257_v27  ;;  %v2261_v27 = vrot.slane %v5960_v45, 2 }
 0x200   : > { %v6180_v40 = vadd.f32 %v7128_v28, %v1064_v8  ;;  %v1066_v4 = vpop.f32.mrb[71].mxu0  ;;  %3830 = vmatmul.mubr.f32.gmra.mrb[176].mxu0 %v2314_v11  ;;  %v2260_v11 = vrot.slane %v5942_v36, 2  ;;  %v2177_v28 = vrot.slane %v6189_v41, 1  ;;  %v6208_v36 = vld [vmem:[%s4559_s21 + $0x158] sm:$0xff] }
 0x201   : > { %v1634_v13 = vpop.f32.mrb[86].mxu1  ;;  %3832 = vmatprep.mubr.f32.mxu0 %v2313_v19 }
 0x202   : > { %v6192_v47 = vadd.f32 %v1634_v13, %v6028_v32  ;;  %v1636_v8 = vpop.f32.mrb[87].mxu1  ;;  %2558 = vmatmul.mubr.f32.gmra.mrb[192].mxu1 %v6113_v59  ;;  %v2201_v32 = vsel %vm387_vm1, %v2175_v30, %v2176_v7  ;;  %v2310_v13 = vsel %vm484_vm0, %v2258_v35, %v2259_v3  ;;  %v2309_v30 = vsel %vm484_vm0, %v2259_v3, %v2260_v11 }
 0x203   : > { %v1069_v19 = vpop.f32.mrb[72].mxu0  ;;  %2562 = vmatprep.mubr.f32.mxu1 %v2202_v15  ;;  %v2263_v3 = vrot.slane %v5997_v54, 2 }
 0x204   : > { %v6199_v48 = vadd.f32 %v5611_v53, %v1069_v19  ;;  %v1071_v16 = vpop.f32.mrb[73].mxu0  ;;  %3833 = vmatmul.mubr.f32.gmra.mrb[178].mxu0 %v2312_v10  ;;  %v2262_v10 = vrot.slane %v5975_v0, 2  ;;  %v6227_v0 = vld [vmem:[%s4559_s21 + $0x160] sm:$0xff] }
 0x205   : > { %v1639_v4 = vpop.f32.mrb[88].mxu1  ;;  %3835 = vmatprep.mubr.f32.mxu0 %v2311_v57  ;;  %v2178_v57 = vrot.slane %v6208_v36, 1  ;;  %v2308_v16 = vsel %vm484_vm0, %v2260_v11, %v2261_v27 }
 0x206   : > { %v6211_v15 = vadd.f32 %v1639_v4, %v6047_v61  ;;  %v1641_v53 = vpop.f32.mrb[89].mxu1  ;;  %2563 = vmatmul.mubr.f32.gmra.mrb[194].mxu1 %v6132_v52  ;;  %v2200_v61 = vsel %vm387_vm1, %v2176_v7, %v2177_v28  ;;  %v2307_v7 = vsel %vm484_vm0, %v2261_v27, %v2262_v10  ;;  %v2264_v4 = vrot.slane %v6018_v50, 2  ;;  %v6246_v50 = vld [vmem:[%s4559_s21 + $0x168] sm:$0xff] }
 0x207   : > { %v1074_v8 = vpop.f32.mrb[74].mxu0  ;;  %2567 = vmatprep.mubr.f32.mxu1 %v2201_v32  ;;  %v2179_v53 = vrot.slane %v6227_v0, 1  ;;  %v2265_v27 = vrot.slane %v6037_v44, 2 }
 0x208   : > { %v6218_v35 = vadd.f32 %v5604_v33, %v1074_v8  ;;  %v1076_v45 = vpop.f32.mrb[75].mxu0  ;;  %3836 = vmatmul.mubr.f32.gmra.mrb[180].mxu0 %v2310_v13  ;;  %v2306_v8 = vsel %vm484_vm0, %v2262_v10, %v2263_v3 }
 0x209   : > { %v1644_v19 = vpop.f32.mrb[90].mxu1  ;;  %3838 = vmatprep.mubr.f32.mxu0 %v2309_v30 }
 0x20a   : > { %v6230_v32 = vadd.f32 %v1644_v19, %v6066_v49  ;;  %v1646_v33 = vpop.f32.mrb[91].mxu1  ;;  %2568 = vmatmul.mubr.f32.gmra.mrb[196].mxu1 %v6151_v12  ;;  %v2199_v49 = vsel %vm387_vm1, %v2177_v28, %v2178_v57  ;;  %v2305_v28 = vsel %vm484_vm0, %v2263_v3, %v2264_v4  ;;  %v2267_v3 = vrot.slane %v6075_v2, 2 }
 0x20b   : > { %v1079_v13 = vpop.f32.mrb[76].mxu0  ;;  %2572 = vmatprep.mubr.f32.mxu1 %v2200_v61  ;;  %v2266_v61 = vrot.slane %v6056_v25, 2  ;;  %v6265_v25 = vld [vmem:[%s4559_s21 + $0x170] sm:$0xff] }
 0x20c   : > { %v6237_v11 = vadd.f32 %v5629_v46, %v1079_v13  ;;  %v1081_v54 = vpop.f32.mrb[77].mxu0  ;;  %3839 = vmatmul.mubr.f32.gmra.mrb[182].mxu0 %v2308_v16  ;;  %v2180_v16 = vrot.slane %v6246_v50, 1 }
 0x20d   : > { %v1649_v30 = vpop.f32.mrb[92].mxu1  ;;  %3841 = vmatprep.mubr.f32.mxu0 %v2307_v7  ;;  %v2304_v7 = vsel %vm484_vm0, %v2264_v4, %v2265_v27  ;;  %v2268_v54 = vrot.slane %v6094_v6, 2  ;;  %v6284_v6 = vld [vmem:[%s4559_s21 + $0x178] sm:$0xff] }
 0x20e   : > { %v6249_v45 = vadd.f32 %v1649_v30, %v6085_v23  ;;  %v1651_v46 = vpop.f32.mrb[93].mxu1  ;;  %2573 = vmatmul.mubr.f32.gmra.mrb[198].mxu1 %v6170_v9  ;;  %v2198_v23 = vsel %vm387_vm1, %v2178_v57, %v2179_v53  ;;  %v2303_v57 = vsel %vm484_vm0, %v2265_v27, %v2266_v61  ;;  %v2181_v30 = vrot.slane %v6265_v25, 1 }
 0x20f   : > { %v1084_v19 = vpop.f32.mrb[78].mxu0  ;;  %2577 = vmatprep.mubr.f32.mxu1 %v2199_v49  ;;  %v2302_v46 = vsel %vm484_vm0, %v2266_v61, %v2267_v3  ;;  %v2269_v27 = vrot.slane %v6113_v59, 2 }
 0x210   : > { %v6256_v10 = vadd.f32 %v5621_v14, %v1084_v19  ;;  %v1086_v44 = vpop.f32.mrb[79].mxu0  ;;  %3842 = vmatmul.mubr.f32.gmra.mrb[184].mxu0 %v2306_v8  ;;  %v2270_v19 = vrot.slane %v6132_v52, 2  ;;  %v6303_v52 = vld [vmem:[%s4559_s21 + $0x180] sm:$0xff] }
 0x211   : > { %v1654_v33 = vpop.f32.mrb[94].mxu1  ;;  %3844 = vmatprep.mubr.f32.mxu0 %v2305_v28 }
 0x212   : > { %v6268_v13 = vadd.f32 %v1654_v33, %v6104_v1  ;;  %v1656_v14 = vpop.f32.mrb[95].mxu1  ;;  %2578 = vmatmul.mubr.f32.gmra.mrb[200].mxu1 %v6189_v41  ;;  %v2197_v1 = vsel %vm387_vm1, %v2179_v53, %v2180_v16  ;;  %v2301_v53 = vsel %vm484_vm0, %v2267_v3, %v2268_v54  ;;  %v2182_v33 = vrot.slane %v6284_v6, 1 }
 0x213   : > { %v1089_v49 = vpop.f32.mrb[80].mxu0  ;;  %2582 = vmatprep.mubr.f32.mxu1 %v2198_v23  ;;  %v7129_v23 = vld [vmem:[#allocation43_spill] sm:$0xff]  ;;  %v2300_v14 = vsel %vm484_vm0, %v2268_v54, %v2269_v27  ;;  %v2271_v3 = vrot.slane %v6151_v12, 2 }
 0x214   : > { %v6275_v4 = vadd.f32 %v5643_v34, %v1089_v49  ;;  %v1091_v2 = vpop.f32.mrb[81].mxu0  ;;  %3845 = vmatmul.mubr.f32.gmra.mrb[186].mxu0 %v2304_v7 }
 0x215   : > { %v1659_v8 = vpop.f32.mrb[96].mxu1  ;;  %3847 = vmatprep.mubr.f32.mxu0 %v2303_v57  ;;  %v2272_v2 = vrot.slane %v6170_v9, 2  ;;  %v6322_v9 = vld [vmem:[%s4559_s21 + $0x188] sm:$0xff] }
 0x216   : > { %v6287_v28 = vadd.f32 %v1659_v8, %v6123_v38  ;;  %v1661_v34 = vpop.f32.mrb[97].mxu1  ;;  %2583 = vmatmul.mubr.f32.gmra.mrb[202].mxu1 %v6208_v36  ;;  %v2196_v38 = vsel %vm387_vm1, %v2180_v16, %v2181_v30  ;;  %v2299_v16 = vsel %vm484_vm0, %v2269_v27, %v2270_v19  ;;  %v2183_v8 = vrot.slane %v6303_v52, 1 }
 0x217   : > { %v1094_v44 = vpop.f32.mrb[82].mxu0  ;;  %2587 = vmatprep.mubr.f32.mxu1 %v2197_v1  ;;  %v2298_v34 = vsel %vm484_vm0, %v2270_v19, %v2271_v3  ;;  %v2273_v27 = vrot.slane %v6189_v41, 2 }
 0x218   : > { %v6294_v61 = vadd.f32 %v7129_v23, %v1094_v44  ;;  %v1096_v59 = vpop.f32.mrb[83].mxu0  ;;  %3848 = vmatmul.mubr.f32.gmra.mrb[188].mxu0 %v2302_v46  ;;  %v2274_v44 = vrot.slane %v6208_v36, 2  ;;  %v6341_v36 = vld [vmem:[%s4559_s21 + $0x190] sm:$0xff] }
 0x219   : > { %v1664_v7 = vpop.f32.mrb[98].mxu1  ;;  %3850 = vmatprep.mubr.f32.mxu0 %v2301_v53  ;;  %v7130_v59 = vld [vmem:[#allocation45_spill] sm:$0xff] }
 0x21a   : > { %v6306_v57 = vadd.f32 %v1664_v7, %v6142_v37  ;;  %v1666_v49 = vpop.f32.mrb[99].mxu1  ;;  %2588 = vmatmul.mubr.f32.gmra.mrb[204].mxu1 %v6227_v0  ;;  %v2195_v37 = vsel %vm387_vm1, %v2181_v30, %v2182_v33  ;;  %v2297_v30 = vsel %vm484_vm0, %v2271_v3, %v2272_v2  ;;  %v2275_v3 = vrot.slane %v6227_v0, 2 }
 0x21b   : > { %v1099_v1 = vpop.f32.mrb[84].mxu0  ;;  %2592 = vmatprep.mubr.f32.mxu1 %v2196_v38  ;;  %v2184_v38 = vrot.slane %v6322_v9, 1 }
 0x21c   : > { %v6313_v54 = vadd.f32 %v5658_v51, %v1099_v1  ;;  %v1101_v12 = vpop.f32.mrb[85].mxu0  ;;  %3851 = vmatmul.mubr.f32.gmra.mrb[190].mxu0 %v2300_v14  ;;  %v2296_v14 = vsel %vm484_vm0, %v2272_v2, %v2273_v27  ;;  %v2276_v1 = vrot.slane %v6246_v50, 2 }
 0x21d   : > { %v1669_v46 = vpop.f32.mrb[100].mxu1  ;;  %3853 = vmatprep.mubr.f32.mxu0 %v2299_v16 }
 0x21e   : > { %v6325_v53 = vadd.f32 %v1669_v46, %v6161_v20  ;;  %v1671_v51 = vpop.f32.mrb[101].mxu1  ;;  %2593 = vmatmul.mubr.f32.gmra.mrb[206].mxu1 %v6246_v50  ;;  %v2194_v20 = vsel %vm387_vm1, %v2182_v33, %v2183_v8  ;;  %v2295_v33 = vsel %vm484_vm0, %v2273_v27, %v2274_v44  ;;  %v2277_v27 = vrot.slane %v6265_v25, 2  ;;  %v6360_v50 = vld [vmem:[%s4559_s21 + $0x198] sm:$0xff] }
 0x21f   : > { %v1104_v23 = vpop.f32.mrb[86].mxu0  ;;  %2597 = vmatprep.mubr.f32.mxu1 %v2195_v37  ;;  %v2185_v37 = vrot.slane %v6341_v36, 1 }
 0x220   : > { %v6332_v19 = vadd.f32 %v7130_v59, %v1104_v23  ;;  %v1106_v41 = vpop.f32.mrb[87].mxu0  ;;  %3854 = vmatmul.mubr.f32.gmra.mrb[192].mxu0 %v2298_v34  ;;  %v2294_v34 = vsel %vm484_vm0, %v2274_v44, %v2275_v3  ;;  %v7131_v59 = vld [vmem:[#allocation47_spill] sm:$0xff] }
 0x221   : > { %v1674_v7 = vpop.f32.mrb[102].mxu1  ;;  %3856 = vmatprep.mubr.f32.mxu0 %v2297_v30  ;;  %v2278_v30 = vrot.slane %v6284_v6, 2  ;;  %v2186_v41 = vrot.slane %v6360_v50, 1 }
 0x222   : > { %v6344_v49 = vadd.f32 %v1674_v7, %v6180_v40  ;;  %v1676_v16 = vpop.f32.mrb[103].mxu1  ;;  %2598 = vmatmul.mubr.f32.gmra.mrb[208].mxu1 %v6265_v25  ;;  %v2193_v40 = vsel %vm387_vm1, %v2183_v8, %v2184_v38  ;;  %v2293_v8 = vsel %vm484_vm0, %v2275_v3, %v2276_v1  ;;  %v2292_v7 = vsel %vm484_vm0, %v2276_v1, %v2277_v27 }
 0x223   : > { %v1109_v12 = vpop.f32.mrb[88].mxu0  ;;  %2602 = vmatprep.mubr.f32.mxu1 %v2194_v20 }
 0x224   : > { %v6351_v2 = vadd.f32 %v5673_v18, %v1109_v12  ;;  %v1111_v0 = vpop.f32.mrb[89].mxu0  ;;  %3857 = vmatmul.mubr.f32.gmra.mrb[194].mxu0 %v2296_v14  ;;  %v2279_v14 = vrot.slane %v6303_v52, 2 }
 0x225   : > { %v1679_v46 = vpop.f32.mrb[104].mxu1  ;;  %3859 = vmatprep.mubr.f32.mxu0 %v2295_v33  ;;  %v2280_v33 = vrot.slane %v6322_v9, 2 }
 0x226   : > { %v6363_v51 = vadd.f32 %v1679_v46, %v6199_v48  ;;  %v1681_v18 = vpop.f32.mrb[105].mxu1  ;;  %2603 = vmatmul.mubr.f32.gmra.mrb[210].mxu1 %v6284_v6  ;;  %v2192_v48 = vsel %vm387_vm1, %v2184_v38, %v2185_v37  ;;  %v6379_v6 = vld [vmem:[%s4559_s21 + $0x1a0] sm:$0xff]  ;;  %v2291_v38 = vsel %vm484_vm0, %v2277_v27, %v2278_v30  ;;  %v3368_v27 = vld [vmem:[%s4559_s21 + $0x1a8] sm:$0xff] }
 0x227   : > { %v1114_v23 = vpop.f32.mrb[90].mxu0  ;;  %2607 = vmatprep.mubr.f32.mxu1 %v2193_v40  ;;  %v2187_v40 = vrot.slane %v6379_v6, 1 }
 0x228   : > { %v6370_v44 = vadd.f32 %v7131_v59, %v1114_v23  ;;  %v1116_v25 = vpop.f32.mrb[91].mxu0  ;;  %3860 = vmatmul.mubr.f32.gmra.mrb[196].mxu0 %v2294_v34  ;;  %v2281_v34 = vrot.slane %v6341_v36, 2  ;;  %v7132_v59 = vld [vmem:[#allocation49_spill] sm:$0xff] }
 0x229   : > { %v1684_v20 = vpop.f32.mrb[106].mxu1  ;;  %3862 = vmatprep.mubr.f32.mxu0 %v2293_v8  ;;  %v2289_v8 = vsel %vm484_vm0, %v2279_v14, %v2280_v33 }
 0x22a   : > { %v6382_v3 = vadd.f32 %v1684_v20, %v6218_v35  ;;  %v1686_v16 = vpop.f32.mrb[107].mxu1  ;;  %2608 = vmatmul.mubr.f32.gmra.mrb[212].mxu1 %v6303_v52  ;;  %v2191_v35 = vsel %vm387_vm1, %v2185_v37, %v2186_v41  ;;  %v2290_v52 = vsel %vm484_vm0, %v2278_v30, %v2279_v14  ;;  %v2282_v37 = vrot.slane %v6360_v50, 2 }
 0x22b   : > { %v1119_v12 = vpop.f32.mrb[92].mxu0  ;;  %2612 = vmatprep.mubr.f32.mxu1 %v2192_v48  ;;  %v2190_v48 = vsel %vm387_vm1, %v2186_v41, %v2187_v40  ;;  %v7133_v41 = vld [vmem:[#allocation38_spill] sm:$0xff] }
 0x22c   : > { %v6389_v1 = vadd.f32 %v5688_v29, %v1119_v12  ;;  %v1121_v0 = vpop.f32.mrb[93].mxu0  ;;  %3863 = vmatmul.mubr.f32.gmra.mrb[198].mxu0 %v2292_v7  ;;  %v2283_v7 = vrot.slane %v6379_v6, 2  ;;  %v2284_v12 = vrot.slane %v3368_v27, 2 }
 0x22d   : > { %v1689_v46 = vpop.f32.mrb[108].mxu1  ;;  %3865 = vmatprep.mubr.f32.mxu0 %v2291_v38  ;;  %v2287_v38 = vsel %vm484_vm0, %v2281_v34, %v2282_v37 }
 0x22e   : > { %v6399_v18 = vadd.f32 %v1689_v46, %v6237_v11  ;;  %v1691_v29 = vpop.f32.mrb[109].mxu1  ;;  %2613 = vmatmul.mubr.f32.gmra.mrb[214].mxu1 %v6322_v9  ;;  %v2188_v11 = vrot.slane %v3368_v27, 1  ;;  %v2288_v9 = vsel %vm484_vm0, %v2280_v33, %v2281_v34 }
 0x22f   : > { %v1124_v23 = vpop.f32.mrb[94].mxu0  ;;  %2617 = vmatprep.mubr.f32.mxu1 %v2191_v35 }
 0x230   : > { %v6406_v25 = vadd.f32 %v7132_v59, %v1124_v23  ;;  %v1126_v30 = vpop.f32.mrb[95].mxu0  ;;  %3866 = vmatmul.mubr.f32.gmra.mrb[200].mxu0 %v2290_v52  ;;  %v2189_v33 = vsel %vm387_vm1, %v2187_v40, %v2188_v11  ;;  %v7134_v52 = vld [vmem:[#allocation34_spill] sm:$0xff]  ;;  %v2285_v23 = vsel %vm484_vm0, %v2283_v7, %v2284_v12 }
 0x231   : > { %v1694_v20 = vpop.f32.mrb[110].mxu1  ;;  %3868 = vmatprep.mubr.f32.mxu0 %v2289_v8 }
 0x232   : > { %v6414_v14 = vadd.f32 %v1694_v20, %v6256_v10  ;;  %v1696_v16 = vpop.f32.mrb[111].mxu1  ;;  %2618 = vmatmul.mubr.f32.gmra.mrb[216].mxu1 %v6341_v36  ;;  %v2286_v36 = vsel %vm484_vm0, %v2282_v37, %v2283_v7 }
 0x233   : > { %v3599_v0 = vpop.f32.mrb[96].mxu0  ;;  %2622 = vmatprep.mubr.f32.mxu1 %v2190_v48  ;;  %v7135_v48 = vld [vmem:[#allocation41_spill] sm:$0xff] }
 0x234   : > { %v1200_v35 = vadd.f32 %v3599_v0, %v7133_v41  ;;  %v1194_v46 = vpop.f32.mrb[97].mxu0  ;;  %3869 = vmatmul.mubr.f32.gmra.mrb[202].mxu0 %v2288_v9  ;;  %v7137_v9 = vld [vmem:[#allocation40_spill] sm:$0xff] }
 0x235   : > { %v1195_v29 = vadd.f32 %v1194_v46, %v7134_v52  ;;  %v1699_v10 = vpop.f32.mrb[112].mxu1  ;;  %3871 = vmatprep.mubr.f32.mxu0 %v2287_v38  ;;  %v7139_v46 = vld [vmem:[#allocation44_spill] sm:$0xff] }
 0x236   : > { %v6426_v8 = vadd.f32 %v1699_v10, %v6275_v4  ;;  %v1701_v34 = vpop.f32.mrb[113].mxu1  ;;  %2623 = vmatmul.mubr.f32.gmra.mrb[218].mxu1 %v6360_v50  ;;  %v6432_v59 = vadd.f32 %v5710_v55, %v1200_v35  ;;  %v7136_v4 = vrot.slane %v5550_v17, 1  ;;  %v7138_v55 = vrot.slane %v5550_v17, 2 }
 0x237   : > { %v3602_v40 = vpop.f32.mrb[98].mxu0  ;;  %2627 = vmatprep.mubr.f32.mxu1 %v2189_v33  ;;  %v6435_v30 = vadd.f32 %v5697_v31, %v1195_v29 }
 0x238   : > { %v1210_v20 = vadd.f32 %v3602_v40, %v7135_v48  ;;  %v1204_v37 = vpop.f32.mrb[99].mxu0  ;;  %3872 = vmatmul.mubr.f32.gmra.mrb[204].mxu0 %v2286_v36  ;;  %v2236_v50 = vsel %vm387_vm1, %v2188_v11, %v7136_v4  ;;  %v2332_v38 = vsel %vm484_vm0, %v2284_v12, %v7138_v55  ;;  %v7142_v36 = vld [vmem:[#allocation55_spill] sm:$0xff]  ;;  %v7144_v48 = vld [vmem:[#allocation46_spill] sm:$0xff] }
 0x239   : > { %v1205_v16 = vadd.f32 %v1204_v37, %v7137_v9  ;;  %v1704_v7 = vpop.f32.mrb[114].mxu1  ;;  %3874 = vmatprep.mubr.f32.mxu0 %v2285_v23  ;;  %v7143_v23 = vld [vmem:[#allocation48_spill] sm:$0xff]  ;;  %v7145_v9 = vld [vmem:[#allocation61_spill] sm:$0xff]  ;;  %v7147_v55 = vld [vmem:[#allocation51_spill] sm:$0xff] }
 0x23a   : > { %v6448_v31 = vadd.f32 %v1704_v7, %v6294_v61  ;;  %v1706_v0 = vpop.f32.mrb[115].mxu1  ;;  %2628 = vmatmul.mubr.f32.gmra.mrb[220].mxu1 %v6379_v6  ;;  %v6452_v41 = vadd.f32 %v5742_v58, %v1210_v20  ;;  %v7141_v6 = vld [vmem:[#allocation57_spill] sm:$0xff]  ;;  %v7146_v7 = vld [vmem:[#allocation59_spill] sm:$0xff] }
 0x23b   : > { %v3605_v35 = vpop.f32.mrb[100].mxu0  ;;  %2632 = vmatprep.mubr.f32.mxu1 %v2236_v50  ;;  %v6455_v11 = vadd.f32 %v5724_v21, %v1205_v16 }
 0x23c   : > { %v1220_v33 = vadd.f32 %v3605_v35, %v7139_v46  ;;  %v1214_v17 = vpop.f32.mrb[101].mxu0  ;;  %3875 = vmatmul.mubr.f32.gmra.mrb[206].mxu0 %v2332_v38  ;;  %v7148_v35 = vld [vmem:[#allocation50_spill] sm:$0xff] }
 0x23d   : > { %v1215_v12 = vadd.f32 %v1214_v17, %v7140_v22  ;;  %v1709_v52 = vpop.f32.mrb[116].mxu1 }
 0x23e   : > { %v6460_v61 = vadd.f32 %v1709_v52, %v6313_v54  ;;  %v1711_v29 = vpop.f32.mrb[117].mxu1  ;;  %2633 = vmatmul.mubr.f32.gmra.mrb[222].mxu1 %v3368_v27  ;;  %v1525_v58 = vadd.f32 %v7141_v6, %v1220_v33 }
 0x23f   : > { %v3608_v10 = vpop.f32.mrb[102].mxu0  ;;  %v1520_v34 = vadd.f32 %v7142_v36, %v1215_v12  ;;  %v7149_v12 = vld [vmem:[#allocation63_spill] sm:$0xff]  ;;  %v7150_v29 = vld [vmem:[#allocation62_spill] sm:$0xff] }
 0x240   : > { %v1230_v21 = vadd.f32 %v3608_v10, %v7143_v23  ;;  %v1224_v40 = vpop.f32.mrb[103].mxu0  ;;  %v7151_v10 = vld [vmem:[#allocation53_spill] sm:$0xff] }
 0x241   : > { %v1225_v20 = vadd.f32 %v1224_v40, %v7144_v48  ;;  %v1714_v37 = vpop.f32.mrb[118].mxu1 }
 0x242   : > { %v6467_v4 = vadd.f32 %v1714_v37, %v6332_v19  ;;  %v1716_v50 = vpop.f32.mrb[119].mxu1  ;;  %v1535_v54 = vadd.f32 %v7145_v9, %v1230_v21  ;;  %v7152_v21 = vld [vmem:[#allocation52_spill] sm:$0xff] }
 0x243   : > { %v3611_v16 = vpop.f32.mrb[104].mxu0  ;;  %v1530_v27 = vadd.f32 %v7146_v7, %v1225_v20  ;;  %v7153_v50 = vld [vmem:[#allocation15_spill] sm:$0xff] }
 0x244   : > { %v1240_v38 = vadd.f32 %v3611_v16, %v7147_v55  ;;  %v1234_v0 = vpop.f32.mrb[105].mxu0  ;;  %v7154_v16 = vld [vmem:[#allocation64_spill] sm:$0xff] }
 0x245   : > { %v1235_v46 = vadd.f32 %v1234_v0, %v7148_v35  ;;  %v1719_v33 = vpop.f32.mrb[120].mxu1  ;;  %v7155_v55 = vld [vmem:[#allocation56_spill] sm:$0xff]  ;;  %v7156_v35 = vld [vmem:[#allocation54_spill] sm:$0xff] }
 0x246   : > { %v6474_v17 = vadd.f32 %v1719_v33, %v6351_v2  ;;  %v1721_v22 = vpop.f32.mrb[121].mxu1  ;;  %v1545_v52 = vadd.f32 %v7149_v12, %v1240_v38 }
 0x247   : > { %v3614_v19 = vpop.f32.mrb[106].mxu0  ;;  %v1540_v6 = vadd.f32 %v7150_v29, %v1235_v46 }
 0x248   : > { %v1250_v36 = vadd.f32 %v3614_v19, %v7151_v10  ;;  %v1244_v23 = vpop.f32.mrb[107].mxu0  ;;  %v7157_v19 = vld [vmem:[#allocation12_spill] sm:$0xff]  ;;  %v7158_v10 = vld [vmem:[#allocation11_spill] sm:$0xff] }
 0x249   : > { %v1245_v40 = vadd.f32 %v1244_v23, %v7152_v21  ;;  %v1724_v48 = vpop.f32.mrb[122].mxu1  ;;  %v7159_v21 = vld [vmem:[#allocation60_spill] sm:$0xff] }
 0x24a   : > { %v6481_v20 = vadd.f32 %v1724_v48, %v6370_v44  ;;  %v1726_v37 = vpop.f32.mrb[123].mxu1  ;;  %v1555_v9 = vadd.f32 %v7153_v50, %v1250_v36 }
 0x24b   : > { %v3617_v2 = vpop.f32.mrb[108].mxu0  ;;  %v1550_v7 = vadd.f32 %v7154_v16, %v1245_v40  ;;  %v7160_v37 = vld [vmem:[#allocation58_spill] sm:$0xff] }
 0x24c   : > { %v1260_v38 = vadd.f32 %v3617_v2, %v7155_v55  ;;  %v1254_v0 = vpop.f32.mrb[109].mxu0  ;;  %v7161_v55 = vld [vmem:[#allocation13_spill] sm:$0xff] }
 0x24d   : > { %v1255_v46 = vadd.f32 %v1254_v0, %v7156_v35  ;;  %v1729_v33 = vpop.f32.mrb[124].mxu1  ;;  %v7162_v35 = vld [vmem:[#allocation19_spill] sm:$0xff] }
 0x24e   : > { %v6488_v22 = vadd.f32 %v1729_v33, %v6389_v1  ;;  %v1731_v12 = vpop.f32.mrb[125].mxu1  ;;  %v1565_v29 = vadd.f32 %v7157_v19, %v1260_v38 }
 0x24f   : > { %v3620_v44 = vpop.f32.mrb[110].mxu0  ;;  %v1560_v23 = vadd.f32 %v7158_v10, %v1255_v46 }
 0x250   : > { %v1270_v36 = vadd.f32 %v3620_v44, %v7159_v21  ;;  %v1264_v48 = vpop.f32.mrb[111].mxu0 }
 0x251   : > { %v1265_v40 = vadd.f32 %v1264_v48, %v7160_v37  ;;  %v1734_v50 = vpop.f32.mrb[126].mxu1 }
 0x252   : > { %v6495_v2 = vadd.f32 %v1734_v50, %v6406_v25  ;;  %v1736_v16 = vpop.f32.mrb[127].mxu1  ;;  %v1575_v0 = vadd.f32 %v7161_v55, %v1270_v36 }
 0x253   : > { %v3703_v1 = vpop.f32.mrb[112].mxu0  ;;  %v1570_v33 = vadd.f32 %v7162_v35, %v1265_v40 }
 0x254   : > { %v6500_v38 = vadd.f32 %v3703_v1, %v6432_v59  ;;  %v1804_v12 = vpop.f32.mrb[113].mxu0 }
 0x255   : > { %v6503_v46 = vadd.f32 %v1804_v12, %v6435_v30  ;;  %v6505_v19 = vpop.f32.mrb[128].mxu1 }
 0x256   : > { %v2401_v44 = vpop.f32.mrb[129].mxu1 }
 0x257   : > { %v3706_v10 = vpop.f32.mrb[114].mxu0 }
 0x258   : > { %v6508_v25 = vadd.f32 %v3706_v10, %v6452_v41  ;;  %v1814_v21 = vpop.f32.mrb[115].mxu0 }
 0x259   : > { %v6511_v36 = vadd.f32 %v1814_v21, %v6455_v11  ;;  %v6513_v48 = vpop.f32.mrb[130].mxu1 }
 0x25a   : > { %v2406_v37 = vpop.f32.mrb[131].mxu1 }
 0x25b   : > { %v3709_v59 = vpop.f32.mrb[116].mxu0 }
 0x25c   : > { %v6515_v40 = vadd.f32 %v3709_v59, %v1525_v58  ;;  %v1824_v50 = vpop.f32.mrb[117].mxu0 }
 0x25d   : > { %v6517_v30 = vadd.f32 %v1824_v50, %v1520_v34  ;;  %v6519_v16 = vpop.f32.mrb[132].mxu1 }
 0x25e   : > { %v2411_v55 = vpop.f32.mrb[133].mxu1 }
 0x25f   : > { %v3712_v1 = vpop.f32.mrb[118].mxu0 }
 0x260   : > { %v6521_v35 = vadd.f32 %v3712_v1, %v1535_v54  ;;  %v1834_v41 = vpop.f32.mrb[119].mxu0 }
 0x261   : > { %v6523_v12 = vadd.f32 %v1834_v41, %v1530_v27  ;;  %v6525_v11 = vpop.f32.mrb[134].mxu1 }
 0x262   : > { %v2416_v44 = vpop.f32.mrb[135].mxu1 }
 0x263   : > { %7163 = vst [vmem:[#allocation17_spill] sm:$0xff] %v6523_v12  ;;  %v3715_v10 = vpop.f32.mrb[120].mxu0 }
 0x264   : > { %v6527_v21 = vadd.f32 %v3715_v10, %v1545_v52  ;;  %v1844_v58 = vpop.f32.mrb[121].mxu0 }
 0x265   : > { %v6529_v37 = vadd.f32 %v1844_v58, %v1540_v6  ;;  %v6531_v34 = vpop.f32.mrb[136].mxu1 }
 0x266   : > { %v2421_v59 = vpop.f32.mrb[137].mxu1 }
 0x267   : > { %7164 = vst [vmem:[#allocation16_spill] sm:$0xff] %v6529_v37  ;;  %v3718_v50 = vpop.f32.mrb[122].mxu0 }
 0x268   : > { %v6533_v55 = vadd.f32 %v3718_v50, %v1555_v9  ;;  %v1854_v54 = vpop.f32.mrb[123].mxu0 }
 0x269   : > { %v6535_v1 = vadd.f32 %v1854_v54, %v1550_v7  ;;  %v6537_v27 = vpop.f32.mrb[138].mxu1 }
 0x26a   : > { %v2426_v41 = vpop.f32.mrb[139].mxu1 }
 0x26b   : > { %7165 = vst [vmem:[#allocation18_spill] sm:$0xff] %v6535_v1  ;;  %v3721_v12 = vpop.f32.mrb[124].mxu0 }
 0x26c   : > { %v6539_v44 = vadd.f32 %v3721_v12, %v1565_v29  ;;  %v1864_v52 = vpop.f32.mrb[125].mxu0  ;;  %v7167_v12 = vld [vmem:[#allocation14_spill] sm:$0xff] }
 0x26d   : > { %v6541_v10 = vadd.f32 %v1864_v52, %v1560_v23  ;;  %v6543_v6 = vpop.f32.mrb[140].mxu1 }
 0x26e   : > { %v2431_v58 = vpop.f32.mrb[141].mxu1 }
 0x26f   : > { %7166 = vst [vmem:[#allocation23_spill] sm:$0xff] %v6541_v10  ;;  %v3724_v37 = vpop.f32.mrb[126].mxu0 }
 0x270   : > { %v6545_v59 = vadd.f32 %v3724_v37, %v1575_v0  ;;  %v1874_v9 = vpop.f32.mrb[127].mxu0 }
 0x271   : > { %v6547_v50 = vadd.f32 %v1874_v9, %v1570_v33  ;;  %v6549_v7 = vpop.f32.mrb[142].mxu1 }
 0x272   : > { %v2436_v54 = vpop.f32.mrb[143].mxu1 }
 0x273   : > { %v3727_v1 = vpop.f32.mrb[128].mxu0 }
 0x274   : > { %v6552_v41 = vadd.f32 %v3727_v1, %v6000_v63  ;;  %v1884_v29 = vpop.f32.mrb[129].mxu0 }
 0x275   : > { %v6555_v23 = vadd.f32 %v1884_v29, %v7167_v12  ;;  %v6557_v52 = vpop.f32.mrb[144].mxu1 }
 0x276   : > { %v2441_v58 = vpop.f32.mrb[145].mxu1 }
 0x277   : > { %7168 = vst [vmem:[#allocation22_spill] sm:$0xff] %v6555_v23  ;;  %v3730_v10 = vpop.f32.mrb[130].mxu0 }
 0x278   : > { %v6560_v0 = vadd.f32 %v3730_v10, %v6040_v26  ;;  %v1894_v33 = vpop.f32.mrb[131].mxu0 }
 0x279   : > { %v6563_v37 = vadd.f32 %v1894_v33, %v6021_v56  ;;  %v6565_v9 = vpop.f32.mrb[146].mxu1 }
 0x27a   : > { %v2446_v54 = vpop.f32.mrb[147].mxu1 }
 0x27b   : > { %7169 = vst [vmem:[#allocation25_spill] sm:$0xff] %v6563_v37  ;;  %v3733_v63 = vpop.f32.mrb[132].mxu0 }
 0x27c   : > { %v6568_v1 = vadd.f32 %v3733_v63, %v6078_v39  ;;  %v1904_v29 = vpop.f32.mrb[133].mxu0 }
 0x27d   : > { %v6571_v12 = vadd.f32 %v1904_v29, %v6059_v43  ;;  %v6573_v58 = vpop.f32.mrb[148].mxu1 }
 0x27e   : > { %v2451_v23 = vpop.f32.mrb[149].mxu1 }
 0x27f   : > { %7170 = vst [vmem:[#allocation20_spill] sm:$0xff] %v6571_v12  ;;  %v3736_v26 = vpop.f32.mrb[134].mxu0 }
 0x280   : > { %v6576_v10 = vadd.f32 %v3736_v26, %v6116_v42  ;;  %v1914_v56 = vpop.f32.mrb[135].mxu0 }
 0x281   : > { %v6579_v33 = vadd.f32 %v1914_v56, %v6097_v60  ;;  %v6581_v54 = vpop.f32.mrb[150].mxu1 }
 0x282   : > { %v2456_v37 = vpop.f32.mrb[151].mxu1 }
 0x283   : > { %7171 = vst [vmem:[#allocation28_spill] sm:$0xff] %v6579_v33  ;;  %v3739_v39 = vpop.f32.mrb[136].mxu0 }
 0x284   : > { %v6584_v63 = vadd.f32 %v3739_v39, %v6154_v5  ;;  %v1924_v43 = vpop.f32.mrb[137].mxu0 }
 0x285   : > { %v6587_v29 = vadd.f32 %v1924_v43, %v6135_v62  ;;  %v6589_v23 = vpop.f32.mrb[152].mxu1 }
 0x286   : > { %v2461_v12 = vpop.f32.mrb[153].mxu1 }
 0x287   : > { %7172 = vst [vmem:[#allocation26_spill] sm:$0xff] %v6587_v29  ;;  %v3742_v42 = vpop.f32.mrb[138].mxu0 }
 0x288   : > { %v6592_v26 = vadd.f32 %v3742_v42, %v6192_v47  ;;  %v1934_v60 = vpop.f32.mrb[139].mxu0 }
 0x289   : > { %v6595_v56 = vadd.f32 %v1934_v60, %v6173_v24  ;;  %v6597_v37 = vpop.f32.mrb[154].mxu1 }
 0x28a   : > { %v2466_v33 = vpop.f32.mrb[155].mxu1 }
 0x28b   : > { %7173 = vst [vmem:[#allocation24_spill] sm:$0xff] %v6595_v56  ;;  %v3745_v5 = vpop.f32.mrb[140].mxu0 }
 0x28c   : > { %v6600_v39 = vadd.f32 %v3745_v5, %v6230_v32  ;;  %v1944_v62 = vpop.f32.mrb[141].mxu0 }
 0x28d   : > { %v6603_v43 = vadd.f32 %v1944_v62, %v6211_v15  ;;  %v6605_v12 = vpop.f32.mrb[156].mxu1 }
 0x28e   : > { %v2471_v29 = vpop.f32.mrb[157].mxu1 }
 0x28f   : > { %7174 = vst [vmem:[#allocation37_spill] sm:$0xff] %v6603_v43  ;;  %v3748_v47 = vpop.f32.mrb[142].mxu0 }
 0x290   : > { %v6608_v42 = vadd.f32 %v3748_v47, %v6268_v13  ;;  %v1954_v24 = vpop.f32.mrb[143].mxu0 }
 0x291   : > { %v6611_v60 = vadd.f32 %v1954_v24, %v6249_v45  ;;  %v6613_v33 = vpop.f32.mrb[158].mxu1 }
 0x292   : > { %v2476_v56 = vpop.f32.mrb[159].mxu1 }
 0x293   : > { %7175 = vst [vmem:[#allocation29_spill] sm:$0xff] %v6611_v60  ;;  %v3751_v32 = vpop.f32.mrb[144].mxu0 }
 0x294   : > { %v6616_v5 = vadd.f32 %v3751_v32, %v6306_v57  ;;  %v1964_v15 = vpop.f32.mrb[145].mxu0 }
 0x295   : > { %v6619_v62 = vadd.f32 %v1964_v15, %v6287_v28  ;;  %v6621_v29 = vpop.f32.mrb[160].mxu1 }
 0x296   : > { %v2481_v43 = vpop.f32.mrb[161].mxu1 }
 0x297   : > { %7176 = vst [vmem:[#allocation27_spill] sm:$0xff] %v6619_v62  ;;  %v3754_v13 = vpop.f32.mrb[146].mxu0 }
 0x298   : > { %v6624_v47 = vadd.f32 %v3754_v13, %v6344_v49  ;;  %v1974_v45 = vpop.f32.mrb[147].mxu0 }
 0x299   : > { %v6627_v24 = vadd.f32 %v1974_v45, %v6325_v53  ;;  %v6629_v56 = vpop.f32.mrb[162].mxu1 }
 0x29a   : > { %v2486_v60 = vpop.f32.mrb[163].mxu1 }
 0x29b   : > { %7177 = vst [vmem:[#allocation31_spill] sm:$0xff] %v6627_v24  ;;  %v3757_v57 = vpop.f32.mrb[148].mxu0 }
 0x29c   : > { %v6632_v32 = vadd.f32 %v3757_v57, %v6382_v3  ;;  %v1984_v28 = vpop.f32.mrb[149].mxu0 }
 0x29d   : > { %v6635_v15 = vadd.f32 %v1984_v28, %v6363_v51  ;;  %v6637_v43 = vpop.f32.mrb[164].mxu1 }
 0x29e   : > { %v2491_v62 = vpop.f32.mrb[165].mxu1 }
 0x29f   : > { %7178 = vst [vmem:[#allocation30_spill] sm:$0xff] %v6635_v15  ;;  %v3760_v49 = vpop.f32.mrb[150].mxu0 }
 0x2a0   : > { %v6640_v13 = vadd.f32 %v3760_v49, %v6414_v14  ;;  %v1994_v53 = vpop.f32.mrb[151].mxu0 }
 0x2a1   : > { %v6643_v45 = vadd.f32 %v1994_v53, %v6399_v18  ;;  %v6645_v60 = vpop.f32.mrb[166].mxu1 }
 0x2a2   : > { %v2496_v24 = vpop.f32.mrb[167].mxu1 }
 0x2a3   : > { %7179 = vst [vmem:[#allocation33_spill] sm:$0xff] %v6643_v45  ;;  %v3763_v3 = vpop.f32.mrb[152].mxu0 }
 0x2a4   : > { %v6648_v57 = vadd.f32 %v3763_v3, %v6448_v31  ;;  %v2004_v51 = vpop.f32.mrb[153].mxu0 }
 0x2a5   : > { %v6651_v28 = vadd.f32 %v2004_v51, %v6426_v8  ;;  %v6653_v62 = vpop.f32.mrb[168].mxu1 }
 0x2a6   : > { %v2501_v15 = vpop.f32.mrb[169].mxu1 }
 0x2a7   : > { %7180 = vst [vmem:[#allocation32_spill] sm:$0xff] %v6651_v28  ;;  %v3766_v14 = vpop.f32.mrb[154].mxu0 }
 0x2a8   : > { %v6656_v49 = vadd.f32 %v3766_v14, %v6467_v4  ;;  %v2014_v18 = vpop.f32.mrb[155].mxu0 }
 0x2a9   : > { %v6659_v53 = vadd.f32 %v2014_v18, %v6460_v61  ;;  %v6661_v24 = vpop.f32.mrb[170].mxu1 }
 0x2aa   : > { %7181 = vst [vmem:[#allocation36_spill] sm:$0xff] %v6656_v49  ;;  %v2506_v45 = vpop.f32.mrb[171].mxu1 }
 0x2ab   : > { %7182 = vst [vmem:[#allocation35_spill] sm:$0xff] %v6659_v53  ;;  %v3769_v31 = vpop.f32.mrb[156].mxu0 }
 0x2ac   : > { %v6664_v3 = vadd.f32 %v3769_v31, %v6481_v20  ;;  %v2024_v8 = vpop.f32.mrb[157].mxu0 }
 0x2ad   : > { %v6667_v51 = vadd.f32 %v2024_v8, %v6474_v17  ;;  %v6669_v15 = vpop.f32.mrb[172].mxu1  ;;  %v6684_v17 = vld [vmem:[%s6958_s2] ss:$0 sm:$0xff] }
 0x2ae   : > { %7183 = vst [vmem:[#allocation39_spill] sm:$0xff] %v6664_v3  ;;  %v2511_v4 = vpop.f32.mrb[173].mxu1 }
 0x2af   : > { %7184 = vst [vmem:[#allocation21_spill] sm:$0xff] %v6667_v51  ;;  %v3772_v14 = vpop.f32.mrb[158].mxu0 }
 0x2b0   : > { %v6672_v49 = vadd.f32 %v3772_v14, %v6495_v2  ;;  %v2034_v61 = vpop.f32.mrb[159].mxu0 }
 0x2b1   : > { %v6675_v18 = vadd.f32 %v2034_v61, %v6488_v22  ;;  %v6677_v45 = vpop.f32.mrb[174].mxu1 }
 0x2b2   : > { %7185 = vst [vmem:[#allocation43_spill] sm:$0xff] %v6672_v49  ;;  %v2516_v53 = vpop.f32.mrb[175].mxu1 }
 0x2b3   : > { %7186 = vst [vmem:[#allocation45_spill] sm:$0xff] %v6675_v18  ;;  %v3807_v20 = vpop.f32.mrb[160].mxu0 }
 0x2b4   : > { %v2710_v31 = vadd.f32 %v3807_v20, %v6513_v48  ;;  %v2704_v3 = vpop.f32.mrb[161].mxu0 }
 0x2b5   : > { %v6686_v8 = vpop.f32.mrb[176].mxu1  ;;  %v2705_v2 = vadd.f32 %v2704_v3, %v6505_v19 }
 0x2b6   : > { %v2944_v22 = vadd.f32 %v2710_v31, %v6500_v38  ;;  %v2521_v4 = vpop.f32.mrb[177].mxu1 }
 0x2b7   : > { %v2943_v14 = vadd.f32 %v2705_v2, %v6503_v46  ;;  %v3810_v53 = vpop.f32.mrb[162].mxu0 }
 0x2b8   : > { %v2999_v61 = vadd.f32 %v6684_v17, %v2944_v22  ;;  %v2720_v48 = vadd.f32 %v3810_v53, %v6525_v11  ;;  %v2714_v20 = vpop.f32.mrb[163].mxu0 }
 0x2b9   : > { %v2998_v49 = vadd.f32 %v6684_v17, %v2943_v14  ;;  %v6694_v18 = vpop.f32.mrb[178].mxu1  ;;  %v2715_v51 = vadd.f32 %v2714_v20, %v6519_v16 }
 0x2ba   : > { %v3047_v28 = vmax.f32 %v2999_v61, 0.0  ;;  %v2946_v19 = vadd.f32 %v2720_v48, %v6508_v25  ;;  %v2526_v3 = vpop.f32.mrb[179].mxu1 }
 0x2bb   : > { %v3046_v38 = vmax.f32 %v2998_v49, 0.0  ;;  %v2945_v31 = vadd.f32 %v2715_v51, %v6511_v36  ;;  %v3813_v46 = vpop.f32.mrb[164].mxu0 }
 0x2bc   : > { %3095 = vst [vmem:[%s6699_s10 + $0x8] sm:$0xff] %v3047_v28  ;;  %v3001_v11 = vadd.f32 %v6684_v17, %v2946_v19  ;;  %v2730_v2 = vadd.f32 %v3813_v46, %v6537_v27  ;;  %v2724_v16 = vpop.f32.mrb[165].mxu0 }
 0x2bd   : > { %3094 = vst [vmem:[%s6699_s10] sm:$0xff] %v3046_v38  ;;  %v3000_v25 = vadd.f32 %v6684_v17, %v2945_v31  ;;  %v6706_v22 = vpop.f32.mrb[180].mxu1  ;;  %v2725_v36 = vadd.f32 %v2724_v16, %v6531_v34  ;;  %v7187_v31 = vld [vmem:[#allocation17_spill] sm:$0xff] }
 0x2be   : > { %v3049_v49 = vmax.f32 %v3001_v11, 0.0  ;;  %v2948_v51 = vadd.f32 %v2730_v2, %v6515_v40  ;;  %v2531_v4 = vpop.f32.mrb[181].mxu1 }
 0x2bf   : > { %v3048_v14 = vmax.f32 %v3000_v25, 0.0  ;;  %v2947_v28 = vadd.f32 %v2725_v36, %v6517_v30  ;;  %v3816_v53 = vpop.f32.mrb[166].mxu0 }
 0x2c0   : > { %3097 = vst [vmem:[%s6699_s10 + $0x18] sm:$0xff] %v3049_v49  ;;  %v3003_v27 = vadd.f32 %v6684_v17, %v2948_v51  ;;  %v2740_v61 = vadd.f32 %v3816_v53, %v6549_v7  ;;  %v2734_v48 = vpop.f32.mrb[167].mxu0 }
 0x2c1   : > { %3096 = vst [vmem:[%s6699_s10 + $0x10] sm:$0xff] %v3048_v14  ;;  %v3002_v20 = vadd.f32 %v6684_v17, %v2947_v28  ;;  %v6716_v34 = vpop.f32.mrb[182].mxu1  ;;  %v2735_v40 = vadd.f32 %v2734_v48, %v6543_v6  ;;  %v7188_v14 = vld [vmem:[#allocation16_spill] sm:$0xff] }
 0x2c2   : > { %v3051_v19 = vmax.f32 %v3003_v27, 0.0  ;;  %v2950_v3 = vadd.f32 %v2740_v61, %v6521_v35  ;;  %v2536_v30 = vpop.f32.mrb[183].mxu1 }
 0x2c3   : > { %v3050_v38 = vmax.f32 %v3002_v20, 0.0  ;;  %v2949_v46 = vadd.f32 %v2735_v40, %v7187_v31  ;;  %v3819_v11 = vpop.f32.mrb[168].mxu0  ;;  %v7189_v30 = vld [vmem:[#allocation18_spill] sm:$0xff] }
 0x2c4   : > { %3099 = vst [vmem:[%s6699_s10 + $0x28] sm:$0xff] %v3051_v19  ;;  %v3005_v7 = vadd.f32 %v6684_v17, %v2950_v3  ;;  %v2750_v2 = vadd.f32 %v3819_v11, %v6565_v9  ;;  %v2744_v16 = vpop.f32.mrb[169].mxu0 }
 0x2c5   : > { %3098 = vst [vmem:[%s6699_s10 + $0x20] sm:$0xff] %v3050_v38  ;;  %v3004_v25 = vadd.f32 %v6684_v17, %v2949_v46  ;;  %v6726_v6 = vpop.f32.mrb[184].mxu1  ;;  %v2745_v35 = vadd.f32 %v2744_v16, %v6557_v52 }
 0x2c6   : > { %v3053_v36 = vmax.f32 %v3005_v7, 0.0  ;;  %v2952_v49 = vadd.f32 %v2750_v2, %v6527_v21  ;;  %v2541_v51 = vpop.f32.mrb[185].mxu1 }
 0x2c7   : > { %v3052_v4 = vmax.f32 %v3004_v25, 0.0  ;;  %v2951_v28 = vadd.f32 %v2745_v35, %v7188_v14  ;;  %v3822_v53 = vpop.f32.mrb[170].mxu0 }
 0x2c8   : > { %3101 = vst [vmem:[%s6699_s10 + $0x38] sm:$0xff] %v3053_v36  ;;  %v3007_v9 = vadd.f32 %v6684_v17, %v2952_v49  ;;  %v2760_v27 = vadd.f32 %v3822_v53, %v6581_v54  ;;  %v2754_v61 = vpop.f32.mrb[171].mxu0  ;;  %v7190_v36 = vld [vmem:[#allocation23_spill] sm:$0xff] }
 0x2c9   : > { %3100 = vst [vmem:[%s6699_s10 + $0x30] sm:$0xff] %v3052_v4  ;;  %v3006_v48 = vadd.f32 %v6684_v17, %v2951_v28  ;;  %v6736_v52 = vpop.f32.mrb[186].mxu1  ;;  %v2755_v21 = vadd.f32 %v2754_v61, %v6573_v58 }
 0x2ca   : > { %v3055_v20 = vmax.f32 %v3007_v9, 0.0  ;;  %v2954_v40 = vadd.f32 %v2760_v27, %v6533_v55  ;;  %v2546_v19 = vpop.f32.mrb[187].mxu1 }
 0x2cb   : > { %v3054_v3 = vmax.f32 %v3006_v48, 0.0  ;;  %v2953_v38 = vadd.f32 %v2755_v21, %v7189_v30  ;;  %v3825_v31 = vpop.f32.mrb[172].mxu0 }
 0x2cc   : > { %3103 = vst [vmem:[%s6699_s10 + $0x48] sm:$0xff] %v3055_v20  ;;  %v3009_v54 = vadd.f32 %v6684_v17, %v2954_v40  ;;  %v2770_v46 = vadd.f32 %v3825_v31, %v6597_v37  ;;  %v2764_v11 = vpop.f32.mrb[173].mxu0  ;;  %v7191_v31 = vld [vmem:[#allocation22_spill] sm:$0xff] }
 0x2cd   : > { %3102 = vst [vmem:[%s6699_s10 + $0x40] sm:$0xff] %v3054_v3  ;;  %v3008_v7 = vadd.f32 %v6684_v17, %v2953_v38  ;;  %v6746_v58 = vpop.f32.mrb[188].mxu1  ;;  %v2765_v55 = vadd.f32 %v2764_v11, %v6589_v23 }
 0x2ce   : > { %v3057_v2 = vmax.f32 %v3009_v54, 0.0  ;;  %v2956_v16 = vadd.f32 %v2770_v46, %v6539_v44  ;;  %v2551_v25 = vpop.f32.mrb[189].mxu1 }
 0x2cf   : > { %v3056_v35 = vmax.f32 %v3008_v7, 0.0  ;;  %v2955_v49 = vadd.f32 %v2765_v55, %v7190_v36  ;;  %v3828_v51 = vpop.f32.mrb[174].mxu0  ;;  %v7192_v36 = vld [vmem:[#allocation25_spill] sm:$0xff] }
 0x2d0   : > { %3105 = vst [vmem:[%s6699_s10 + $0x58] sm:$0xff] %v3057_v2  ;;  %v3011_v37 = vadd.f32 %v6684_v17, %v2956_v16  ;;  %v2780_v4 = vadd.f32 %v3828_v51, %v6613_v33  ;;  %v2774_v14 = vpop.f32.mrb[175].mxu0 }
 0x2d1   : > { %3104 = vst [vmem:[%s6699_s10 + $0x50] sm:$0xff] %v3056_v35  ;;  %v3010_v28 = vadd.f32 %v6684_v17, %v2955_v49  ;;  %v6756_v23 = vpop.f32.mrb[190].mxu1  ;;  %v2775_v44 = vadd.f32 %v2774_v14, %v6605_v12 }
 0x2d2   : > { %v3059_v53 = vmax.f32 %v3011_v37, 0.0  ;;  %v2958_v9 = vadd.f32 %v2780_v4, %v6545_v59  ;;  %v2556_v27 = vpop.f32.mrb[191].mxu1 }
 0x2d3   : > { %v3058_v61 = vmax.f32 %v3010_v28, 0.0  ;;  %v2957_v48 = vadd.f32 %v2775_v44, %v6547_v50  ;;  %v3831_v21 = vpop.f32.mrb[176].mxu0  ;;  %v7193_v27 = vld [vmem:[#allocation20_spill] sm:$0xff] }
 0x2d4   : > { %3107 = vst [vmem:[%s6699_s10 + $0x68] sm:$0xff] %v3059_v53  ;;  %v3013_v33 = vadd.f32 %v6684_v17, %v2958_v9  ;;  %v2790_v20 = vadd.f32 %v3831_v21, %v6629_v56  ;;  %v2784_v40 = vpop.f32.mrb[177].mxu0 }
 0x2d5   : > { %3106 = vst [vmem:[%s6699_s10 + $0x60] sm:$0xff] %v3058_v61  ;;  %v3012_v19 = vadd.f32 %v6684_v17, %v2957_v48  ;;  %v6766_v12 = vpop.f32.mrb[192].mxu1  ;;  %v2785_v59 = vadd.f32 %v2784_v40, %v6621_v29 }
 0x2d6   : > { %v3061_v3 = vmax.f32 %v3013_v33, 0.0  ;;  %v2960_v30 = vadd.f32 %v2790_v20, %v6552_v41  ;;  %v2561_v50 = vpop.f32.mrb[193].mxu1 }
 0x2d7   : > { %v3060_v38 = vmax.f32 %v3012_v19, 0.0  ;;  %v2959_v54 = vadd.f32 %v2785_v59, %v7191_v31  ;;  %v3834_v46 = vpop.f32.mrb[178].mxu0 }
 0x2d8   : > { %3109 = vst [vmem:[%s6699_s10 + $0x78] sm:$0xff] %v3061_v3  ;;  %v3015_v56 = vadd.f32 %v6684_v17, %v2960_v30  ;;  %v2800_v11 = vadd.f32 %v3834_v46, %v6645_v60  ;;  %v2794_v7 = vpop.f32.mrb[179].mxu0  ;;  %v7194_v30 = vld [vmem:[#allocation28_spill] sm:$0xff] }
 0x2d9   : > { %3108 = vst [vmem:[%s6699_s10 + $0x70] sm:$0xff] %v3060_v38  ;;  %v3014_v55 = vadd.f32 %v6684_v17, %v2959_v54  ;;  %v6776_v29 = vpop.f32.mrb[194].mxu1  ;;  %v2795_v41 = vadd.f32 %v2794_v7, %v6637_v43 }
 0x2da   : > { %v3063_v2 = vmax.f32 %v3015_v56, 0.0  ;;  %v2962_v16 = vadd.f32 %v2800_v11, %v6560_v0  ;;  %v2566_v25 = vpop.f32.mrb[195].mxu1 }
 0x2db   : > { %v3062_v35 = vmax.f32 %v3014_v55, 0.0  ;;  %v2961_v49 = vadd.f32 %v2795_v41, %v7192_v36  ;;  %v3837_v51 = vpop.f32.mrb[180].mxu0  ;;  %v7195_v41 = vld [vmem:[#allocation26_spill] sm:$0xff] }
 0x2dc   : > { %3111 = vst [vmem:[%s6699_s10 + $0x88] sm:$0xff] %v3063_v2  ;;  %v3017_v60 = vadd.f32 %v6684_v17, %v2962_v16  ;;  %v2810_v37 = vadd.f32 %v3837_v51, %v6661_v24  ;;  %v2804_v4 = vpop.f32.mrb[181].mxu0 }
 0x2dd   : > { %3110 = vst [vmem:[%s6699_s10 + $0x80] sm:$0xff] %v3062_v35  ;;  %v3016_v14 = vadd.f32 %v6684_v17, %v2961_v49  ;;  %v6786_v43 = vpop.f32.mrb[196].mxu1  ;;  %v2805_v0 = vadd.f32 %v2804_v4, %v6653_v62  ;;  %v7196_v4 = vld [vmem:[#allocation24_spill] sm:$0xff] }
 0x2de   : > { %v3065_v28 = vmax.f32 %v3017_v60, 0.0  ;;  %v2964_v44 = vadd.f32 %v2810_v37, %v6568_v1  ;;  %v2571_v53 = vpop.f32.mrb[197].mxu1 }
 0x2df   : > { %v3064_v9 = vmax.f32 %v3016_v14, 0.0  ;;  %v2963_v61 = vadd.f32 %v2805_v0, %v7193_v27  ;;  %v3840_v48 = vpop.f32.mrb[182].mxu0 }
 0x2e0   : > { %3113 = vst [vmem:[%s6699_s10 + $0x98] sm:$0xff] %v3065_v28  ;;  %v3019_v24 = vadd.f32 %v6684_v17, %v2964_v44  ;;  %v2820_v21 = vadd.f32 %v3840_v48, %v6677_v45  ;;  %v2814_v33 = vpop.f32.mrb[183].mxu0 }
 0x2e1   : > { %3112 = vst [vmem:[%s6699_s10 + $0x90] sm:$0xff] %v3064_v9  ;;  %v3018_v20 = vadd.f32 %v6684_v17, %v2963_v61  ;;  %v6796_v62 = vpop.f32.mrb[198].mxu1  ;;  %v2815_v1 = vadd.f32 %v2814_v33, %v6669_v15 }
 0x2e2   : > { %v3067_v40 = vmax.f32 %v3019_v24, 0.0  ;;  %v2966_v19 = vadd.f32 %v2820_v21, %v6576_v10  ;;  %v2576_v59 = vpop.f32.mrb[199].mxu1  ;;  %v7197_v24 = vld [vmem:[#allocation37_spill] sm:$0xff] }
 0x2e3   : > { %v3066_v3 = vmax.f32 %v3018_v20, 0.0  ;;  %v2965_v50 = vadd.f32 %v2815_v1, %v7194_v30  ;;  %v3843_v38 = vpop.f32.mrb[184].mxu0 }
 0x2e4   : > { %3115 = vst [vmem:[%s6699_s10 + $0xa8] sm:$0xff] %v3067_v40  ;;  %v3021_v45 = vadd.f32 %v6684_v17, %v2966_v19  ;;  %v2830_v31 = vadd.f32 %v3843_v38, %v6694_v18  ;;  %v2824_v54 = vpop.f32.mrb[185].mxu0 }
 0x2e5   : > { %3114 = vst [vmem:[%s6699_s10 + $0xa0] sm:$0xff] %v3066_v3  ;;  %v3020_v46 = vadd.f32 %v6684_v17, %v2965_v50  ;;  %v6806_v15 = vpop.f32.mrb[200].mxu1  ;;  %v2825_v10 = vadd.f32 %v2824_v54, %v6686_v8  ;;  %v7198_v50 = vld [vmem:[#allocation29_spill] sm:$0xff] }
 0x2e6   : > { %v3069_v56 = vmax.f32 %v3021_v45, 0.0  ;;  %v2968_v11 = vadd.f32 %v2830_v31, %v6584_v63  ;;  %v2581_v7 = vpop.f32.mrb[201].mxu1 }
 0x2e7   : > { %v3068_v55 = vmax.f32 %v3020_v46, 0.0  ;;  %v2967_v2 = vadd.f32 %v2825_v10, %v7195_v41  ;;  %v3846_v16 = vpop.f32.mrb[186].mxu0 }
 0x2e8   : > { %3117 = vst [vmem:[%s6699_s10 + $0xb8] sm:$0xff] %v3069_v56  ;;  %v3023_v18 = vadd.f32 %v6684_v17, %v2968_v11  ;;  %v2840_v25 = vadd.f32 %v3846_v16, %v6716_v34  ;;  %v2834_v35 = vpop.f32.mrb[187].mxu0 }
 0x2e9   : > { %3116 = vst [vmem:[%s6699_s10 + $0xb0] sm:$0xff] %v3068_v55  ;;  %v3022_v36 = vadd.f32 %v6684_v17, %v2967_v2  ;;  %v6816_v8 = vpop.f32.mrb[202].mxu1  ;;  %v2835_v63 = vadd.f32 %v2834_v35, %v6706_v22  ;;  %v7199_v55 = vld [vmem:[#allocation27_spill] sm:$0xff] }
 0x2ea   : > { %v3071_v49 = vmax.f32 %v3023_v18, 0.0  ;;  %v2970_v51 = vadd.f32 %v2840_v25, %v6592_v26  ;;  %v2586_v60 = vpop.f32.mrb[203].mxu1 }
 0x2eb   : > { %v3070_v37 = vmax.f32 %v3022_v36, 0.0  ;;  %v2969_v14 = vadd.f32 %v2835_v63, %v7196_v4  ;;  %v3849_v0 = vpop.f32.mrb[188].mxu0 }
 0x2ec   : > { %3119 = vst [vmem:[%s6699_s10 + $0xc8] sm:$0xff] %v3071_v49  ;;  %v3025_v34 = vadd.f32 %v6684_v17, %v2970_v51  ;;  %v2850_v28 = vadd.f32 %v3849_v0, %v6736_v52  ;;  %v2844_v44 = vpop.f32.mrb[189].mxu0  ;;  %v7200_v51 = vld [vmem:[#allocation31_spill] sm:$0xff] }
 0x2ed   : > { %3118 = vst [vmem:[%s6699_s10 + $0xc0] sm:$0xff] %v3070_v37  ;;  %v3024_v53 = vadd.f32 %v6684_v17, %v2969_v14  ;;  %v6826_v22 = vpop.f32.mrb[204].mxu1  ;;  %v2845_v26 = vadd.f32 %v2844_v44, %v6726_v6 }
 0x2ee   : > { %v3073_v9 = vmax.f32 %v3025_v34, 0.0  ;;  %v2972_v27 = vadd.f32 %v2850_v28, %v6600_v39  ;;  %v2591_v61 = vpop.f32.mrb[205].mxu1 }
 0x2ef   : > { %v3072_v48 = vmax.f32 %v3024_v53, 0.0  ;;  %v2971_v21 = vadd.f32 %v2845_v26, %v7197_v24  ;;  %v3852_v33 = vpop.f32.mrb[190].mxu0  ;;  %v7201_v26 = vld [vmem:[#allocation30_spill] sm:$0xff] }
 0x2f0   : > { %3121 = vst [vmem:[%s6699_s10 + $0xd8] sm:$0xff] %v3073_v9  ;;  %v3027_v52 = vadd.f32 %v6684_v17, %v2972_v27  ;;  %v2860_v20 = vadd.f32 %v3852_v33, %v6756_v23  ;;  %v2854_v1 = vpop.f32.mrb[191].mxu0 }
 0x2f1   : > { %3120 = vst [vmem:[%s6699_s10 + $0xd0] sm:$0xff] %v3072_v48  ;;  %v3026_v40 = vadd.f32 %v6684_v17, %v2971_v21  ;;  %v2594_v6 = vpop.f32.mrb[206].mxu1  ;;  %v2855_v19 = vadd.f32 %v2854_v1, %v6746_v58  ;;  %v7202_v1 = vld [vmem:[#allocation33_spill] sm:$0xff] }
 0x2f2   : > { %v3075_v39 = vmax.f32 %v3027_v52, 0.0  ;;  %v2974_v59 = vadd.f32 %v2860_v20, %v6608_v42  ;;  %v2596_v3 = vpop.f32.mrb[207].mxu1 }
 0x2f3   : > { %v3074_v30 = vmax.f32 %v3026_v40, 0.0  ;;  %v2973_v38 = vadd.f32 %v2855_v19, %v7198_v50  ;;  %v3855_v45 = vpop.f32.mrb[192].mxu0 }
 0x2f4   : > { %3123 = vst [vmem:[%s6699_s10 + $0xe8] sm:$0xff] %v3075_v39  ;;  %v3029_v23 = vadd.f32 %v6684_v17, %v2974_v59  ;;  %v2870_v31 = vadd.f32 %v3855_v45, %v6776_v29  ;;  %v2864_v54 = vpop.f32.mrb[193].mxu0 }
 0x2f5   : > { %3122 = vst [vmem:[%s6699_s10 + $0xe0] sm:$0xff] %v3074_v30  ;;  %v3028_v46 = vadd.f32 %v6684_v17, %v2973_v38  ;;  %v2599_v58 = vpop.f32.mrb[208].mxu1  ;;  %v2865_v10 = vadd.f32 %v2864_v54, %v6766_v12 }
 0x2f6   : > { %v3077_v42 = vmax.f32 %v3029_v23, 0.0  ;;  %v2976_v56 = vadd.f32 %v2870_v31, %v6616_v5  ;;  %v2601_v11 = vpop.f32.mrb[209].mxu1  ;;  %v7203_v23 = vld [vmem:[#allocation32_spill] sm:$0xff] }
 0x2f7   : > { %v3076_v7 = vmax.f32 %v3028_v46, 0.0  ;;  %v2975_v41 = vadd.f32 %v2865_v10, %v7199_v55  ;;  %v3858_v2 = vpop.f32.mrb[194].mxu0  ;;  %v7204_v55 = vld [vmem:[#allocation36_spill] sm:$0xff] }
 0x2f8   : > { %3125 = vst [vmem:[%s6699_s10 + $0xf8] sm:$0xff] %v3077_v42  ;;  %v3031_v29 = vadd.f32 %v6684_v17, %v2976_v56  ;;  %v2880_v16 = vadd.f32 %v3858_v2, %v6796_v62  ;;  %v2874_v18 = vpop.f32.mrb[195].mxu0 }
 0x2f9   : > { %3124 = vst [vmem:[%s6699_s10 + $0xf0] sm:$0xff] %v3076_v7  ;;  %v3030_v25 = vadd.f32 %v6684_v17, %v2975_v41  ;;  %v2604_v12 = vpop.f32.mrb[210].mxu1  ;;  %v2875_v35 = vadd.f32 %v2874_v18, %v6786_v43 }
 0x2fa   : > { %v3079_v5 = vmax.f32 %v3031_v29, 0.0  ;;  %v2978_v36 = vadd.f32 %v2880_v16, %v6624_v47  ;;  %v2606_v63 = vpop.f32.mrb[211].mxu1  ;;  %v7205_v29 = vld [vmem:[#allocation35_spill] sm:$0xff] }
 0x2fb   : > { %v3078_v49 = vmax.f32 %v3030_v25, 0.0  ;;  %v2977_v60 = vadd.f32 %v2875_v35, %v7200_v51  ;;  %v3861_v37 = vpop.f32.mrb[196].mxu0  ;;  %v7206_v51 = vld [vmem:[#allocation39_spill] sm:$0xff] }
 0x2fc   : > { %3127 = vst [vmem:[%s6699_s10 + $0x108] sm:$0xff] %v3079_v5  ;;  %v3033_v62 = vadd.f32 %v6684_v17, %v2978_v36  ;;  %v2890_v4 = vadd.f32 %v3861_v37, %v6816_v8  ;;  %v2884_v14 = vpop.f32.mrb[197].mxu0 }
 0x2fd   : > { %3126 = vst [vmem:[%s6699_s10 + $0x100] sm:$0xff] %v3078_v49  ;;  %v3032_v0 = vadd.f32 %v6684_v17, %v2977_v60  ;;  %v2609_v43 = vpop.f32.mrb[212].mxu1  ;;  %v2885_v34 = vadd.f32 %v2884_v14, %v6806_v15 }
 0x2fe   : > { %v3081_v47 = vmax.f32 %v3033_v62, 0.0  ;;  %v2980_v28 = vadd.f32 %v2890_v4, %v6632_v32  ;;  %v2611_v44 = vpop.f32.mrb[213].mxu1  ;;  %v7207_v4 = vld [vmem:[#allocation21_spill] sm:$0xff] }
 0x2ff   : > { %v3080_v53 = vmax.f32 %v3032_v0, 0.0  ;;  %v2979_v9 = vadd.f32 %v2885_v34, %v7201_v26  ;;  %v3864_v27 = vpop.f32.mrb[198].mxu0 }
 0x300   : > { %3129 = vst [vmem:[%s6699_s10 + $0x118] sm:$0xff] %v3081_v47  ;;  %v3035_v8 = vadd.f32 %v6684_v17, %v2980_v28  ;;  %v2900_v61 = vadd.f32 %v3864_v27, %v2594_v6  ;;  %v2894_v48 = vpop.f32.mrb[199].mxu0 }
 0x301   : > { %3128 = vst [vmem:[%s6699_s10 + $0x110] sm:$0xff] %v3080_v53  ;;  %v3034_v24 = vadd.f32 %v6684_v17, %v2979_v9  ;;  %v2614_v21 = vpop.f32.mrb[214].mxu1  ;;  %v2895_v15 = vadd.f32 %v2894_v48, %v6826_v22  ;;  %v7209_v48 = vld [vmem:[#allocation43_spill] sm:$0xff] }
 0x302   : > { %v3083_v33 = vmax.f32 %v3035_v8, 0.0  ;;  %v2982_v32 = vadd.f32 %v2900_v61, %v6640_v13  ;;  %v2616_v52 = vpop.f32.mrb[215].mxu1  ;;  %v7208_v8 = vld [vmem:[#allocation45_spill] sm:$0xff] }
 0x303   : > { %v3082_v20 = vmax.f32 %v3034_v24, 0.0  ;;  %v2981_v40 = vadd.f32 %v2895_v15, %v7202_v1  ;;  %v3867_v19 = vpop.f32.mrb[200].mxu0 }
 0x304   : > { %3131 = vst [vmem:[%s6699_s10 + $0x128] sm:$0xff] %v3083_v33  ;;  %v3037_v6 = vadd.f32 %v6684_v17, %v2982_v32  ;;  %v2910_v39 = vadd.f32 %v3867_v19, %v2604_v12  ;;  %v2904_v59 = vpop.f32.mrb[201].mxu0 }
 0x305   : > { %3130 = vst [vmem:[%s6699_s10 + $0x120] sm:$0xff] %v3082_v20  ;;  %v3036_v3 = vadd.f32 %v6684_v17, %v2981_v40  ;;  %v2619_v30 = vpop.f32.mrb[216].mxu1  ;;  %v2905_v22 = vadd.f32 %v2904_v59, %v2599_v58 }
 0x306   : > { %v3085_v50 = vmax.f32 %v3037_v6, 0.0  ;;  %v2984_v13 = vadd.f32 %v2910_v39, %v6648_v57  ;;  %v2621_v38 = vpop.f32.mrb[217].mxu1 }
 0x307   : > { %v3084_v45 = vmax.f32 %v3036_v3, 0.0  ;;  %v2983_v31 = vadd.f32 %v2905_v22, %v7203_v23  ;;  %v3870_v54 = vpop.f32.mrb[202].mxu0 }
 0x308   : > { %3133 = vst [vmem:[%s6699_s10 + $0x138] sm:$0xff] %v3085_v50  ;;  %v3039_v46 = vadd.f32 %v6684_v17, %v2984_v13  ;;  %v2920_v10 = vadd.f32 %v3870_v54, %v2614_v21  ;;  %v2914_v42 = vpop.f32.mrb[203].mxu0 }
 0x309   : > { %3132 = vst [vmem:[%s6699_s10 + $0x130] sm:$0xff] %v3084_v45  ;;  %v3038_v56 = vadd.f32 %v6684_v17, %v2983_v31  ;;  %v2624_v11 = vpop.f32.mrb[218].mxu1  ;;  %v2915_v58 = vadd.f32 %v2914_v42, %v2609_v43 }
 0x30a   : > { %v3087_v7 = vmax.f32 %v3039_v46, 0.0  ;;  %v2986_v57 = vadd.f32 %v2920_v10, %v7204_v55  ;;  %v2626_v41 = vpop.f32.mrb[219].mxu1 }
 0x30b   : > { %v3086_v2 = vmax.f32 %v3038_v56, 0.0  ;;  %v2985_v16 = vadd.f32 %v2915_v58, %v7205_v29  ;;  %v3873_v18 = vpop.f32.mrb[204].mxu0 }
 0x30c   : > { %3135 = vst [vmem:[%s6699_s10 + $0x148] sm:$0xff] %v3087_v7  ;;  %v3041_v25 = vadd.f32 %v6684_v17, %v2986_v57  ;;  %v2930_v12 = vadd.f32 %v3873_v18, %v2624_v11  ;;  %v2924_v35 = vpop.f32.mrb[205].mxu0 }
 0x30d   : > { %3134 = vst [vmem:[%s6699_s10 + $0x140] sm:$0xff] %v3086_v2  ;;  %v3040_v5 = vadd.f32 %v6684_v17, %v2985_v16  ;;  %v2629_v36 = vpop.f32.mrb[220].mxu1  ;;  %v2925_v63 = vadd.f32 %v2924_v35, %v2619_v30 }
 0x30e   : > { %v3089_v49 = vmax.f32 %v3041_v25, 0.0  ;;  %v2988_v60 = vadd.f32 %v2930_v12, %v7206_v51  ;;  %v2631_v37 = vpop.f32.mrb[221].mxu1 }
 0x30f   : > { %v3088_v62 = vmax.f32 %v3040_v5, 0.0  ;;  %v2987_v14 = vadd.f32 %v2925_v63, %v7207_v4  ;;  %v3876_v0 = vpop.f32.mrb[206].mxu0 }
 0x310   : > { %3137 = vst [vmem:[%s6699_s10 + $0x158] sm:$0xff] %v3089_v49  ;;  %v3043_v43 = vadd.f32 %v6684_v17, %v2988_v60  ;;  %v2934_v34 = vpop.f32.mrb[207].mxu0 }
 0x311   : > { %3136 = vst [vmem:[%s6699_s10 + $0x150] sm:$0xff] %v3088_v62  ;;  %v3042_v47 = vadd.f32 %v6684_v17, %v2987_v14  ;;  %v2634_v28 = vpop.f32.mrb[222].mxu1  ;;  %v2935_v44 = vadd.f32 %v2934_v34, %v2629_v36 }
 0x312   : > { %v3091_v53 = vmax.f32 %v3043_v43, 0.0  ;;  %v2940_v26 = vadd.f32 %v3876_v0, %v2634_v28  ;;  %v2636_v9 = vpop.f32.mrb[223].mxu1 }
 0x313   : > { %v3090_v27 = vmax.f32 %v3042_v47, 0.0  ;;  %v2989_v61 = vadd.f32 %v2935_v44, %v7208_v8 }
 0x314   : > { %3139 = vst [vmem:[%s6699_s10 + $0x168] sm:$0xff] %v3091_v53  ;;  %v2990_v24 = vadd.f32 %v2940_v26, %v7209_v48 }
 0x315   : > { %3138 = vst [vmem:[%s6699_s10 + $0x160] sm:$0xff] %v3090_v27  ;;  %v3044_v21 = vadd.f32 %v6684_v17, %v2989_v61 }
 0x316   : > { %v3045_v15 = vadd.f32 %v6684_v17, %v2990_v24 }
 0x317   : > { %v3092_v33 = vmax.f32 %v3044_v21, 0.0 }
 0x318   : > { %v3093_v32 = vmax.f32 %v3045_v15, 0.0 }
 0x319   : > { %3140 = vst [vmem:[%s6699_s10 + $0x170] sm:$0xff] %v3092_v33 }
 0x31a   : > { %3141 = vst [vmem:[%s6699_s10 + $0x178] sm:$0xff] %v3093_v32 }
 0x31b   : > { %4300 = shalt.err (!%p4297_p5)
}
 0x31c   : > { %s4301_s6 = scalar_lea.hbm %s6903_s19, 6144  ;;  %s4305_s20 = scalar_lea.hbm %s6959_s3, 12288 }
 0x31d   : > { %p4302_p9 = scmp.ne.s32.totalorder %s6903_s19, %s4301_s6  ;;  %p4306_p3 = scmp.lt.u32.totalorder %s6903_s19, %s6959_s3 }
 0x31e   : > { %p4307_p7 = scmp.lt.u32.totalorder %s4305_s20, %s4301_s6  ;;  %p4309_p4 = scmp.lt.u32.totalorder %s4301_s6, %s6903_s19 }
 0x31f   : > { %p4303_p1 = pnand %p4302_p9, %p4498_p10 }
 0x320   : > { %p4308_p11 = por %p4307_p7, %p4306_p3 }
 0x321   : > { %p4304_p2 = pneg %p4303_p1 }
 0x322   : > { %p4310_p6 = por %p4309_p4, %p4308_p11 }
 0x324   : > { %p4311_p8 = pnand %p4310_p6, %p4304_p2 }
 0x326   : > { %4314 = shalt.err (!%p4311_p8)
}
 0x327   : > { %s4381_s10 = smov 128   ;;  %s4382_s11 = smov 8  }
 0x328   : > { %4144 = dma.vmem_to_hbm [thread:$0]  (%p4498_p10), %s6905_s7, 6144, %s6903_s19, %s3143_s15, %s4381_s10, %s4381_s10, %s4382_s11  }
 0x329 PF: > { %s3172_s8 = sand.u32 1, %s4353_s12   ;;  %p7210_p12 = scmp.ne.s32.totalorder %s7002_s23, 0 }
 0x32a   : > { %p7211_p13 = scmp.ge.s32.totalorder %s4373_s17, 2  ;;  %s3173_s18 = scalar_lea.sflag [#allocation4], %s3172_s8 }
 0x32c   : > { %p4155_p0 = pnand %p7211_p13, %p7210_p12 }
 0x32e   : > { %4348 = dma.done.wait (!%p4155_p0), %s3173_s18, 6144  }
 0x32f   : > { %4350 = vsyncadd (!%p4155_p0), %s3173_s18, 4294961152  ;;  %s20_s17 = sadd.s32 1, %s4373_s17   ;;  %s7212_s12 = smov %s4357_s13 }
 0x330   : > { %p17_p5 = scmp.ge.s32.totalorder %s20_s17, 4   ;;  %s7213_s13 = smov %s4361_s14 }
 0x331   : > { %s7214_s14 = smov %s4507_s5  ;;  %s7215_s15 = smov %s4369_s16 }
 0x332   : > { %s7216_s16 = smov %s7218_s28  ;;  %19 = sbr.rel (!%p17_p5) target bundleno = 7 (0x7), region = 89 }
 0x339   :  { %3178 = vsyncpa [#allocation3], 1 }
 0x33a   :  { %3180 = vsyncpa [#allocation3 + $0x1], 1 }
 0x33b   :  { %3181 = vsyncpa [#allocation6], 1 }
 0x33c   :  { %3182 = vsyncpa [#allocation4], 1 }
 0x33d   :  { %3184 = vsyncpa [#allocation4 + $0x1], 1 }

</bundles_post_ra>
